<compile_context>
chip_gen: v6e
topology: v6e:2x2x1
jax: 0.10.0
libtpu: 0.0.40
codegen_flags: <defaults>
</compile_context>

<pallas_src>
import functools

import jax
import jax.numpy as jnp
from jax.experimental import pallas as pl
from jax.experimental.pallas import tpu as pltpu


def resnet_block_kernel(xpad_ref, xres_ref, w1_ref, w2_ref, out_ref,
                        *, H, W, Cp, eps):
    # xpad_ref : (H+2, W+2, Cp) f32   reflect-padded input (conv1 taps)
    # xres_ref : (H*W,  Cp)     f32   unpadded input, contiguous (residual)
    # w1_ref   : (3, 3*Cp, Cp)  bf16  conv1 weights, [kh, kw*Cp+cin, cout]
    # w2_ref   : (3, 3*Cp, Cp)  bf16  conv2 weights
    # out_ref  : (H*W, Cp)      f32
    inv_n = 1.0 / float(H * W)

    def conv3x3(get_band, w_ref):
        # width-direction im2col: one (H*W, 3*Cp) @ (3*Cp, Cp) matmul per kh.
        acc = None
        for kh in range(3):
            band = get_band(kh)                      # (H, W+2, Cp) f32
            patch = jnp.concatenate(
                [band[:, 0:W, :], band[:, 1:W + 1, :], band[:, 2:W + 2, :]],
                axis=-1,
            ).reshape(H * W, 3 * Cp).astype(jnp.bfloat16)
            d = jnp.dot(patch, w_ref[kh], preferred_element_type=jnp.float32)
            acc = d if acc is None else acc + d
        return acc                                    # (H*W, Cp) f32

    def instance_norm(v):
        # single-pass stats: var = E[x^2] - mean^2
        s = jnp.sum(v, axis=0, keepdims=True)
        ss = jnp.sum(v * v, axis=0, keepdims=True)
        mean = s * inv_n
        var = jnp.maximum(ss * inv_n - mean * mean, 0.0)
        return (v - mean) * jax.lax.rsqrt(var + eps)

    # ---------------- conv1 (+ InstanceNorm + ReLU) ----------------
    # (bias dropped: cancelled by the following InstanceNorm(affine=False))
    y = conv3x3(lambda kh: xpad_ref[kh:kh + H, :, :], w1_ref)
    y = jnp.maximum(instance_norm(y), 0.0)

    # ---------------- reflect pad of y, built as values ----------------
    y3 = y.reshape(H, W, Cp)
    # width reflect pad: (H, W+2, Cp)
    yw = jnp.concatenate([y3[:, 1:2, :], y3, y3[:, W - 2:W - 1, :]], axis=1)
    # height-shifted bands of the (virtually) H-reflect-padded activation
    bands = (
        jnp.concatenate([yw[1:2], yw[0:H - 1]], axis=0),       # rows -1 .. H-2
        yw,                                                     # rows  0 .. H-1
        jnp.concatenate([yw[1:H], yw[H - 2:H - 1]], axis=0),    # rows  1 .. H
    )

    # ---------------- conv2 (+ InstanceNorm) ----------------
    z = conv3x3(lambda kh: bands[kh], w2_ref)
    z = instance_norm(z)

    # ---------------- residual add ----------------
    out_ref[...] = xres_ref[...] + z


def resnet_block_forward(x_nchw, w1, b1, w2, b2, eps=1e-5):
    """x_nchw: (N, C, H, W) f32. Conv weights as (kh*3+kw, Cin, Cout).
    Returns (N, C, H, W) f32.  Biases are accepted for interface parity but
    are mathematically cancelled by InstanceNorm(affine=False) and dropped."""
    del b1, b2
    N, C, H, W = x_nchw.shape
    Cp = max(128, ((C + 127) // 128) * 128)   # lane-pad channels to >= 128

    x = jnp.transpose(x_nchw, (0, 2, 3, 1)).astype(jnp.float32)        # NHWC
    x = jnp.pad(x, ((0, 0), (0, 0), (0, 0), (0, Cp - C)))               # channel pad
    xpad = jnp.pad(x, ((0, 0), (1, 1), (1, 1), (0, 0)), mode="reflect")  # conv1 pad
    x_flat = x.reshape(N, H * W, Cp)                                     # residual

    def prep_w(w):
        wp = jnp.pad(w.astype(jnp.float32),
                     ((0, 0), (0, Cp - C), (0, Cp - C)))                 # (9,Cp,Cp)
        # (9,Cp,Cp) -> (3, 3*Cp, Cp); row index = kw*Cp + cin for fixed kh
        return wp.reshape(3, 3 * Cp, Cp).astype(jnp.bfloat16)

    w1r, w2r = prep_w(w1), prep_w(w2)

    kern = functools.partial(resnet_block_kernel, H=H, W=W, Cp=Cp, eps=eps)

    # explicit VMEM budget (double-buffered blocks + in-kernel temporaries)
    blk_bytes = (
        2 * (H + 2) * (W + 2) * Cp * 4     # padded input
        + 2 * H * W * Cp * 4               # residual input
        + 2 * H * W * Cp * 4               # output
        + 2 * 2 * 3 * 3 * Cp * Cp * 2      # two bf16 weight slabs
        + 10 * H * W * Cp * 4              # im2col patches / accumulators / y,z
    )
    vmem_limit = int(min(max(2 * blk_bytes, 32 * 1024 * 1024), 64 * 1024 * 1024))

    out_flat = pl.pallas_call(
        kern,
        out_shape=jax.ShapeDtypeStruct((N, H * W, Cp), jnp.float32),
        grid_spec=pltpu.PrefetchScalarGridSpec(
            num_scalar_prefetch=0,
            grid=(N,),
            in_specs=[
                pl.BlockSpec((None, H + 2, W + 2, Cp), lambda n: (n, 0, 0, 0)),
                pl.BlockSpec((None, H * W, Cp), lambda n: (n, 0, 0)),
                pl.BlockSpec((3, 3 * Cp, Cp), lambda n: (0, 0, 0)),
                pl.BlockSpec((3, 3 * Cp, Cp), lambda n: (0, 0, 0)),
            ],
            out_specs=pl.BlockSpec((None, H * W, Cp), lambda n: (n, 0, 0)),
        ),
        compiler_params=pltpu.CompilerParams(
            dimension_semantics=("parallel",),
            vmem_limit_bytes=vmem_limit),
    )(xpad, x_flat, w1r, w2r)

    out = out_flat[:, :, :C].reshape(N, H, W, C)
    return jnp.transpose(out, (0, 3, 1, 2))  # back to NCHW


def reference_forward(x_nchw, w1, b1, w2, b2, eps=1e-5):
    """Pure-JAX f32 reference of the PyTorch module (reflect pad, conv+bias,
    InstanceNorm(affine=False), ReLU, reflect pad, conv+bias, InstanceNorm,
    residual add)."""
    N, C, H, W = x_nchw.shape
    x = jnp.transpose(x_nchw, (0, 2, 3, 1)).astype(jnp.float32)  # NHWC
    w1_hwio = w1.reshape(3, 3, C, C)
    w2_hwio = w2.reshape(3, 3, C, C)

    def conv(inp, w, b):
        p = jnp.pad(inp, ((0, 0), (1, 1), (1, 1), (0, 0)), mode="reflect")
        y = jax.lax.conv_general_dilated(
            p, w, window_strides=(1, 1), padding="VALID",
            dimension_numbers=("NHWC", "HWIO", "NHWC"))
        return y + b.reshape(1, 1, 1, C)

    def inorm(v):
        m = jnp.mean(v, axis=(1, 2), keepdims=True)
        var = jnp.mean(jnp.square(v - m), axis=(1, 2), keepdims=True)
        return (v - m) * jax.lax.rsqrt(var + eps)

    y = jnp.maximum(inorm(conv(x, w1_hwio, b1)), 0.0)
    z = inorm(conv(y, w2_hwio, b2))
    return jnp.transpose(x + z, (0, 3, 1, 2))


def init_params(key, dim):
    """Deterministic synthetic weights.
    Conv weights stored as (kh*3+kw, Cin, Cout) -- i.e. torch weight
    (Cout, Cin, kh, kw) transposed to (kh, kw, Cin, Cout) then flattened."""
    k1, k2, k3, k4 = jax.random.split(key, 4)
    w1 = jax.random.normal(k1, (9, dim, dim), jnp.float32) * 0.1
    b1 = jax.random.normal(k2, (1, dim), jnp.float32) * 0.1
    w2 = jax.random.normal(k3, (9, dim, dim), jnp.float32) * 0.1
    b2 = jax.random.normal(k4, (1, dim), jnp.float32) * 0.1
    return w1, b1, w2, b2


if __name__ == "__main__":
    key = jax.random.PRNGKey(0)
    kx, kp = jax.random.split(key)

    N, C, H, W = 2, 4, 16, 16          # NCHW, dim = 4
    x = jax.random.normal(kx, (N, C, H, W), jnp.float32)
    w1, b1, w2, b2 = init_params(kp, C)

    out = resnet_block_forward(x, w1, b1, w2, b2)
    jax.block_until_ready(out)
    assert out.shape == (N, C, H, W), out.shape

    # correctness vs pure-JAX f32 reference (kernel uses bf16 MXU inputs)
    ref = reference_forward(x, w1, b1, w2, b2)
    jax.block_until_ready(ref)
    assert jnp.max(jnp.abs(out - ref)) < 0.1, float(jnp.max(jnp.abs(out - ref)))

    print("KERNEL_OK")
</pallas_src>

<mosaic_0001>
module attributes {stable_mosaic.version = 11 : i64} {
  func.func @resnet_block_kernel(%arg0: i32, %arg1: memref<1x18x18x128xf32, #tpu.memory_space<vmem>>, %arg2: memref<1x256x128xf32, #tpu.memory_space<vmem>>, %arg3: memref<3x384x128xbf16, #tpu.memory_space<vmem>>, %arg4: memref<3x384x128xbf16, #tpu.memory_space<vmem>>, %arg5: memref<1x256x128xf32, #tpu.memory_space<vmem>>) attributes {dimension_semantics = [#tpu.dimension_semantics<parallel>], iteration_bounds = array<i64: 2>, scalar_prefetch = 0 : i64, scratch_operands = 0 : i64, tpu.core_type = #tpu.core_type<tc>, window_params = [{transform_indices = @transform_0, window_bounds = array<i64: 1, 18, 18, 128>}, {transform_indices = @transform_1, window_bounds = array<i64: 1, 256, 128>}, {pipeline_mode = #tpu.pipeline_mode<synchronous>, transform_indices = @transform_2, window_bounds = array<i64: 3, 384, 128>}, {pipeline_mode = #tpu.pipeline_mode<synchronous>, transform_indices = @transform_3, window_bounds = array<i64: 3, 384, 128>}, {transform_indices = @transform_4, window_bounds = array<i64: 1, 256, 128>}]} {
    %c0 = arith.constant 0 : index
    %c0_0 = arith.constant 0 : index
    %c0_1 = arith.constant 0 : index
    %c0_2 = arith.constant 0 : index
    %0 = vector.load %arg1[%c0, %c0_0, %c0_1, %c0_2] : memref<1x18x18x128xf32, #tpu.memory_space<vmem>>, vector<1x16x18x128xf32>
    %1 = vector.shape_cast %0 : vector<1x16x18x128xf32> to vector<16x18x128xf32>
    %2 = vector.extract_strided_slice %1 {offsets = [0, 0, 0], sizes = [16, 16, 128], strides = [1, 1, 1]} : vector<16x18x128xf32> to vector<16x16x128xf32>
    %3 = vector.extract_strided_slice %1 {offsets = [0, 1, 0], sizes = [16, 16, 128], strides = [1, 1, 1]} : vector<16x18x128xf32> to vector<16x16x128xf32>
    %4 = vector.extract_strided_slice %1 {offsets = [0, 2, 0], sizes = [16, 16, 128], strides = [1, 1, 1]} : vector<16x18x128xf32> to vector<16x16x128xf32>
    %5 = tpu.concatenate %2, %3, %4 in 2 : vector<16x16x128xf32>, vector<16x16x128xf32>, vector<16x16x128xf32> -> vector<16x16x384xf32>
    %6 = vector.shape_cast %5 : vector<16x16x384xf32> to vector<256x384xf32>
    %7 = arith.truncf %6 : vector<256x384xf32> to vector<256x384xbf16>
    %c0_3 = arith.constant 0 : index
    %c0_4 = arith.constant 0 : index
    %c0_5 = arith.constant 0 : index
    %8 = vector.load %arg3[%c0_3, %c0_4, %c0_5] : memref<3x384x128xbf16, #tpu.memory_space<vmem>>, vector<1x384x128xbf16>
    %9 = vector.shape_cast %8 : vector<1x384x128xbf16> to vector<384x128xbf16>
    %cst = arith.constant dense<0.000000e+00> : vector<256x128xf32>
    %10 = tpu.matmul %7, %9, %cst {dimension_numbers = #tpu.dot_dimension_numbers<[1], [0], [0], [1], [0, 0, 1, 1], [], []>} : vector<256x384xbf16>, vector<384x128xbf16>, vector<256x128xf32> -> vector<256x128xf32>
    %c0_6 = arith.constant 0 : index
    %c1 = arith.constant 1 : index
    %c0_7 = arith.constant 0 : index
    %c0_8 = arith.constant 0 : index
    %11 = vector.load %arg1[%c0_6, %c1, %c0_7, %c0_8] : memref<1x18x18x128xf32, #tpu.memory_space<vmem>>, vector<1x16x18x128xf32>
    %12 = vector.shape_cast %11 : vector<1x16x18x128xf32> to vector<16x18x128xf32>
    %13 = vector.extract_strided_slice %12 {offsets = [0, 0, 0], sizes = [16, 16, 128], strides = [1, 1, 1]} : vector<16x18x128xf32> to vector<16x16x128xf32>
    %14 = vector.extract_strided_slice %12 {offsets = [0, 1, 0], sizes = [16, 16, 128], strides = [1, 1, 1]} : vector<16x18x128xf32> to vector<16x16x128xf32>
    %15 = vector.extract_strided_slice %12 {offsets = [0, 2, 0], sizes = [16, 16, 128], strides = [1, 1, 1]} : vector<16x18x128xf32> to vector<16x16x128xf32>
    %16 = tpu.concatenate %13, %14, %15 in 2 : vector<16x16x128xf32>, vector<16x16x128xf32>, vector<16x16x128xf32> -> vector<16x16x384xf32>
    %17 = vector.shape_cast %16 : vector<16x16x384xf32> to vector<256x384xf32>
    %18 = arith.truncf %17 : vector<256x384xf32> to vector<256x384xbf16>
    %c1_9 = arith.constant 1 : index
    %c0_10 = arith.constant 0 : index
    %c0_11 = arith.constant 0 : index
    %19 = vector.load %arg3[%c1_9, %c0_10, %c0_11] : memref<3x384x128xbf16, #tpu.memory_space<vmem>>, vector<1x384x128xbf16>
    %20 = vector.shape_cast %19 : vector<1x384x128xbf16> to vector<384x128xbf16>
    %cst_12 = arith.constant dense<0.000000e+00> : vector<256x128xf32>
    %21 = tpu.matmul %18, %20, %cst_12 {dimension_numbers = #tpu.dot_dimension_numbers<[1], [0], [0], [1], [0, 0, 1, 1], [], []>} : vector<256x384xbf16>, vector<384x128xbf16>, vector<256x128xf32> -> vector<256x128xf32>
    %22 = arith.addf %10, %21 : vector<256x128xf32>
    %c0_13 = arith.constant 0 : index
    %c2 = arith.constant 2 : index
    %c0_14 = arith.constant 0 : index
    %c0_15 = arith.constant 0 : index
    %23 = vector.load %arg1[%c0_13, %c2, %c0_14, %c0_15] : memref<1x18x18x128xf32, #tpu.memory_space<vmem>>, vector<1x16x18x128xf32>
    %24 = vector.shape_cast %23 : vector<1x16x18x128xf32> to vector<16x18x128xf32>
    %25 = vector.extract_strided_slice %24 {offsets = [0, 0, 0], sizes = [16, 16, 128], strides = [1, 1, 1]} : vector<16x18x128xf32> to vector<16x16x128xf32>
    %26 = vector.extract_strided_slice %24 {offsets = [0, 1, 0], sizes = [16, 16, 128], strides = [1, 1, 1]} : vector<16x18x128xf32> to vector<16x16x128xf32>
    %27 = vector.extract_strided_slice %24 {offsets = [0, 2, 0], sizes = [16, 16, 128], strides = [1, 1, 1]} : vector<16x18x128xf32> to vector<16x16x128xf32>
    %28 = tpu.concatenate %25, %26, %27 in 2 : vector<16x16x128xf32>, vector<16x16x128xf32>, vector<16x16x128xf32> -> vector<16x16x384xf32>
    %29 = vector.shape_cast %28 : vector<16x16x384xf32> to vector<256x384xf32>
    %30 = arith.truncf %29 : vector<256x384xf32> to vector<256x384xbf16>
    %c2_16 = arith.constant 2 : index
    %c0_17 = arith.constant 0 : index
    %c0_18 = arith.constant 0 : index
    %31 = vector.load %arg3[%c2_16, %c0_17, %c0_18] : memref<3x384x128xbf16, #tpu.memory_space<vmem>>, vector<1x384x128xbf16>
    %32 = vector.shape_cast %31 : vector<1x384x128xbf16> to vector<384x128xbf16>
    %cst_19 = arith.constant dense<0.000000e+00> : vector<256x128xf32>
    %33 = tpu.matmul %30, %32, %cst_19 {dimension_numbers = #tpu.dot_dimension_numbers<[1], [0], [0], [1], [0, 0, 1, 1], [], []>} : vector<256x384xbf16>, vector<384x128xbf16>, vector<256x128xf32> -> vector<256x128xf32>
    %34 = arith.addf %22, %33 : vector<256x128xf32>
    %cst_20 = arith.constant dense<0.000000e+00> : vector<128xf32>
    %35 = vector.multi_reduction <add>, %34, %cst_20 [0] : vector<256x128xf32> to vector<128xf32>
    %36 = vector.shape_cast %35 : vector<128xf32> to vector<1x128xf32>
    %37 = arith.mulf %34, %34 : vector<256x128xf32>
    %cst_21 = arith.constant dense<0.000000e+00> : vector<128xf32>
    %38 = vector.multi_reduction <add>, %37, %cst_21 [0] : vector<256x128xf32> to vector<128xf32>
    %39 = vector.shape_cast %38 : vector<128xf32> to vector<1x128xf32>
    %cst_22 = arith.constant 3.906250e-03 : f32
    %40 = vector.broadcast %cst_22 : f32 to vector<1x128xf32>
    %41 = arith.mulf %36, %40 : vector<1x128xf32>
    %cst_23 = arith.constant 3.906250e-03 : f32
    %42 = vector.broadcast %cst_23 : f32 to vector<1x128xf32>
    %43 = arith.mulf %39, %42 : vector<1x128xf32>
    %44 = arith.mulf %41, %41 : vector<1x128xf32>
    %45 = arith.subf %43, %44 : vector<1x128xf32>
    %cst_24 = arith.constant 0.000000e+00 : f32
    %46 = vector.broadcast %cst_24 : f32 to vector<1x128xf32>
    %47 = arith.maximumf %45, %46 : vector<1x128xf32>
    %48 = vector.broadcast %41 : vector<1x128xf32> to vector<256x128xf32>
    %49 = arith.subf %34, %48 : vector<256x128xf32>
    %cst_25 = arith.constant 9.99999974E-6 : f32
    %50 = vector.broadcast %cst_25 : f32 to vector<1x128xf32>
    %51 = arith.addf %47, %50 : vector<1x128xf32>
    %52 = math.rsqrt %51 : vector<1x128xf32>
    %53 = vector.broadcast %52 : vector<1x128xf32> to vector<256x128xf32>
    %54 = arith.mulf %49, %53 : vector<256x128xf32>
    %cst_26 = arith.constant 0.000000e+00 : f32
    %55 = vector.broadcast %cst_26 : f32 to vector<256x128xf32>
    %56 = arith.maximumf %54, %55 : vector<256x128xf32>
    %57 = vector.shape_cast %56 : vector<256x128xf32> to vector<16x16x128xf32>
    %58 = vector.extract_strided_slice %57 {offsets = [0, 1, 0], sizes = [16, 1, 128], strides = [1, 1, 1]} : vector<16x16x128xf32> to vector<16x1x128xf32>
    %59 = vector.extract_strided_slice %57 {offsets = [0, 14, 0], sizes = [16, 1, 128], strides = [1, 1, 1]} : vector<16x16x128xf32> to vector<16x1x128xf32>
    %60 = tpu.concatenate %58, %57, %59 in 1 : vector<16x1x128xf32>, vector<16x16x128xf32>, vector<16x1x128xf32> -> vector<16x18x128xf32>
    %61 = vector.extract_strided_slice %60 {offsets = [1, 0, 0], sizes = [1, 18, 128], strides = [1, 1, 1]} : vector<16x18x128xf32> to vector<1x18x128xf32>
    %62 = vector.extract_strided_slice %60 {offsets = [0, 0, 0], sizes = [15, 18, 128], strides = [1, 1, 1]} : vector<16x18x128xf32> to vector<15x18x128xf32>
    %63 = tpu.concatenate %61, %62 in 0 : vector<1x18x128xf32>, vector<15x18x128xf32> -> vector<16x18x128xf32>
    %64 = vector.extract_strided_slice %60 {offsets = [1, 0, 0], sizes = [15, 18, 128], strides = [1, 1, 1]} : vector<16x18x128xf32> to vector<15x18x128xf32>
    %65 = vector.extract_strided_slice %60 {offsets = [14, 0, 0], sizes = [1, 18, 128], strides = [1, 1, 1]} : vector<16x18x128xf32> to vector<1x18x128xf32>
    %66 = tpu.concatenate %64, %65 in 0 : vector<15x18x128xf32>, vector<1x18x128xf32> -> vector<16x18x128xf32>
    %67 = vector.extract_strided_slice %63 {offsets = [0, 0, 0], sizes = [16, 16, 128], strides = [1, 1, 1]} : vector<16x18x128xf32> to vector<16x16x128xf32>
    %68 = vector.extract_strided_slice %63 {offsets = [0, 1, 0], sizes = [16, 16, 128], strides = [1, 1, 1]} : vector<16x18x128xf32> to vector<16x16x128xf32>
    %69 = vector.extract_strided_slice %63 {offsets = [0, 2, 0], sizes = [16, 16, 128], strides = [1, 1, 1]} : vector<16x18x128xf32> to vector<16x16x128xf32>
    %70 = tpu.concatenate %67, %68, %69 in 2 : vector<16x16x128xf32>, vector<16x16x128xf32>, vector<16x16x128xf32> -> vector<16x16x384xf32>
    %71 = vector.shape_cast %70 : vector<16x16x384xf32> to vector<256x384xf32>
    %72 = arith.truncf %71 : vector<256x384xf32> to vector<256x384xbf16>
    %c0_27 = arith.constant 0 : index
    %c0_28 = arith.constant 0 : index
    %c0_29 = arith.constant 0 : index
    %73 = vector.load %arg4[%c0_27, %c0_28, %c0_29] : memref<3x384x128xbf16, #tpu.memory_space<vmem>>, vector<1x384x128xbf16>
    %74 = vector.shape_cast %73 : vector<1x384x128xbf16> to vector<384x128xbf16>
    %cst_30 = arith.constant dense<0.000000e+00> : vector<256x128xf32>
    %75 = tpu.matmul %72, %74, %cst_30 {dimension_numbers = #tpu.dot_dimension_numbers<[1], [0], [0], [1], [0, 0, 1, 1], [], []>} : vector<256x384xbf16>, vector<384x128xbf16>, vector<256x128xf32> -> vector<256x128xf32>
    %76 = vector.extract_strided_slice %60 {offsets = [0, 0, 0], sizes = [16, 16, 128], strides = [1, 1, 1]} : vector<16x18x128xf32> to vector<16x16x128xf32>
    %77 = vector.extract_strided_slice %60 {offsets = [0, 1, 0], sizes = [16, 16, 128], strides = [1, 1, 1]} : vector<16x18x128xf32> to vector<16x16x128xf32>
    %78 = vector.extract_strided_slice %60 {offsets = [0, 2, 0], sizes = [16, 16, 128], strides = [1, 1, 1]} : vector<16x18x128xf32> to vector<16x16x128xf32>
    %79 = tpu.concatenate %76, %77, %78 in 2 : vector<16x16x128xf32>, vector<16x16x128xf32>, vector<16x16x128xf32> -> vector<16x16x384xf32>
    %80 = vector.shape_cast %79 : vector<16x16x384xf32> to vector<256x384xf32>
    %81 = arith.truncf %80 : vector<256x384xf32> to vector<256x384xbf16>
    %c1_31 = arith.constant 1 : index
    %c0_32 = arith.constant 0 : index
    %c0_33 = arith.constant 0 : index
    %82 = vector.load %arg4[%c1_31, %c0_32, %c0_33] : memref<3x384x128xbf16, #tpu.memory_space<vmem>>, vector<1x384x128xbf16>
    %83 = vector.shape_cast %82 : vector<1x384x128xbf16> to vector<384x128xbf16>
    %cst_34 = arith.constant dense<0.000000e+00> : vector<256x128xf32>
    %84 = tpu.matmul %81, %83, %cst_34 {dimension_numbers = #tpu.dot_dimension_numbers<[1], [0], [0], [1], [0, 0, 1, 1], [], []>} : vector<256x384xbf16>, vector<384x128xbf16>, vector<256x128xf32> -> vector<256x128xf32>
    %85 = arith.addf %75, %84 : vector<256x128xf32>
    %86 = vector.extract_strided_slice %66 {offsets = [0, 0, 0], sizes = [16, 16, 128], strides = [1, 1, 1]} : vector<16x18x128xf32> to vector<16x16x128xf32>
    %87 = vector.extract_strided_slice %66 {offsets = [0, 1, 0], sizes = [16, 16, 128], strides = [1, 1, 1]} : vector<16x18x128xf32> to vector<16x16x128xf32>
    %88 = vector.extract_strided_slice %66 {offsets = [0, 2, 0], sizes = [16, 16, 128], strides = [1, 1, 1]} : vector<16x18x128xf32> to vector<16x16x128xf32>
    %89 = tpu.concatenate %86, %87, %88 in 2 : vector<16x16x128xf32>, vector<16x16x128xf32>, vector<16x16x128xf32> -> vector<16x16x384xf32>
    %90 = vector.shape_cast %89 : vector<16x16x384xf32> to vector<256x384xf32>
    %91 = arith.truncf %90 : vector<256x384xf32> to vector<256x384xbf16>
    %c2_35 = arith.constant 2 : index
    %c0_36 = arith.constant 0 : index
    %c0_37 = arith.constant 0 : index
    %92 = vector.load %arg4[%c2_35, %c0_36, %c0_37] : memref<3x384x128xbf16, #tpu.memory_space<vmem>>, vector<1x384x128xbf16>
    %93 = vector.shape_cast %92 : vector<1x384x128xbf16> to vector<384x128xbf16>
    %cst_38 = arith.constant dense<0.000000e+00> : vector<256x128xf32>
    %94 = tpu.matmul %91, %93, %cst_38 {dimension_numbers = #tpu.dot_dimension_numbers<[1], [0], [0], [1], [0, 0, 1, 1], [], []>} : vector<256x384xbf16>, vector<384x128xbf16>, vector<256x128xf32> -> vector<256x128xf32>
    %95 = arith.addf %85, %94 : vector<256x128xf32>
    %cst_39 = arith.constant dense<0.000000e+00> : vector<128xf32>
    %96 = vector.multi_reduction <add>, %95, %cst_39 [0] : vector<256x128xf32> to vector<128xf32>
    %97 = vector.shape_cast %96 : vector<128xf32> to vector<1x128xf32>
    %98 = arith.mulf %95, %95 : vector<256x128xf32>
    %cst_40 = arith.constant dense<0.000000e+00> : vector<128xf32>
    %99 = vector.multi_reduction <add>, %98, %cst_40 [0] : vector<256x128xf32> to vector<128xf32>
    %100 = vector.shape_cast %99 : vector<128xf32> to vector<1x128xf32>
    %cst_41 = arith.constant 3.906250e-03 : f32
    %101 = vector.broadcast %cst_41 : f32 to vector<1x128xf32>
    %102 = arith.mulf %97, %101 : vector<1x128xf32>
    %cst_42 = arith.constant 3.906250e-03 : f32
    %103 = vector.broadcast %cst_42 : f32 to vector<1x128xf32>
    %104 = arith.mulf %100, %103 : vector<1x128xf32>
    %105 = arith.mulf %102, %102 : vector<1x128xf32>
    %106 = arith.subf %104, %105 : vector<1x128xf32>
    %cst_43 = arith.constant 0.000000e+00 : f32
    %107 = vector.broadcast %cst_43 : f32 to vector<1x128xf32>
    %108 = arith.maximumf %106, %107 : vector<1x128xf32>
    %109 = vector.broadcast %102 : vector<1x128xf32> to vector<256x128xf32>
    %110 = arith.subf %95, %109 : vector<256x128xf32>
    %cst_44 = arith.constant 9.99999974E-6 : f32
    %111 = vector.broadcast %cst_44 : f32 to vector<1x128xf32>
    %112 = arith.addf %108, %111 : vector<1x128xf32>
    %113 = math.rsqrt %112 : vector<1x128xf32>
    %114 = vector.broadcast %113 : vector<1x128xf32> to vector<256x128xf32>
    %115 = arith.mulf %110, %114 : vector<256x128xf32>
    %c0_45 = arith.constant 0 : index
    %c0_46 = arith.constant 0 : index
    %c0_47 = arith.constant 0 : index
    %116 = vector.load %arg2[%c0_45, %c0_46, %c0_47] : memref<1x256x128xf32, #tpu.memory_space<vmem>>, vector<1x256x128xf32>
    %117 = vector.shape_cast %116 : vector<1x256x128xf32> to vector<256x128xf32>
    %118 = arith.addf %117, %115 : vector<256x128xf32>
    %c0_48 = arith.constant 0 : index
    %c0_49 = arith.constant 0 : index
    %c0_50 = arith.constant 0 : index
    %119 = vector.load %arg5[%c0_48, %c0_49, %c0_50] : memref<1x256x128xf32, #tpu.memory_space<vmem>>, vector<1x256x128xf32>
    %120 = vector.shape_cast %119 : vector<1x256x128xf32> to vector<256x128xf32>
    %121 = vector.shape_cast %118 : vector<256x128xf32> to vector<1x256x128xf32>
    tpu.vector_store %arg5[%c0_48, %c0_49, %c0_50], %121 {strides = array<i32>} : memref<1x256x128xf32, #tpu.memory_space<vmem>>, vector<1x256x128xf32>,
    return
  }
  func.func @transform_0(%arg0: i32) -> (i32, i32, i32, i32) {
    %c0_i32 = arith.constant 0 : i32
    %c0_i32_0 = arith.constant 0 : i32
    %c0_i32_1 = arith.constant 0 : i32
    %c0_i32_2 = arith.constant 0 : i32
    return %arg0, %c0_i32, %c0_i32_0, %c0_i32_1 : i32, i32, i32, i32
  }
  func.func @transform_1(%arg0: i32) -> (i32, i32, i32) {
    %c0_i32 = arith.constant 0 : i32
    %c0_i32_0 = arith.constant 0 : i32
    %c0_i32_1 = arith.constant 0 : i32
    return %arg0, %c0_i32, %c0_i32_0 : i32, i32, i32
  }
  func.func @transform_2(%arg0: i32) -> (i32, i32, i32) {
    %c0_i32 = arith.constant 0 : i32
    %c0_i32_0 = arith.constant 0 : i32
    %c0_i32_1 = arith.constant 0 : i32
    %c0_i32_2 = arith.constant 0 : i32
    return %c0_i32, %c0_i32_0, %c0_i32_1 : i32, i32, i32
  }
  func.func @transform_3(%arg0: i32) -> (i32, i32, i32) {
    %c0_i32 = arith.constant 0 : i32
    %c0_i32_0 = arith.constant 0 : i32
    %c0_i32_1 = arith.constant 0 : i32
    %c0_i32_2 = arith.constant 0 : i32
    return %c0_i32, %c0_i32_0, %c0_i32_1 : i32, i32, i32
  }
  func.func @transform_4(%arg0: i32) -> (i32, i32, i32) {
    %c0_i32 = arith.constant 0 : i32
    %c0_i32_0 = arith.constant 0 : i32
    %c0_i32_1 = arith.constant 0 : i32
    return %arg0, %c0_i32, %c0_i32_0 : i32, i32, i32
  }
}

</mosaic_0001>

<bundles_post_ra>
// kernel: tpu_custom_call.1
= control target key start
LH: loop header
LB: loop body
LE: loop exit
PB: predicated region body
PF: predicated region fallthrough
CT: control target
= control target key end

     0   :  { %9 = vsyncpa [#allocation3], 0  ;;  %s11595_s0 = inlined_call_operand.vmem [shape: f32[2,18,18,128], index: 0, kind: input, shape index: {}]   ;;  %s11596_s1 = inlined_call_operand.hbm [shape: f32[2,256,128], index: 1, kind: input, shape index: {}]   ;;  %s11597_s2 = inlined_call_operand.vmem [shape: bf16[3,384,128], index: 2, kind: input, shape index: {}]   ;;  %s11598_s3 = inlined_call_operand.vmem [shape: bf16[3,384,128], index: 3, kind: input, shape index: {}]   ;;  %s11599_s4 = inlined_call_operand.hbm [shape: f32[2,256,128], index: 4, kind: output, shape index: {}]  }
   0x1   :  { %11 = vsyncpa [#allocation3 + $0x1], 0 }
   0x2   :  { %12 = vsyncpa [#allocation4], 0 }
   0x3   :  { %14 = vsyncpa [#allocation4 + $0x1], 0  ;;  %s7484_s15 = smov 0   ;;  %s7486_s16 = smov 0  }
   0x4   :  { %s7488_s17 = smov 0   ;;  %s7490_s18 = smov 0  }
   0x5 LB: > { %s7505_s19 = sadd.s32 4294967295, %s7451_s18   ;;  %s5607_s20 = sadd.s32 4294967294, %s7451_s18   ;;  %s7451_s18 = sphi %s7490_s18, %s12065_s18   ;;  %s7447_s17 = sphi %s7488_s17, %s12064_s17   ;;  %s7443_s16 = sphi %s7486_s16, %s12063_s16   ;;  %s7439_s15 = sphi %s7484_s15, %s12062_s15  }
   0x6   : > { %s7509_s21 = sadd.s32 1, %s7451_s18   ;;  %s53_s22 = sadd.s32 1, %s7447_s17 }
   0x7   : > { %s50_s23 = ssub.s32 %s7451_s18, %s7509_s21  ;;  %p60_p0 = scmp.ne.s32.totalorder %s7447_s17, %s7443_s16 }
   0x8   : > { %p51_p1 = scmp.eq.s32.totalorder %s50_s23, 0  ;;  %p61_p2 = scmp.eq.s32.totalorder %s7451_s18, 0 }
   0x9   : > { %p66_p3 = scmp.ne.s32.totalorder %s7443_s16, %s7439_s15  ;;  %p67_p4 = scmp.eq.s32.totalorder %s7505_s19, 0 }
   0xa   : > { %s7521_s24 = scalar_select %p51_p1, %s7447_s17, %s53_s22  }
   0xb   : > { %p7523_p5 = por %p61_p2, %p60_p0  ;;  %p7527_p6 = por %p67_p4, %p66_p3 }
   0xc   : > { %p132_p7 = scmp.eq.s32.totalorder %s7505_s19, 1  ;;  %p138_p8 = scmp.eq.s32.totalorder %s5607_s20, 1 }
   0xd   : > { %s11717_s26 = scalar_select %p7527_p6, 1, 0 }
   0xe   : > { %p7173_p10 = scmp.lt.s32.totalorder %s7451_s18, 2  ;;  %p7534_p11 = por %p132_p7, %p60_p0 }
   0xf   : > { %p7538_p12 = por %p138_p8, %p66_p3  ;;  %s172_s29 = sand.u32 1, %s7447_s17  }
  0x10   : > { %s11718_s27 = scalar_select %p7534_p11, 1, 0 }
  0x11   : > { %s11719_s28 = scalar_select %p7538_p12, 1, 0 }
  0x12   : > { %s6054_s30 = sshll.u32 %s7451_s18, 12  ;;  %s5610_s5 = sshll.u32 %s172_s29, 8 }
  0x13   : > { %s7547_s8 = scalar_lea.hbm %s11596_s1, %s6054_s30  ;;  %s176_s9 = scalar_lea.vmem [#allocation2], %s5610_s5 }
  0x14   : > { %s183_s10 = sshll.u32 %s176_s9, 4  ;;  %p7551_p13 = pnand %p7173_p10, %p7523_p5  ;;  %s7555_s10 = int_to_ptr.vmem [resolvable:$true] %s183_s10 }
  0x15   : > { %s7557_s12 = scalar_lea.sflag [#allocation3], %s172_s29  ;;  %s7359_s13 = scalar_lea.hbm %s7547_s8, 4096 }
  0x16   : > { %p7360_p0 = scmp.ne.s32.totalorder %s7547_s8, %s7359_s13  ;;  %p7361_p1 = pneg %p7551_p13 }
  0x17   : > { %s7364_s22 = scalar_lea.hbm %s11596_s1, 8192  ;;  %p7365_p4 = scmp.lt.s32.totalorder %s7547_s8, %s11596_s1 }
  0x18   : > { %p7362_p2 = pnand %p7361_p1, %p7360_p0  ;;  %p7366_p5 = scmp.lt.s32.totalorder %s7364_s22, %s7359_s13 }
  0x1a   : > { %p7363_p3 = pneg %p7362_p2  ;;  %p7367_p7 = por %p7366_p5, %p7365_p4 }
  0x1c   : > { %p7368_p8 = pnand %p7367_p7, %p7363_p3 }
  0x1e   : > { %7371 = shalt.err (!%p7368_p8)
}
  0x1f   : > { %s7372_s29 = scalar_lea.vmem %s7555_s10, 4096  ;;  %s7453_s30 = smov [#allocation2]  }
  0x20   : > { %p7373_p10 = scmp.ne.s32.totalorder %s7555_s10, %s7372_s29  ;;  %s7377_s5 = sshll.u32 %s7453_s30, 4  ;;  %s7378_s5 = int_to_ptr.vmem [resolvable:$false] %s7377_s5 }
  0x21   : > { %s7379_s6 = scalar_lea.vmem %s7378_s5, 8192  ;;  %p7380_p2 = scmp.lt.s32.totalorder %s7555_s10, %s7378_s5 }
  0x22   : > { %p7375_p9 = pnand %p7373_p10, %p7361_p1  ;;  %p7381_p12 = scmp.lt.s32.totalorder %s7379_s6, %s7372_s29 }
  0x24   : > { %p7376_p0 = pneg %p7375_p9  ;;  %p7382_p11 = por %p7381_p12, %p7380_p2 }
  0x26   : > { %p7383_p6 = pnand %p7382_p11, %p7376_p0 }
  0x28   : > { %7386 = shalt.err (!%p7383_p6)
}
  0x29   : > { %s7454_s7 = smov 128   ;;  %s7455_s9 = smov 8  }
  0x2a   : > { %7168 = dma.hbm_to_vmem [thread:$0]  (!%p7551_p13), %s7547_s8, 4096, %s7555_s10, %s7557_s12, %s7454_s7, %s7454_s7, %s7455_s9  }
  0x2b   : > { %p5613_p9 = scmp.ge.s32.totalorder %s7451_s18, 1  ;;  %p191_p1 = scmp.lt.s32.totalorder %s7451_s18, 3 }
  0x2d   : > { %p192_p3 = pnand %p5613_p9, %p191_p1 }
  0x2f   : > { %195 = sbr.rel (%p192_p3) target bundleno = 1284 (0x504), region = 36 }
  0x34   : > { %s7581_s13 = sand.u32 1, %s7443_s16   ;;  %p11721_p6 = scmp.ne.s32.totalorder %s11717_s26, 0 }
  0x35   : > { %s5614_s14 = sshll.u32 %s7581_s13, 8  ;;  %s198_s20 = scalar_lea.sflag [#allocation3], %s7581_s13 }
  0x36   : > { %s7587_s22 = scalar_lea.vmem [#allocation2], %s5614_s14 }
  0x37   : > { %7430 = dma.done.wait (%p11721_p6), %s198_s20, 4096  }
  0x38   : > { %7432 = vsyncadd (%p11721_p6), %s198_s20, 4294963200  ;;  %v7211_v0 = vld [vmem:[%s11597_s2 + $0x138] sm:$0xff]   ;;  %v7214_v3 = vld [vmem:[%s11597_s2 + $0x130] sm:$0xff]   ;;  %p231_p11 = scmp.lt.s32.totalorder %s7505_s19, 1  ;;  %vm333_vm0 = vcmask 1046528   ;;  %vm446_vm1 = vcmask 1045504  }
  0x39   : > { %v7212_v1 = vld [vmem:[%s11597_s2 + $0x178] sm:$0xff]   ;;  %6056 = vmatprep.subr.bf16.mxu0 %v7211_v0  ;;  %v7215_v4 = vld [vmem:[%s11597_s2 + $0x170] sm:$0xff]   ;;  %v7217_v6 = vld [vmem:[%s11597_s2 + $0x128] sm:$0xff]   ;;  %vm3194_vm2 = vcmask 1040384   ;;  %s11411_s29 = scalar_lea.vmem [#allocation5], %s5614_s14  ;;  %s6055_s14 = sshll.u32 %s7505_s19, 12 }
  0x3a   : > { %v7213_v2 = vld [vmem:[%s11597_s2 + $0xf8] sm:$0xff]   ;;  %6872 = vmatprep.subr.bf16.mxu1 %v7212_v1  ;;  %v7216_v5 = vld [vmem:[%s11597_s2 + $0xf0] sm:$0xff]   ;;  %v7218_v7 = vld [vmem:[%s11597_s2 + $0x168] sm:$0xff]   ;;  %s232_s8 = scalar_select %p231_p11, %s7505_s19, 1 }
  0x3b   : > { %6057 = vmatpush3.bf16.msra.mxu0 %v7213_v2  ;;  %6873 = vmatpush3.bf16.msra.mxu1 %v7212_v1  ;;  %v7219_v8 = vld [vmem:[%s11597_s2 + $0xe8] sm:$0xff]   ;;  %v7220_v9 = vld [vmem:[%s11597_s2 + $0x120] sm:$0xff]   ;;  %v7223_v12 = vld [vmem:[%s11597_s2 + $0x118] sm:$0xff]   ;;  %s5522_s26 = sshll.u32 %s11411_s29, 4  ;;  %s5509_s19 = scalar_lea.sflag [#allocation4], %s7581_s13  ;;  %s11536_s26 = int_to_ptr.vmem [resolvable:$true] %s5522_s26 }
  0x3c   : > { %6058 = vmatprep.subr.bf16.mxu0 %v7214_v3  ;;  %6874 = vmatprep.subr.bf16.mxu1 %v7215_v4  ;;  %v7221_v10 = vld [vmem:[%s11597_s2 + $0x160] sm:$0xff]   ;;  %v7224_v13 = vld [vmem:[%s11597_s2 + $0x158] sm:$0xff]   ;;  %v7226_v15 = vld [vmem:[%s11597_s2 + $0x110] sm:$0xff]   ;;  %s7160_s30 = smul.u32 432, %s232_s8  ;;  %s7387_s6 = scalar_lea.vmem %s11536_s26, 4096 }
  0x3d   : > { %v7222_v11 = vld [vmem:[%s11597_s2 + $0xe0] sm:$0xff]   ;;  %v7225_v14 = vld [vmem:[%s11597_s2 + $0xd8] sm:$0xff]   ;;  %v7227_v16 = vld [vmem:[%s11597_s2 + $0x150] sm:$0xff]   ;;  %p7388_p12 = scmp.ne.s32.totalorder %s11536_s26, %s7387_s6  ;;  %p12059_p13 = scmp.ne.s32.totalorder %s11718_s27, 0 }
  0x3e   : > { %v7228_v17 = vld [vmem:[%s11597_s2 + $0xd0] sm:$0xff]   ;;  %v7229_v18 = vld [vmem:[%s11597_s2 + $0x108] sm:$0xff]   ;;  %s7658_s8 = scalar_lea.vmem %s11595_s0, %s7160_s30  ;;  %v7232_v21 = vld [vmem:[%s11597_s2 + $0x100] sm:$0xff]   ;;  %s11532_s30 = scalar_lea.hbm %s11599_s4, %s6055_s14 }
  0x3f   : > { %6059 = vmatpush3.bf16.msra.mxu0 %v7216_v5  ;;  %6875 = vmatpush3.bf16.msra.mxu1 %v7215_v4  ;;  %v7230_v19 = vld [vmem:[%s11597_s2 + $0x148] sm:$0xff]   ;;  %v7233_v22 = vld [vmem:[%s11597_s2 + $0x140] sm:$0xff]   ;;  %v5617_v23 = vld [vmem:[%s7658_s8 + $0x18] sm:$0xff]  ;;  %p7389_p4 = pnand %p7388_p12, %p12059_p13  ;;  %s7456_s7 = smov [#allocation5]  }
  0x40   : > { %6060 = vmatprep.subr.bf16.mxu0 %v7217_v6  ;;  %6876 = vmatprep.subr.bf16.mxu1 %v7218_v7  ;;  %v7231_v20 = vld [vmem:[%s11597_s2 + $0xc8] sm:$0xff]   ;;  %v5618_v24 = vld [vmem:[%s7658_s8 + $0x20] sm:$0xff]  ;;  %v752_v26 = vrot.slane %v5617_v23, 1  ;;  %v864_v29 = vrot.slane %v5617_v23, 2  ;;  %v7675_v30 = vld [vmem:[%s7658_s8 + $0x30] sm:$0xff]  ;;  %s7391_s9 = sshll.u32 %s7456_s7, 4  ;;  %s7392_s9 = int_to_ptr.vmem [resolvable:$false] %s7391_s9 }
  0x41   : > { %v5619_v25 = vld [vmem:[%s7658_s8 + $0x28] sm:$0x3]  ;;  %v7672_v27 = vrot.slane %v5618_v24, 1  ;;  %v7678_v31 = vld [vmem:[%s7658_s8 + $0x38] sm:$0xff]  ;;  %v7234_v32 = vld [vmem:[%s11597_s2 + $0xc0] sm:$0xff]   ;;  %v7683_v33 = vrot.slane %v5618_v24, 2  ;;  %v7733_v56 = vpack.c.bf16 %v5618_v24, %v5617_v23  ;;  %p7390_p5 = pneg %p7389_p4  ;;  %p7394_p7 = scmp.lt.s32.totalorder %s11536_s26, %s7392_s9 }
  0x42   : > { %v755_v28 = vrot.slane %v5619_v25, 1  ;;  %v867_v34 = vrot.slane %v5619_v25, 2  ;;  %v5622_v35 = vld [vmem:[%s7658_s8 + $0x40] sm:$0x3]  ;;  %v869_v36 = vrot.slane %v7675_v30, 2  ;;  %v7694_v39 = vrot.slane %v7678_v31, 2 }
  0x43   : > { %6061 = vmatpush3.bf16.msra.mxu0 %v7219_v8  ;;  %6877 = vmatpush3.bf16.msra.mxu1 %v7218_v7  ;;  %11722 = vst [vmem:[#allocation8_spill] sm:$0xff] %v7683_v33  ;;  %v7689_v37 = vsel %vm333_vm0, %v752_v26, %v7672_v27  ;;  %v872_v40 = vrot.slane %v5622_v35, 2  ;;  %v7235_v41 = vld [vmem:[%s11597_s2 + $0xb8] sm:$0xff]   ;;  %v7702_v43 = vsel %vm446_vm1, %v864_v29, %v7683_v33  ;;  %v757_v45 = vrot.slane %v7675_v30, 1  ;;  %v7708_v46 = vld [vmem:[%s7658_s8 + $0x48] sm:$0xff]  ;;  %v7711_v47 = vld [vmem:[%s7658_s8 + $0x50] sm:$0xff] }
  0x44   : > { %6062 = vmatprep.subr.bf16.mxu0 %v7220_v9  ;;  %6878 = vmatprep.subr.bf16.mxu1 %v7221_v10  ;;  %v756_v38 = vsel %vm333_vm0, %v7672_v27, %v755_v28  ;;  %11723 = vst [vmem:[#allocation9_spill] sm:$0xff] %v7694_v39  ;;  %11724 = vst [vmem:[#allocation10_spill] sm:$0xff] %v7702_v43  ;;  %v868_v44 = vsel %vm446_vm1, %v7683_v33, %v867_v34  ;;  %v5625_v48 = vld [vmem:[%s7658_s8 + $0x58] sm:$0x3]  ;;  %v7722_v52 = vrot.slane %v7678_v31, 1  ;;  %v7725_v53 = vld [vmem:[%s7658_s8 + $0x60] sm:$0xff] }
  0x45   : > { %v977_v42 = vpack.c.bf16 %v756_v38, %v7689_v37  ;;  %v978_v49 = vpack.c.bf16 %v868_v44, %v7702_v43  ;;  %v7717_v50 = vsel %vm446_vm1, %v869_v36, %v7694_v39  ;;  %v873_v51 = vsel %vm446_vm1, %v7694_v39, %v872_v40  ;;  %v7728_v54 = vld [vmem:[%s7658_s8 + $0x68] sm:$0xff]  ;;  %v7731_v55 = vld [vmem:[%s7658_s8 + $0x70] sm:$0x3]  ;;  %11726 = vst [vmem:[#allocation12_spill] sm:$0xff] %v7733_v56  ;;  %v7746_v0 = vld [vmem:[%s7658_s8 + $0x78] sm:$0xff]  ;;  %s7393_s20 = scalar_lea.vmem %s7392_s9, 8192 }
  0x46   : > { %11725 = vst [vmem:[#allocation11_spill] sm:$0xff] %v7717_v50  ;;  %v760_v57 = vrot.slane %v5622_v35, 1  ;;  %v874_v58 = vrot.slane %v7708_v46, 2  ;;  %v7737_v59 = vrot.slane %v7711_v47, 2  ;;  %v981_v60 = vpack.c.bf16 %v873_v51, %v7717_v50  ;;  %v7749_v1 = vld [vmem:[%s7658_s8 + $0x80] sm:$0xff]  ;;  %v7803_v24 = vld [vmem:[%s7658_s8 + $0xa8] sm:$0xff]  ;;  %p7395_p8 = scmp.lt.s32.totalorder %s7393_s20, %s7387_s6 }
  0x47   : > { %6063 = vmatpush3.bf16.msra.mxu0 %v7222_v11  ;;  %6879 = vmatpush3.bf16.msra.mxu1 %v7221_v10  ;;  %v7742_v61 = vsel %vm333_vm0, %v757_v45, %v7722_v52  ;;  %v877_v62 = vrot.slane %v5625_v48, 2  ;;  %v879_v63 = vrot.slane %v7725_v53, 2  ;;  %v7758_v4 = vrot.slane %v7728_v54, 2  ;;  %v7762_v6 = vld [vmem:[%s7658_s8 + $0x88] sm:$0x3]  ;;  %v7236_v11 = vld [vmem:[%s11597_s2 + $0xb0] sm:$0xff]  }
  0x48   : > { %6064 = vmatprep.subr.bf16.mxu0 %v7223_v12  ;;  %6880 = vmatprep.subr.bf16.mxu1 %v7224_v13  ;;  %11727 = vst [vmem:[#allocation13_spill] sm:$0xff] %v7737_v59  ;;  %11728 = vst [vmem:[#allocation14_spill] sm:$0xff] %v7742_v61  ;;  %v761_v2 = vsel %vm333_vm0, %v7722_v52, %v760_v57  ;;  %v7755_v3 = vsel %vm446_vm1, %v874_v58, %v7737_v59  ;;  %v882_v5 = vrot.slane %v7731_v55, 2  ;;  %v7806_v25 = vld [vmem:[%s7658_s8 + $0xb8] sm:$0x3]  ;;  %v7818_v34 = vld [vmem:[%s7658_s8 + $0xb0] sm:$0xff]  ;;  %p7396_p10 = por %p7395_p8, %p7394_p7 }
  0x49   : > { %1249 = vmatprep.mubr.bf16.mxu0 %v977_v42  ;;  %6888 = vmatprep.mubr.bf16.mxu1 %v978_v49  ;;  %11729 = vst [vmem:[#allocation15_spill] sm:$0xff] %v7755_v3  ;;  %11730 = vst [vmem:[#allocation16_spill] sm:$0xff] %v7758_v4  ;;  %v980_v7 = vpack.c.bf16 %v761_v2, %v7742_v61  ;;  %v878_v8 = vsel %vm446_vm1, %v7737_v59, %v877_v62  ;;  %v762_v9 = vrot.slane %v7708_v46, 1  ;;  %v7237_v42 = vld [vmem:[%s11597_s2 + $0x78] sm:$0xff]   ;;  %v7840_v49 = vld [vmem:[%s7658_s8 + $0xc8] sm:$0xff] }
  0x4a   : > { %v7769_v10 = vrot.slane %v7711_v47, 1  ;;  %v984_v12 = vpack.c.bf16 %v878_v8, %v7755_v3  ;;  %v887_v23 = vrot.slane %v7762_v6, 2  ;;  %v767_v36 = vrot.slane %v7725_v53, 1  ;;  %v7843_v51 = vld [vmem:[%s7658_s8 + $0xd0] sm:$0x3]  ;;  %v7858_v62 = vld [vmem:[%s7658_s8 + $0xd8] sm:$0xff]  ;;  %p7397_p0 = pnand %p7396_p10, %p7390_p5 }
  0x4b   : > { %6065 = vmatpush3.bf16.msra.mxu0 %v7225_v14  ;;  %6881 = vmatpush3.bf16.msra.mxu1 %v7224_v13  ;;  %v765_v13 = vrot.slane %v5625_v48, 1  ;;  %v7776_v14 = vld [vmem:[%s7658_s8 + $0x90] sm:$0xff]  ;;  %v7824_v38 = vrot.slane %v7728_v54, 1  ;;  %v770_v40 = vrot.slane %v7731_v55, 1  ;;  %v7835_v44 = vpack.c.bf16 %v7678_v31, %v7675_v30  ;;  %v7238_v55 = vld [vmem:[%s11597_s2 + $0xa8] sm:$0xff]   ;;  %v7239_v31 = vld [vmem:[%s11597_s2 + $0x38] sm:$0xff]  }
  0x4c   : > { %6066 = vmatprep.subr.bf16.mxu0 %v7226_v15  ;;  %6882 = vmatprep.subr.bf16.mxu1 %v7227_v16  ;;  %v7779_v15 = vld [vmem:[%s7658_s8 + $0x98] sm:$0xff]  ;;  %v889_v28 = vrot.slane %v7776_v14, 2  ;;  %v894_v48 = vrot.slane %v7803_v24, 2  ;;  %v7851_v30 = vrot.slane %v7818_v34, 2  ;;  %v7990_v3 = vld [vmem:[%s7658_s8 + $0x140] sm:$0xff]  ;;  %v8002_v59 = vld [vmem:[%s7658_s8 + $0x150] sm:$0xff] }
  0x4d   : > { %v7814_v29 = vrot.slane %v7779_v15, 2  ;;  %11736 = vst [vmem:[#allocation22_spill] sm:$0xff] %v7824_v38  ;;  %11737 = vst [vmem:[#allocation23_spill] sm:$0xff] %v7835_v44  ;;  %v7875_v8 = vsel %vm333_vm0, %v767_v36, %v7824_v38  ;;  %v7904_v36 = vrot.slane %v7749_v1, 1  ;;  %v7246_v50 = vld [vmem:[%s11597_s2 + $0x58] sm:$0xff]   ;;  %v8008_v39 = vrot.slane %v7818_v34, 1 }
  0x4e   : > { %11738 = vst [vmem:[#allocation24_spill] sm:$0xff] %v7851_v30  ;;  %11740 = vst [vmem:[#allocation26_spill] sm:$0xff] %v7875_v8  ;;  %v8013_v43 = vld [vmem:[%s7658_s8 + $0x158] sm:$0xff]  ;;  %v8016_v33 = vld [vmem:[%s7658_s8 + $0x160] sm:$0x3] }
  0x4f   : > { %6067 = vmatpush3.bf16.msra.mxu0 %v7228_v17  ;;  %6883 = vmatpush3.bf16.msra.mxu1 %v7227_v16  ;;  %v7782_v16 = vld [vmem:[%s7658_s8 + $0xa0] sm:$0x3]  ;;  %v7787_v17 = vsel %vm446_vm1, %v879_v63, %v7758_v4  ;;  %11735 = vst [vmem:[#allocation21_spill] sm:$0xff] %v7814_v29  ;;  %v7862_v63 = vsel %vm446_vm1, %v889_v28, %v7814_v29  ;;  %v772_v28 = vrot.slane %v7746_v0, 1  ;;  %11743 = vst [vmem:[#allocation29_spill] sm:$0xff] %v7904_v36 }
  0x50   : > { %6068 = vmatprep.subr.bf16.mxu0 %v7229_v18  ;;  %6884 = vmatprep.subr.bf16.mxu1 %v7230_v19  ;;  %11731 = vst [vmem:[#allocation17_spill] sm:$0xff] %v7787_v17  ;;  %v884_v18 = vrot.slane %v7746_v0, 2  ;;  %11739 = vst [vmem:[#allocation25_spill] sm:$0xff] %v7862_v63  ;;  %v8341_v61 = vld [vmem:[%s7658_s8 + $0xb8] sm:$0x3] }
  0x51   : > { %11756 = vst [vmem:[#allocation42_spill] sm:$0xff] %v7990_v3  ;;  %11759 = vst [vmem:[#allocation45_spill] sm:$0xff] %v8008_v39 }
  0x52   : > { %11760 = vst [vmem:[#allocation46_spill] sm:$0xff] %v8013_v43  ;;  %11761 = vst [vmem:[#allocation47_spill] sm:$0xff] %v8016_v33 }
  0x53   : > { %6069 = vmatpush3.bf16.msra.mxu0 %v7231_v20  ;;  %6885 = vmatpush3.bf16.msra.mxu1 %v7230_v19  ;;  %v7791_v19 = vrot.slane %v7749_v1, 2  ;;  %v883_v20 = vsel %vm446_vm1, %v7758_v4, %v882_v5  ;;  %v7867_v5 = vld [vmem:[%s7658_s8 + $0xe0] sm:$0xff]  ;;  %v7967_v4 = vsel %vm333_vm0, %v772_v28, %v7904_v36 }
  0x54   : > { %6070 = vmatprep.subr.bf16.mxu0 %v7232_v21  ;;  %6886 = vmatprep.subr.bf16.mxu1 %v7233_v22  ;;  %v7797_v21 = vsel %vm333_vm0, %v762_v9, %v7769_v10  ;;  %v987_v45 = vpack.c.bf16 %v883_v20, %v7787_v17  ;;  %v771_v9 = vsel %vm333_vm0, %v7824_v38, %v770_v40  ;;  %v775_v40 = vrot.slane %v7762_v6, 1 }
  0x55   : > { %11732 = vst [vmem:[#allocation18_spill] sm:$0xff] %v7791_v19  ;;  %11733 = vst [vmem:[#allocation19_spill] sm:$0xff] %v7797_v21  ;;  %v7810_v26 = vsel %vm446_vm1, %v884_v18, %v7791_v19  ;;  %v888_v35 = vsel %vm446_vm1, %v7791_v19, %v887_v23  ;;  %v7241_v18 = vld [vmem:[%s11597_s2 + $0x30] sm:$0xff]   ;;  %v902_v23 = vrot.slane %v7843_v51, 2  ;;  %v7244_v19 = vld [vmem:[%s11597_s2 + $0x60] sm:$0xff]  }
  0x56   : > { %11734 = vst [vmem:[#allocation20_spill] sm:$0xff] %v7810_v26  ;;  %v990_v58 = vpack.c.bf16 %v888_v35, %v7810_v26  ;;  %v7901_v35 = vld [vmem:[%s7658_s8 + $0x100] sm:$0x3] }
  0x57   : > { %6071 = vmatpush3.bf16.msra.mxu0 %v7234_v32  ;;  %6887 = vmatpush3.bf16.msra.mxu1 %v7233_v22  ;;  %v766_v22 = vsel %vm333_vm0, %v7769_v10, %v765_v13  ;;  %v892_v32 = vrot.slane %v7782_v16, 2  ;;  %v7885_v13 = vld [vmem:[%s7658_s8 + $0xe8] sm:$0x3] }
  0x58   : > { %6920 = vmatprep.subr.bf16.mxu0 %v7235_v41  ;;  %v983_v57 = vpack.c.bf16 %v766_v22, %v7797_v21  ;;  %6192 = vmatprep.subr.bf16.mxu1 %v7237_v42  ;;  %v7893_v22 = vrot.slane %v7840_v49, 2  ;;  %v904_v42 = vrot.slane %v7858_v62, 2  ;;  %v907_v6 = vrot.slane %v7885_v13, 2 }
  0x59   : > { %v893_v2 = vsel %vm446_vm1, %v7814_v29, %v892_v32  ;;  %v7898_v32 = vld [vmem:[%s7658_s8 + $0xf0] sm:$0xff]  ;;  %v7243_v29 = vld [vmem:[%s11597_s2 + $0x28] sm:$0xff]   ;;  %v8038_v21 = vrot.slane %v8013_v43, 2 }
  0x5a   : > { %1250 = vmatmul.mubr.bf16.vlgmr.msra.gmra.mxu0 %v7733_v56  ;;  %6889 = vmatmul.mubr.bf16.vlgmr.msra.gmra.mxu1 %v981_v60  ;;  %v897_v60 = vrot.slane %v7806_v25, 2  ;;  %11742 = vst [vmem:[#allocation28_spill] sm:$0xff] %v7893_v22  ;;  %v903_v17 = vsel %vm446_vm1, %v7893_v22, %v902_v23 }
  0x5b   : > { %6921 = vmatpush3.bf16.msra.mxu0 %v7235_v41  ;;  %1257 = vmatprep.mubr.bf16.mxu0 %v980_v7  ;;  %v7828_v41 = vld [vmem:[%s7658_s8 + $0xc0] sm:$0xff]  ;;  %v7240_v7 = vld [vmem:[%s11597_s2 + $0x70] sm:$0xff]   ;;  %11765 = vst [vmem:[#allocation51_spill] sm:$0xff] %v8038_v21 }
  0x5c   : > { %6892 = vmatprep.mubr.bf16.mxu1 %v984_v12  ;;  %6922 = vmatprep.subr.bf16.mxu0 %v7236_v11  ;;  %v899_v12 = vrot.slane %v7828_v41, 2  ;;  %v898_v20 = vsel %vm446_vm1, %v7851_v30, %v897_v60  ;;  %v7926_v60 = vld [vmem:[%s7658_s8 + $0x118] sm:$0x3] }
  0x5d   : > { %6193 = vmatpush3.bf16.msra.mxu1 %v7239_v31  ;;  %v7923_v31 = vld [vmem:[%s7658_s8 + $0x110] sm:$0xff] }
  0x5e   : > { %6194 = vmatprep.subr.bf16.mxu1 %v7240_v7  ;;  %11747 = vst [vmem:[#allocation33_spill] sm:$0xff] %v7923_v31  ;;  %v986_v7 = vpack.c.bf16 %v771_v9, %v7875_v8  ;;  %v777_v9 = vrot.slane %v7776_v14, 1  ;;  %v7247_v8 = vld [vmem:[%s11597_s2 + $0xa0] sm:$0xff]  }
  0x5f   : > { %6923 = vmatpush3.bf16.msra.mxu0 %v7236_v11  ;;  %v7881_v11 = vsel %vm446_vm1, %v894_v48, %v7851_v30  ;;  %v7912_v48 = vld [vmem:[%s7658_s8 + $0xf8] sm:$0xff]  ;;  %v7939_v30 = vld [vmem:[%s7658_s8 + $0x128] sm:$0xff] }
  0x60   : > { %6924 = vmatprep.subr.bf16.mxu0 %v7238_v55  ;;  %11741 = vst [vmem:[#allocation27_spill] sm:$0xff] %v7881_v11  ;;  %v996_v56 = vpack.c.bf16 %v898_v20, %v7881_v11  ;;  %11749 = vst [vmem:[#allocation35_spill] sm:$0xff] %v7939_v30  ;;  %v7948_v26 = vrot.slane %v7912_v48, 2  ;;  %v7953_v20 = vrot.slane %v7779_v15, 1  ;;  %v7957_v11 = vsel %vm446_vm1, %v899_v12, %v7893_v22  ;;  %v7987_v22 = vld [vmem:[%s7658_s8 + $0x138] sm:$0xff] }
  0x61   : > { %6195 = vmatpush3.bf16.msra.mxu1 %v7241_v18  ;;  %v7942_v18 = vld [vmem:[%s7658_s8 + $0x130] sm:$0x3]  ;;  %11752 = vst [vmem:[#allocation38_spill] sm:$0xff] %v7957_v11  ;;  %11755 = vst [vmem:[#allocation41_spill] sm:$0xff] %v7987_v22 }
  0x62   : > { %1258 = vmatmul.mubr.bf16.gmra.mxu0 %v7835_v44  ;;  %6893 = vmatmul.mubr.bf16.gmra.mxu1 %v987_v45  ;;  %v7909_v45 = vrot.slane %v7867_v5, 2  ;;  %v7242_v44 = vld [vmem:[%s11597_s2 + $0x68] sm:$0xff]   ;;  %11750 = vst [vmem:[#allocation36_spill] sm:$0xff] %v7942_v18  ;;  %11751 = vst [vmem:[#allocation37_spill] sm:$0xff] %v7948_v26 }
  0x63   : > { %1265 = vmatprep.mubr.bf16.mxu0 %v983_v57  ;;  %6896 = vmatprep.mubr.bf16.mxu1 %v990_v58  ;;  %v7915_v57 = vld [vmem:[%s7658_s8 + $0x108] sm:$0xff]  ;;  %v7919_v58 = vpack.c.bf16 %v7711_v47, %v7708_v46  ;;  %v909_v46 = vrot.slane %v7898_v32, 2  ;;  %v7936_v47 = vld [vmem:[%s7658_s8 + $0x120] sm:$0xff] }
  0x64   : > { %11744 = vst [vmem:[#allocation30_spill] sm:$0xff] %v7909_v45  ;;  %6925 = vmatpush3.bf16.msra.mxu0 %v7238_v55  ;;  %11745 = vst [vmem:[#allocation31_spill] sm:$0xff] %v7915_v57  ;;  %v993_v55 = vpack.c.bf16 %v893_v2, %v7862_v63  ;;  %v912_v2 = vrot.slane %v7901_v35, 2  ;;  %6196 = vmatprep.subr.bf16.mxu1 %v7242_v44  ;;  %v780_v63 = vrot.slane %v7782_v16, 1  ;;  %v914_v12 = vrot.slane %v7915_v57, 2  ;;  %v7245_v16 = vld [vmem:[%s11597_s2 + $0x20] sm:$0xff]  }
  0x65   : > { %11746 = vst [vmem:[#allocation32_spill] sm:$0xff] %v7919_v58  ;;  %11748 = vst [vmem:[#allocation34_spill] sm:$0xff] %v7936_v47  ;;  %v776_v44 = vsel %vm333_vm0, %v7904_v36, %v775_v40  ;;  %6197 = vmatpush3.bf16.msra.mxu1 %v7243_v29  ;;  %v7978_v23 = vsel %vm446_vm1, %v904_v42, %v7909_v45  ;;  %v908_v28 = vsel %vm446_vm1, %v7909_v45, %v907_v6 }
  0x66   : > { %11753 = vst [vmem:[#allocation39_spill] sm:$0xff] %v7978_v23  ;;  %v7983_v40 = vrot.slane %v7923_v31, 2  ;;  %v917_v29 = vrot.slane %v7926_v60, 2  ;;  %v919_v42 = vrot.slane %v7936_v47, 2  ;;  %v922_v6 = vrot.slane %v7942_v18, 2  ;;  %6198 = vmatprep.subr.bf16.mxu1 %v7244_v19  ;;  %6926 = vmatprep.subr.bf16.mxu0 %v7247_v8 }
  0x67   : > { %v782_v45 = vrot.slane %v7803_v24, 1  ;;  %v8019_v36 = vrot.slane %v7990_v3, 2  ;;  %v8026_v19 = vpack.c.bf16 %v7728_v54, %v7725_v53  ;;  %v989_v38 = vpack.c.bf16 %v776_v44, %v7967_v4  ;;  %v7248_v53 = vld [vmem:[%s11597_s2 + $0x18] sm:$0xff]   ;;  %v7249_v44 = vld [vmem:[%s11597_s2 + $0x50] sm:$0xff]  }
  0x68   : > { %11754 = vst [vmem:[#allocation40_spill] sm:$0xff] %v7983_v40  ;;  %v929_v18 = vrot.slane %v8002_v59, 2  ;;  %v8045_v54 = vsel %vm446_vm1, %v7948_v26, %v912_v2  ;;  %6927 = vmatpush3.bf16.msra.mxu0 %v7247_v8  ;;  %v8061_v2 = vsel %vm446_vm1, %v914_v12, %v7983_v40  ;;  %v7250_v8 = vld [vmem:[%s11597_s2 + $0x10] sm:$0xff]  }
  0x69   : > { %6199 = vmatpush3.bf16.msra.mxu1 %v7245_v16  ;;  %11762 = vst [vmem:[#allocation48_spill] sm:$0xff] %v8019_v36  ;;  %11763 = vst [vmem:[#allocation49_spill] sm:$0xff] %v8026_v19  ;;  %v8033_v16 = vsel %vm446_vm1, %v909_v46, %v7948_v26  ;;  %v932_v46 = vrot.slane %v8016_v33, 2  ;;  %v8089_v33 = vld [vmem:[%s7658_s8 + $0x168] sm:$0xff]  ;;  %v8116_v26 = vld [vmem:[%s7658_s8 + $0x190] sm:$0x3] }
  0x6a   : > { %1266 = vmatmul.mubr.bf16.gmra.mxu0 %v7919_v58  ;;  %6897 = vmatmul.mubr.bf16.gmra.mxu1 %v993_v55  ;;  %v7993_v58 = vld [vmem:[%s7658_s8 + $0x148] sm:$0x3]  ;;  %v7997_v55 = vrot.slane %v7939_v30, 2  ;;  %11764 = vst [vmem:[#allocation50_spill] sm:$0xff] %v8033_v16  ;;  %11766 = vst [vmem:[#allocation52_spill] sm:$0xff] %v8061_v2 }
  0x6b   : > { %11757 = vst [vmem:[#allocation43_spill] sm:$0xff] %v7993_v58  ;;  %1273 = vmatprep.mubr.bf16.mxu0 %v986_v7  ;;  %6900 = vmatprep.mubr.bf16.mxu1 %v996_v56  ;;  %v785_v56 = vrot.slane %v7806_v25, 1  ;;  %v924_v7 = vrot.slane %v7987_v22, 2  ;;  %v999_v25 = vpack.c.bf16 %v903_v17, %v7957_v11  ;;  %v1002_v22 = vpack.c.bf16 %v908_v28, %v7978_v23  ;;  %v7251_v23 = vld [vmem:[%s11597_s2 + $0x48] sm:$0xff]  }
  0x6c   : > { %11758 = vst [vmem:[#allocation44_spill] sm:$0xff] %v7997_v55  ;;  %6200 = vmatprep.subr.bf16.mxu1 %v7246_v50  ;;  %v927_v3 = vrot.slane %v7993_v58, 2  ;;  %v8049_v50 = vsel %vm333_vm0, %v777_v9, %v7953_v20  ;;  %v8053_v17 = vsel %vm333_vm0, %v7953_v20, %v780_v63  ;;  %v8065_v9 = vsel %vm446_vm1, %v7983_v40, %v917_v29  ;;  %v8092_v58 = vld [vmem:[%s7658_s8 + $0x170] sm:$0xff]  ;;  %v8113_v40 = vld [vmem:[%s7658_s8 + $0x188] sm:$0xff] }
  0x6d   : > { %v8069_v63 = vsel %vm446_vm1, %v919_v42, %v7997_v55  ;;  %6201 = vmatpush3.bf16.msra.mxu1 %v7248_v53  ;;  %v787_v28 = vrot.slane %v7828_v41, 1  ;;  %v8078_v12 = vsel %vm446_vm1, %v7997_v55, %v922_v6  ;;  %v8082_v29 = vsel %vm333_vm0, %v782_v45, %v8008_v39  ;;  %v8110_v55 = vld [vmem:[%s7658_s8 + $0x180] sm:$0xff]  ;;  %11772 = vst [vmem:[#allocation58_spill] sm:$0xff] %v8116_v26 }
  0x6e   : > { %11767 = vst [vmem:[#allocation53_spill] sm:$0xff] %v8069_v63  ;;  %11768 = vst [vmem:[#allocation54_spill] sm:$0xff] %v8082_v29  ;;  %v8085_v42 = vrot.slane %v7840_v49, 1  ;;  %v790_v53 = vrot.slane %v7843_v51, 1  ;;  %v8099_v6 = vsel %vm333_vm0, %v8008_v39, %v785_v56  ;;  %v8103_v45 = vsel %vm446_vm1, %v924_v7, %v8019_v36  ;;  %6202 = vmatprep.subr.bf16.mxu1 %v7249_v44  ;;  %v7252_v44 = vld [vmem:[%s11597_s2 + $0x8] sm:$0xff]  }
  0x6f   : > { %11770 = vst [vmem:[#allocation56_spill] sm:$0xff] %v8103_v45  ;;  %v8107_v51 = vrot.slane %v8092_v58, 2  ;;  %v939_v56 = vrot.slane %v8110_v55, 2  ;;  %v940_v7 = vrot.slane %v8113_v40, 2  ;;  %v8130_v11 = vpack.c.bf16 %v7749_v1, %v7746_v0 }
  0x70   : > { %v1005_v39 = vpack.c.bf16 %v8045_v54, %v8033_v16  ;;  %v8144_v0 = vpack.c.bf16 %v7779_v15, %v7776_v14  ;;  %v8148_v1 = vpack.c.bf16 %v7818_v34, %v7803_v24  ;;  %v8158_v14 = vpack.c.bf16 %v8092_v58, %v8089_v33  ;;  %v8200_v54 = vld [vmem:[%s7658_s8 + $0x8] sm:$0xff] }
  0x71   : > { %11771 = vst [vmem:[#allocation57_spill] sm:$0xff] %v8107_v51  ;;  %11773 = vst [vmem:[#allocation59_spill] sm:$0xff] %v8130_v11  ;;  %6203 = vmatpush3.bf16.msra.mxu1 %v7250_v8  ;;  %v8162_v15 = vsel %vm446_vm1, %v929_v18, %v8038_v21  ;;  %v8166_v24 = vsel %vm446_vm1, %v8038_v21, %v932_v46  ;;  %v8170_v34 = vsel %vm333_vm0, %v787_v28, %v8085_v42  ;;  %v7254_v18 = vld [vmem:[%s11597_s2] sm:$0xff]   ;;  %v8252_v21 = vld [vmem:[%s7658_s8 + $0x58] sm:$0x3] }
  0x72   : > { %1274 = vmatmul.mubr.bf16.gmra.mxu0 %v8026_v19  ;;  %6901 = vmatmul.mubr.bf16.gmra.mxu1 %v999_v25  ;;  %v8095_v19 = vld [vmem:[%s7658_s8 + $0x178] sm:$0x3]  ;;  %v934_v25 = vrot.slane %v8089_v33, 2  ;;  %11774 = vst [vmem:[#allocation60_spill] sm:$0xff] %v8144_v0  ;;  %11775 = vst [vmem:[#allocation61_spill] sm:$0xff] %v8148_v1  ;;  %v11781_v16 = vpack.c.bf16 %v8078_v12, %v8069_v63  ;;  %v11783_v12 = vpack.c.bf16 %v8099_v6, %v8082_v29 }
  0x73   : > { %11769 = vst [vmem:[#allocation55_spill] sm:$0xff] %v8095_v19  ;;  %1281 = vmatprep.mubr.bf16.mxu0 %v989_v38  ;;  %6904 = vmatprep.mubr.bf16.mxu1 %v1002_v22  ;;  %v8120_v38 = vsel %vm446_vm1, %v8019_v36, %v927_v3  ;;  %v937_v22 = vrot.slane %v8095_v19, 2  ;;  %v942_v3 = vrot.slane %v8116_v26, 2  ;;  %v992_v19 = vpack.c.bf16 %v8053_v17, %v8049_v50  ;;  %v8183_v17 = vld [vmem:[%s7658_s8] sm:$0xff] }
  0x74   : > { %v1008_v36 = vpack.c.bf16 %v8065_v9, %v8061_v2  ;;  %6204 = vmatprep.subr.bf16.mxu1 %v7251_v23  ;;  %11776 = vst [vmem:[#allocation62_spill] sm:$0xff] %v8158_v14  ;;  %v8174_v23 = vsel %vm333_vm0, %v8085_v42, %v790_v53  ;;  %v7253_v9 = vld [vmem:[%s11597_s2 + $0x40] sm:$0xff]   ;;  %v8187_v46 = vsel %vm446_vm1, %v934_v25, %v8107_v51  ;;  %v8203_v14 = vld [vmem:[%s7658_s8 + $0x10] sm:$0x3] }
  0x75   : > { %11777 = vst [vmem:[#allocation63_spill] sm:$0xff] %v8187_v46  ;;  %v8191_v28 = vsel %vm446_vm1, %v8107_v51, %v937_v22  ;;  %v8194_v53 = vsel %vm446_vm1, %v939_v56, %v940_v7  ;;  %v8197_v8 = vsel %vm446_vm1, %v940_v7, %v942_v3  ;;  %6205 = vmatpush3.bf16.msra.mxu1 %v7252_v44  ;;  %v792_v22 = vrot.slane %v7858_v62, 1  ;;  %v7255_v7 = vld [vmem:[%s11597_s2 + $0x98] sm:$0xff]   ;;  %v8237_v26 = vld [vmem:[%s7658_s8 + $0x40] sm:$0x3] }
  0x76   : > { %v8208_v25 = vpack.c.bf16 %v7840_v49, %v7828_v41  ;;  %v8213_v56 = vpack.c.bf16 %v7867_v5, %v7858_v62  ;;  %v8220_v3 = vpack.c.bf16 %v7912_v48, %v7898_v32  ;;  %v8230_v62 = vrot.slane %v7867_v5, 1  ;;  %6206 = vmatprep.subr.bf16.mxu1 %v7253_v9  ;;  %6928 = vmatprep.subr.bf16.mxu0 %v7255_v7  ;;  %v8338_v63 = vld [vmem:[%s7658_s8 + $0xa0] sm:$0x3] }
  0x77   : > { %v795_v44 = vrot.slane %v7885_v13, 1  ;;  %v797_v49 = vrot.slane %v7898_v32, 1  ;;  %v334_v13 = vrot.slane %v8183_v17, 1  ;;  %v335_v41 = vrot.slane %v8200_v54, 1  ;;  %6929 = vmatpush3.bf16.msra.mxu0 %v7255_v7 }
  0x78   : > { %11778 = vst [vmem:[#allocation64_spill] sm:$0xff] %v8220_v3  ;;  %v337_v51 = vrot.slane %v8203_v14, 1  ;;  %v800_v9 = vrot.slane %v7901_v35, 1  ;;  %v8263_v2 = vsel %vm333_vm0, %v792_v22, %v8230_v62  ;;  %v8268_v7 = vrot.slane %v7923_v31, 1  ;;  %v8290_v31 = vld [vmem:[%s11597_s2 + $0x238] sm:$0xff]  }
  0x79   : > { %6207 = vmatpush3.bf16.msra.mxu1 %v7254_v18  ;;  %v802_v18 = vrot.slane %v7915_v57, 1  ;;  %v352_v35 = vrot.slane %v8252_v21, 1  ;;  %v805_v22 = vrot.slane %v7926_v60, 1  ;;  %v807_v57 = vrot.slane %v7936_v47, 1 }
  0x7a   : > { %1282 = vmatmul.mubr.bf16.gmra.mxu0 %v8130_v11  ;;  %6905 = vmatmul.mubr.bf16.gmra.mxu1 %v1005_v39  ;;  %v7256_v39 = vld [vmem:[%s11597_s2 + $0x90] sm:$0xff]   ;;  %v8234_v11 = vld [vmem:[%s7658_s8 + $0x28] sm:$0x3]  ;;  %v8296_v60 = vrot.slane %v7939_v30, 1 }
  0x7b   : > { %1289 = vmatprep.mubr.bf16.mxu0 %v992_v19  ;;  %6908 = vmatprep.mubr.bf16.mxu1 %v1008_v36  ;;  %v342_v5 = vrot.slane %v8234_v11, 1  ;;  %v8249_v19 = vrot.slane %v7912_v48, 1  ;;  %v347_v36 = vrot.slane %v8237_v26, 1  ;;  %v7257_v48 = vld [vmem:[%s11597_s2 + $0x88] sm:$0xff]   ;;  %v8345_v6 = vsel %vm333_vm0, %v802_v18, %v8268_v7 }
  0x7c   : > { %6930 = vmatprep.subr.bf16.mxu0 %v7256_v39  ;;  %v11786_v30 = vld [vmem:[#allocation41_spill] sm:$0xff]  ;;  %6968 = vmatprep.subr.bf16.mxu1 %v8290_v31 }
  0x7d   : > { %v8257_v32 = vsel %vm333_vm0, %v7672_v27, %v342_v5  ;;  %v8272_v27 = vld [vmem:[%s7658_s8 + $0x70] sm:$0x3]  ;;  %v8276_v5 = vsel %vm333_vm0, %v8230_v62, %v795_v44  ;;  %v8282_v3 = vsel %vm333_vm0, %v7722_v52, %v347_v36  ;;  %6931 = vmatpush3.bf16.msra.mxu0 %v7256_v39  ;;  %v8300_v52 = vsel %vm333_vm0, %v7769_v10, %v352_v35  ;;  %v8303_v36 = vld [vmem:[%s7658_s8 + $0x88] sm:$0x3]  ;;  %v11785_v10 = vld [vmem:[#allocation36_spill] sm:$0xff] }
  0x7e   : > { %11779 = vst [vmem:[#allocation65_spill] sm:$0xff] %v8282_v3  ;;  %11780 = vst [vmem:[#allocation66_spill] sm:$0xff] %v8300_v52  ;;  %v8310_v39 = vsel %vm333_vm0, %v334_v13, %v335_v41  ;;  %v8314_v44 = vsel %vm333_vm0, %v797_v49, %v8249_v19  ;;  %v357_v35 = vrot.slane %v8272_v27, 1  ;;  %v8329_v49 = vsel %vm333_vm0, %v335_v41, %v337_v51  ;;  %v11788_v41 = vld [vmem:[#allocation22_spill] sm:$0xff] }
  0x7f   : > { %v8333_v13 = vsel %vm333_vm0, %v8249_v19, %v800_v9  ;;  %v810_v47 = vrot.slane %v11785_v10, 1  ;;  %v812_v52 = vrot.slane %v11786_v30, 1  ;;  %6932 = vmatprep.subr.bf16.mxu0 %v7257_v48  ;;  %v362_v10 = vrot.slane %v8303_v36, 1 }
  0x80   : > { %v8352_v9 = vsel %vm333_vm0, %v11788_v41, %v357_v35  ;;  %v8364_v30 = vrot.slane %v8013_v43, 1  ;;  %v1001_v35 = vpack.c.bf16 %v8276_v5, %v8263_v2  ;;  %v560_v41 = vpack.c.bf16 %v8329_v49, %v8310_v39  ;;  %v8413_v49 = vld [vmem:[%s7658_s8 + $0xe8] sm:$0x3] }
  0x81   : > { %6933 = vmatpush3.bf16.msra.mxu0 %v7257_v48  ;;  %v8377_v48 = vld [vmem:[%s7658_s8 + $0xd0] sm:$0x3]  ;;  %v822_v43 = vrot.slane %v8089_v33, 1  ;;  %v8383_v5 = vrot.slane %v8092_v58, 1  ;;  %v367_v39 = vrot.slane %v8338_v63, 1  ;;  %v7260_v33 = vld [vmem:[%s11597_s2 + $0x1f8] sm:$0xff]   ;;  %v8400_v58 = vsel %vm333_vm0, %v8296_v60, %v810_v47 }
  0x82   : > { %1290 = vmatmul.mubr.bf16.gmra.mxu0 %v8144_v0  ;;  %6909 = vmatmul.mubr.bf16.gmra.mxu1 %v11781_v16  ;;  %v7258_v0 = vld [vmem:[%s11597_s2 + $0x80] sm:$0xff]   ;;  %v11784_v16 = vpack.c.bf16 %v8120_v38, %v8103_v45  ;;  %v11787_v38 = vld [vmem:[#allocation42_spill] sm:$0xff]  ;;  %v372_v45 = vrot.slane %v8341_v61, 1  ;;  %v11791_v47 = vpack.c.bf16 %v8166_v24, %v8162_v15  ;;  %v11794_v24 = vpack.c.bf16 %v8191_v28, %v8187_v46 }
  0x83   : > { %1297 = vmatprep.mubr.bf16.mxu0 %v11783_v12  ;;  %v8348_v51 = vrot.slane %v11787_v38, 1  ;;  %v8358_v12 = vsel %vm333_vm0, %v8268_v7, %v805_v22  ;;  %v817_v38 = vrot.slane %v8002_v59, 1  ;;  %v11790_v22 = vld [vmem:[#allocation29_spill] sm:$0xff]  ;;  %6934 = vmatprep.subr.bf16.mxu0 %v7258_v0  ;;  %v11796_v28 = vld [vmem:[#allocation8_spill] sm:$0xff] }
  0x84   : > { %6912 = vmatprep.mubr.bf16.mxu1 %v11784_v16  ;;  %v11789_v16 = vld [vmem:[#allocation26_spill] sm:$0xff]  ;;  %v8374_v3 = vsel %vm333_vm0, %v11790_v22, %v362_v10  ;;  %v8392_v22 = vsel %vm333_vm0, %v807_v57, %v8296_v60  ;;  %v8408_v10 = vsel %vm333_vm0, %v7953_v20, %v367_v39  ;;  %v377_v57 = vrot.slane %v8377_v48, 1 }
  0x85   : > { %v8404_v18 = vsel %vm333_vm0, %v812_v52, %v8348_v51  ;;  %6935 = vmatpush3.bf16.msra.mxu0 %v7258_v0  ;;  %v8421_v52 = vsel %vm333_vm0, %v817_v38, %v8364_v30  ;;  %v11792_v0 = vld [vmem:[#allocation45_spill] sm:$0xff]  ;;  %v8438_v38 = vsel %vm333_vm0, %v822_v43, %v8383_v5  ;;  %v8456_v43 = vld [vmem:[%s7658_s8 + $0x100] sm:$0x3] }
  0x86   : > { %v8427_v39 = vsel %vm333_vm0, %v11792_v0, %v372_v45  ;;  %v447_v45 = vrot.slane %v8183_v17, 2  ;;  %v448_v0 = vrot.slane %v8200_v54, 2  ;;  %v8446_v20 = vsel %vm333_vm0, %v8085_v42, %v377_v57  ;;  %6328 = vmatprep.subr.bf16.mxu0 %v7260_v33  ;;  %v272_v33 = vld [vmem:[%s7658_s8 + $0x118] sm:$0x3] }
  0x87   : > { %v387_v42 = vrot.slane %v8456_v43, 1 }
  0x88   : > { %v8461_v29 = vsel %vm446_vm1, %v447_v45, %v448_v0 }
  0x8a   : > { %1298 = vmatmul.mubr.bf16.gmra.mxu0 %v8148_v1  ;;  %6913 = vmatmul.mubr.bf16.gmra.mxu1 %v11791_v47  ;;  %v11793_v1 = vpack.c.bf16 %v8174_v23, %v8170_v34  ;;  %v11795_v23 = vrot.slane %v8234_v11, 2  ;;  %v11798_v47 = vld [vmem:[#allocation9_spill] sm:$0xff] }
  0x8b   : > { %6916 = vmatprep.mubr.bf16.mxu1 %v11794_v24 }
  0x8c   : > { %1305 = vmatprep.mubr.bf16.mxu0 %v11793_v1  ;;  %v450_v1 = vrot.slane %v8203_v14, 2  ;;  %v8453_v24 = vsel %vm446_vm1, %v11796_v28, %v11795_v23  ;;  %v382_v14 = vrot.slane %v8413_v49, 1  ;;  %v460_v23 = vrot.slane %v8237_v26, 2 }
  0x8d   : > { %v8500_v26 = vsel %vm333_vm0, %v8249_v19, %v387_v42  ;;  %v11807_v19 = vld [vmem:[#allocation20_spill] sm:$0xff]  ;;  %v11809_v42 = vld [vmem:[#allocation25_spill] sm:$0xff] }
  0x8e   : > { %v8467_v11 = vsel %vm446_vm1, %v448_v0, %v450_v1  ;;  %v8474_v28 = vsel %vm333_vm0, %v8230_v62, %v382_v14  ;;  %v8480_v57 = vsel %vm446_vm1, %v11798_v47, %v460_v23  ;;  %v465_v0 = vrot.slane %v8252_v21, 2  ;;  %v11801_v14 = vld [vmem:[#allocation13_spill] sm:$0xff]  ;;  %v11802_v21 = vld [vmem:[#allocation15_spill] sm:$0xff]  ;;  %11803 = vst [vmem:[#allocation36_spill] sm:$0xff] %v8500_v26 }
  0x8f   : > { %v11800_v62 = vpack.c.bf16 %v8197_v8, %v8194_v53  ;;  %v470_v47 = vrot.slane %v8272_v27, 2  ;;  %v475_v1 = vrot.slane %v8303_v36, 2  ;;  %v275_v8 = vld [vmem:[%s7658_s8 + $0x130] sm:$0x3]  ;;  %v392_v27 = vrot.slane %v272_v33, 1 }
  0x90   : > { %v8493_v45 = vsel %vm446_vm1, %v11801_v14, %v465_v0  ;;  %v11804_v0 = vld [vmem:[#allocation16_spill] sm:$0xff]  ;;  %v11806_v14 = vld [vmem:[#allocation18_spill] sm:$0xff]  ;;  %v480_v53 = vrot.slane %v8338_v63, 2  ;;  %v278_v26 = vld [vmem:[%s7658_s8 + $0x148] sm:$0x3] }
  0x91   : > { %v8514_v23 = vsel %vm446_vm1, %v11806_v14, %v475_v1  ;;  %v8520_v36 = vsel %vm333_vm0, %v8268_v7, %v392_v27  ;;  %v397_v1 = vrot.slane %v275_v8, 1  ;;  %v7264_v14 = vld [vmem:[%s11597_s2 + $0x230] sm:$0xff]   ;;  %v11810_v27 = vld [vmem:[#allocation24_spill] sm:$0xff]  ;;  %v490_v7 = vrot.slane %v8377_v48, 2 }
  0x92   : > { %1306 = vmatmul.mubr.bf16.gmra.mxu0 %v8208_v25  ;;  %6917 = vmatmul.mubr.bf16.gmra.mxu1 %v11800_v62  ;;  %v8508_v62 = vsel %vm446_vm1, %v11804_v0, %v470_v47  ;;  %v485_v0 = vrot.slane %v8341_v61, 2  ;;  %v11811_v61 = vpack.c.bf16 %v8200_v54, %v8183_v17  ;;  %v495_v17 = vrot.slane %v8413_v49, 2  ;;  %v284_v54 = vld [vmem:[%s7658_s8 + $0x178] sm:$0x3] }
  0x93   : > { %1313 = vmatprep.mubr.bf16.mxu0 %v1001_v35  ;;  %1715 = vmatprep.mubr.bf16.mxu1 %v560_v41  ;;  %v11808_v41 = vld [vmem:[#allocation21_spill] sm:$0xff]  ;;  %v8548_v47 = vsel %vm333_vm0, %v8296_v60, %v397_v1  ;;  %v11816_v60 = vld [vmem:[#allocation28_spill] sm:$0xff]  ;;  %v402_v48 = vrot.slane %v278_v26, 1  ;;  %v500_v49 = vrot.slane %v8456_v43, 2  ;;  %v11830_v43 = vpack.c.bf16 %v8358_v12, %v8345_v6  ;;  %v7277_v12 = vld [vmem:[%s11597_s2 + $0x218] sm:$0xff]  }
  0x94   : > { %v8529_v35 = vsel %vm446_vm1, %v11808_v41, %v480_v53  ;;  %v8538_v63 = vsel %vm446_vm1, %v11810_v27, %v485_v0  ;;  %v11812_v53 = vld [vmem:[#allocation27_spill] sm:$0xff]  ;;  %11813 = vst [vmem:[#allocation22_spill] sm:$0xff] %v8548_v47  ;;  %v11814_v0 = vpack.c.bf16 %v8333_v13, %v8314_v44  ;;  %v11815_v27 = vpack.c.bf16 %v8257_v32, %v7689_v37  ;;  %v7269_v13 = vld [vmem:[%s11597_s2 + $0x228] sm:$0xff]   ;;  %v11818_v32 = vld [vmem:[#allocation30_spill] sm:$0xff] }
  0x95   : > { %v8563_v1 = vsel %vm446_vm1, %v11816_v60, %v490_v7  ;;  %v8580_v60 = vsel %vm333_vm0, %v8348_v51, %v402_v48  ;;  %v11822_v47 = vld [vmem:[#allocation37_spill] sm:$0xff]  ;;  %v7274_v7 = vld [vmem:[%s11597_s2 + $0x220] sm:$0xff]   ;;  %v510_v41 = vrot.slane %v275_v8, 2 }
  0x96   : > { %11821 = vst [vmem:[#allocation29_spill] sm:$0xff] %v8580_v60  ;;  %v8587_v37 = vsel %vm446_vm1, %v11822_v47, %v500_v49  ;;  %v11825_v48 = vld [vmem:[#allocation40_spill] sm:$0xff] }
  0x97   : > { %11823 = vst [vmem:[#allocation45_spill] sm:$0xff] %v8587_v37  ;;  %v11827_v60 = vld [vmem:[#allocation64_spill] sm:$0xff]  ;;  %v11832_v37 = vld [vmem:[#allocation14_spill] sm:$0xff] }
  0x98   : > { %v11828_v47 = vld [vmem:[#allocation12_spill] sm:$0xff] }
  0x9a   : > { %1314 = vmatmul.mubr.bf16.gmra.mxu0 %v8213_v56  ;;  %1716 = vmatmul.mubr.bf16.vlgmr.msra.gmra.mxu1 %v11811_v61  ;;  %v11817_v61 = vld [vmem:[#allocation38_spill] sm:$0xff] }
  0x9b   : > { %1321 = vmatprep.mubr.bf16.mxu0 %v11814_v0  ;;  %1723 = vmatprep.mubr.bf16.mxu1 %v11815_v27  ;;  %v8572_v0 = vsel %vm446_vm1, %v11818_v32, %v495_v17  ;;  %v505_v17 = vrot.slane %v272_v33, 2  ;;  %v11831_v32 = vld [vmem:[#allocation65_spill] sm:$0xff]  ;;  %v412_v33 = vrot.slane %v284_v54, 1 }
  0x9c   : > { %6969 = vmatpush3.bf16.msra.mxu1 %v8290_v31  ;;  %11819 = vst [vmem:[#allocation26_spill] sm:$0xff] %v8572_v0  ;;  %v281_v31 = vld [vmem:[%s7658_s8 + $0x160] sm:$0x3] }
  0x9d   : > { %6970 = vmatprep.subr.bf16.mxu1 %v7264_v14  ;;  %v407_v27 = vrot.slane %v281_v31, 1  ;;  %v8596_v0 = vsel %vm446_vm1, %v11825_v48, %v505_v17  ;;  %v11833_v17 = vpack.c.bf16 %v11831_v32, %v11832_v37  ;;  %v11834_v48 = vld [vmem:[#allocation44_spill] sm:$0xff] }
  0x9e   : > { %11826 = vst [vmem:[#allocation8_spill] sm:$0xff] %v8596_v0  ;;  %v11837_v37 = vld [vmem:[#allocation48_spill] sm:$0xff] }
  0x9f   : > { %v8604_v49 = vsel %vm333_vm0, %v8364_v30, %v407_v27  ;;  %v11840_v0 = vld [vmem:[#allocation56_spill] sm:$0xff]  ;;  %v11848_v27 = vld [vmem:[#allocation34_spill] sm:$0xff] }
  0xa0   : > { %6971 = vmatpush3.bf16.msra.mxu1 %v7264_v14  ;;  %v515_v14 = vrot.slane %v278_v26, 2  ;;  %v525_v26 = vrot.slane %v284_v54, 2 }
  0xa1   : > { %6972 = vmatprep.subr.bf16.mxu1 %v7269_v13 }
  0xa2   : > { %1322 = vmatmul.mubr.bf16.gmra.mxu0 %v11827_v60  ;;  %1724 = vmatmul.mubr.bf16.gmra.mxu1 %v11828_v47  ;;  %v8616_v47 = vsel %vm446_vm1, %v11834_v48, %v510_v41  ;;  %v8625_v32 = vsel %vm446_vm1, %v11837_v37, %v515_v14  ;;  %v520_v41 = vrot.slane %v281_v31, 2  ;;  %v1010_v14 = vpack.c.bf16 %v8400_v58, %v8392_v22  ;;  %v11841_v37 = vld [vmem:[#allocation51_spill] sm:$0xff]  ;;  %v7278_v58 = vld [vmem:[%s11597_s2 + $0x210] sm:$0xff]  }
  0xa3   : > { %1329 = vmatprep.mubr.bf16.mxu0 %v11830_v43  ;;  %1731 = vmatprep.mubr.bf16.mxu1 %v11833_v17  ;;  %11835 = vst [vmem:[#allocation9_spill] sm:$0xff] %v8616_v47  ;;  %v8629_v43 = vsel %vm333_vm0, %v8383_v5, %v412_v33  ;;  %v11838_v17 = vld [vmem:[#allocation31_spill] sm:$0xff]  ;;  %v11842_v33 = vld [vmem:[#allocation57_spill] sm:$0xff] }
  0xa4   : > { %6973 = vmatpush3.bf16.msra.mxu1 %v7269_v13  ;;  %v11839_v13 = vld [vmem:[#allocation33_spill] sm:$0xff]  ;;  %v8643_v47 = vsel %vm446_vm1, %v11841_v37, %v520_v41  ;;  %v8647_v54 = vsel %vm446_vm1, %v11842_v33, %v525_v26  ;;  %v11843_v31 = vld [vmem:[#allocation43_spill] sm:$0xff]  ;;  %v11845_v26 = vld [vmem:[#allocation66_spill] sm:$0xff] }
  0xa5   : > { %6974 = vmatprep.subr.bf16.mxu1 %v7274_v7  ;;  %v8633_v48 = vpack.c.bf16 %v11839_v13, %v11838_v17  ;;  %v815_v17 = vrot.slane %v11843_v31, 1  ;;  %v11844_v41 = vld [vmem:[#allocation23_spill] sm:$0xff]  ;;  %v7281_v31 = vld [vmem:[%s11597_s2 + $0x208] sm:$0xff]  }
  0xa6   : > { %v11846_v37 = vld [vmem:[#allocation19_spill] sm:$0xff] }
  0xa7   : > { %v11847_v33 = vpack.c.bf16 %v11845_v26, %v11846_v37  ;;  %v11849_v13 = vld [vmem:[#allocation35_spill] sm:$0xff] }
  0xa8   : > { %6975 = vmatpush3.bf16.msra.mxu1 %v7274_v7  ;;  %v816_v7 = vsel %vm333_vm0, %v8348_v51, %v815_v17  ;;  %v8669_v8 = vpack.c.bf16 %v11849_v13, %v11848_v27  ;;  %v7282_v51 = vld [vmem:[%s11597_s2 + $0x200] sm:$0xff]   ;;  %v11852_v17 = vpack.c.bf16 %v8352_v9, %v11789_v16  ;;  %v11853_v13 = vld [vmem:[#allocation41_spill] sm:$0xff]  ;;  %v11857_v9 = vpack.c.bf16 %v8374_v3, %v7967_v4 }
  0xa9   : > { %6976 = vmatprep.subr.bf16.mxu1 %v7277_v12  ;;  %v828_v16 = vrot.slane %v8113_v40, 1  ;;  %v11861_v4 = vpack.c.bf16 %v8408_v10, %v8049_v50  ;;  %v11867_v50 = vld [vmem:[#allocation61_spill] sm:$0xff]  ;;  %v11868_v10 = vpack.c.bf16 %v8446_v20, %v8170_v34  ;;  %v11873_v20 = vld [vmem:[#allocation11_spill] sm:$0xff] }
  0xaa   : > { %1330 = vmatmul.mubr.bf16.gmra.mxu0 %v8633_v48  ;;  %1732 = vmatmul.mubr.bf16.gmra.mxu1 %v11844_v41  ;;  %v1013_v41 = vpack.c.bf16 %v816_v7, %v8404_v18 }
  0xab   : > { %1337 = vmatprep.mubr.bf16.mxu0 %v1010_v14  ;;  %1739 = vmatprep.mubr.bf16.mxu1 %v11847_v33  ;;  %v11850_v14 = vld [vmem:[#allocation47_spill] sm:$0xff] }
  0xac   : > { %6977 = vmatpush3.bf16.msra.mxu1 %v7277_v12  ;;  %v820_v46 = vrot.slane %v11850_v14, 1  ;;  %v11851_v12 = vld [vmem:[#allocation32_spill] sm:$0xff]  ;;  %v11855_v33 = vld [vmem:[#allocation55_spill] sm:$0xff] }
  0xad   : > { %6978 = vmatprep.subr.bf16.mxu1 %v7278_v58  ;;  %v825_v7 = vrot.slane %v11855_v33, 1 }
  0xae   : > { %v821_v27 = vsel %vm333_vm0, %v8364_v30, %v820_v46  ;;  %v827_v46 = vrot.slane %v8110_v55, 1 }
  0xaf   : > { %v1016_v37 = vpack.c.bf16 %v821_v27, %v8421_v52  ;;  %v826_v30 = vsel %vm333_vm0, %v8383_v5, %v825_v7  ;;  %v11860_v27 = vld [vmem:[#allocation59_spill] sm:$0xff]  ;;  %v11866_v7 = vpack.c.bf16 %v8113_v40, %v8110_v55  ;;  %v7263_v40 = vld [vmem:[%s11597_s2 + $0x1b0] sm:$0xff]  }
  0xb0   : > { %6979 = vmatpush3.bf16.msra.mxu1 %v7278_v58  ;;  %v11854_v58 = vld [vmem:[#allocation42_spill] sm:$0xff]  ;;  %v829_v3 = vsel %vm333_vm0, %v827_v46, %v828_v16  ;;  %v11878_v46 = vld [vmem:[#allocation17_spill] sm:$0xff] }
  0xb1   : > { %6980 = vmatprep.subr.bf16.mxu1 %v7281_v31  ;;  %v8685_v26 = vpack.c.bf16 %v11854_v58, %v11853_v13  ;;  %v11862_v58 = vld [vmem:[#allocation62_spill] sm:$0xff] }
  0xb2   : > { %1338 = vmatmul.mubr.bf16.gmra.mxu0 %v8669_v8  ;;  %1740 = vmatmul.mubr.bf16.gmra.mxu1 %v11851_v12  ;;  %v11870_v55 = vld [vmem:[#allocation10_spill] sm:$0xff] }
  0xb3   : > { %1345 = vmatprep.mubr.bf16.mxu0 %v1013_v41  ;;  %1747 = vmatprep.mubr.bf16.mxu1 %v11852_v17  ;;  %v11856_v41 = vld [vmem:[#allocation49_spill] sm:$0xff]  ;;  %v1019_v17 = vpack.c.bf16 %v826_v30, %v8438_v38  ;;  %v11871_v34 = vpack.c.bf16 %v8453_v24, %v11870_v55  ;;  %v7267_v24 = vld [vmem:[%s11597_s2 + $0x1e0] sm:$0xff]  }
  0xb4   : > { %6981 = vmatpush3.bf16.msra.mxu1 %v7281_v31  ;;  %v11858_v31 = vld [vmem:[#allocation58_spill] sm:$0xff]  ;;  %v7265_v30 = vld [vmem:[%s11597_s2 + $0x1e8] sm:$0xff]  }
  0xb5   : > { %6982 = vmatprep.subr.bf16.mxu1 %v7282_v51  ;;  %v830_v14 = vrot.slane %v11858_v31, 1  ;;  %v7268_v31 = vld [vmem:[%s11597_s2 + $0x1a0] sm:$0xff]  }
  0xb7   : > { %v831_v5 = vsel %vm333_vm0, %v828_v16, %v830_v14  ;;  %v11879_v16 = vpack.c.bf16 %v8508_v62, %v11878_v46  ;;  %v11881_v62 = vpack.c.bf16 %v8520_v36, %v8345_v6  ;;  %v11882_v14 = vpack.c.bf16 %v8529_v35, %v11809_v42  ;;  %v7276_v6 = vld [vmem:[%s11597_s2 + $0x188] sm:$0xff]  }
  0xb8   : > { %6983 = vmatpush3.bf16.msra.mxu1 %v7282_v51  ;;  %v11859_v51 = vld [vmem:[#allocation46_spill] sm:$0xff]  ;;  %v1022_v13 = vpack.c.bf16 %v831_v5, %v829_v3  ;;  %v11883_v35 = vpack.c.bf16 %v8538_v63, %v11812_v53  ;;  %v11886_v36 = vpack.c.bf16 %v8563_v1, %v11817_v61  ;;  %v11892_v61 = vld [vmem:[#allocation45_spill] sm:$0xff]  ;;  %v11895_v3 = vld [vmem:[#allocation8_spill] sm:$0xff] }
  0xb9   : > { %v8701_v12 = vpack.c.bf16 %v11859_v51, %v8002_v59  ;;  %v11863_v59 = vld [vmem:[#allocation60_spill] sm:$0xff]  ;;  %v7273_v51 = vld [vmem:[%s11597_s2 + $0x190] sm:$0xff]  }
  0xba   : > { %1346 = vmatmul.mubr.bf16.gmra.mxu0 %v8685_v26  ;;  %1748 = vmatmul.mubr.bf16.gmra.mxu1 %v11856_v41  ;;  %v11869_v41 = vpack.c.bf16 %v8467_v11, %v8461_v29  ;;  %v11872_v29 = vpack.c.bf16 %v8474_v28, %v8263_v2  ;;  %v11874_v11 = vpack.c.bf16 %v8480_v57, %v11873_v20  ;;  %v11876_v57 = vld [vmem:[#allocation36_spill] sm:$0xff]  ;;  %v11887_v63 = vld [vmem:[#allocation26_spill] sm:$0xff] }
  0xbb   : > { %1353 = vmatprep.mubr.bf16.mxu0 %v1016_v37  ;;  %1755 = vmatprep.mubr.bf16.mxu1 %v11857_v9  ;;  %v11864_v37 = vld [vmem:[#allocation54_spill] sm:$0xff]  ;;  %v7261_v9 = vld [vmem:[%s11597_s2 + $0x1b8] sm:$0xff]   ;;  %v11875_v2 = vpack.c.bf16 %v8493_v45, %v11802_v21  ;;  %v11877_v28 = vpack.c.bf16 %v11876_v57, %v8314_v44  ;;  %v11880_v21 = vpack.c.bf16 %v8514_v23, %v11807_v19  ;;  %v7279_v23 = vld [vmem:[%s11597_s2 + $0x1c0] sm:$0xff]  }
  0xbc   : > { %v11865_v33 = vpack.c.bf16 %v8427_v39, %v11864_v37  ;;  %v7262_v39 = vld [vmem:[%s11597_s2 + $0x1f0] sm:$0xff]   ;;  %v7271_v45 = vld [vmem:[%s11597_s2 + $0x198] sm:$0xff]   ;;  %v11896_v5 = vld [vmem:[#allocation52_spill] sm:$0xff]  ;;  %v11904_v20 = vpack.c.bf16 %v8643_v47, %v8162_v15 }
  0xbd   : > { %v7272_v44 = vld [vmem:[%s11597_s2 + $0x1d0] sm:$0xff]   ;;  %v11900_v37 = vld [vmem:[#allocation53_spill] sm:$0xff] }
  0xbe   : > { %v11884_v19 = vld [vmem:[#allocation22_spill] sm:$0xff] }
  0xbf   : > { %v11885_v42 = vpack.c.bf16 %v11884_v19, %v8392_v22  ;;  %v11888_v22 = vld [vmem:[#allocation39_spill] sm:$0xff]  ;;  %v5769_v57 = vld [vmem:[%s7658_s8 + $0x70] sm:$0x3] }
  0xc0   : > { %v11889_v53 = vpack.c.bf16 %v11887_v63, %v11888_v22  ;;  %v8899_v19 = vld [vmem:[%s7658_s8 + $0x78] sm:$0xff]  ;;  %v8909_v63 = vld [vmem:[%s7658_s8 + $0x88] sm:$0x3] }
  0xc2   : > { %1354 = vmatmul.mubr.bf16.gmra.mxu0 %v8701_v12  ;;  %1756 = vmatmul.mubr.bf16.gmra.mxu1 %v11860_v27  ;;  %v11893_v27 = vld [vmem:[#allocation50_spill] sm:$0xff] }
  0xc3   : > { %1361 = vmatprep.mubr.bf16.mxu0 %v1019_v17  ;;  %1763 = vmatprep.mubr.bf16.mxu1 %v11861_v4  ;;  %v11890_v17 = vld [vmem:[#allocation29_spill] sm:$0xff]  ;;  %v11894_v4 = vpack.c.bf16 %v11892_v61, %v11893_v27  ;;  %v2115_v61 = vrot.slane %v5769_v57, 1  ;;  %v2229_v27 = vrot.slane %v8899_v19, 2 }
  0xc4   : > { %v11891_v1 = vpack.c.bf16 %v11890_v17, %v8404_v18  ;;  %v8832_v18 = vld [vmem:[%s7658_s8 + $0x30] sm:$0xff] }
  0xca   : > { %1362 = vmatmul.mubr.bf16.gmra.mxu0 %v11862_v58  ;;  %1764 = vmatmul.mubr.bf16.gmra.mxu1 %v11863_v59  ;;  %v11899_v59 = vld [vmem:[#allocation9_spill] sm:$0xff] }
  0xcb   : > { %1369 = vmatprep.mubr.bf16.mxu0 %v1022_v13  ;;  %1771 = vmatprep.mubr.bf16.mxu1 %v11865_v33  ;;  %v11897_v13 = vpack.c.bf16 %v11895_v3, %v11896_v5  ;;  %v11901_v33 = vpack.c.bf16 %v11899_v59, %v11900_v37  ;;  %v8922_v59 = vld [vmem:[%s7658_s8 + $0x98] sm:$0xff]  ;;  %v8925_v37 = vld [vmem:[%s7658_s8 + $0xa0] sm:$0x3] }
  0xd2   : > { %1370 = vmatmul.mubr.bf16.gmra.mxu0 %v11866_v7  ;;  %1772 = vmatmul.mubr.bf16.gmra.mxu1 %v11867_v50  ;;  %v8835_v7 = vld [vmem:[%s7658_s8 + $0x38] sm:$0xff]  ;;  %v5763_v50 = vld [vmem:[%s7658_s8 + $0x40] sm:$0x3] }
  0xd3   : > { %1779 = vmatprep.mubr.bf16.mxu1 %v11868_v10  ;;  %6936 = vmatprep.mubr.bf16.mxu0 %v11869_v41  ;;  %v2103_v10 = vrot.slane %v8835_v7, 1  ;;  %v2105_v41 = vrot.slane %v5763_v50, 1  ;;  %v2326_v22 = vpack.c.bf16 %v8835_v7, %v8832_v18 }
  0xda   : > { %1780 = vmatmul.mubr.bf16.gmra.mxu1 %v8208_v25  ;;  %6937 = vmatmul.mubr.bf16.vlgmr.msra.gmra.mxu0 %v11871_v34  ;;  %v7266_v25 = vld [vmem:[%s11597_s2 + $0x1a8] sm:$0xff]   ;;  %v11902_v34 = vpack.c.bf16 %v8625_v32, %v11840_v0  ;;  %v5766_v0 = vld [vmem:[%s7658_s8 + $0x58] sm:$0x3] }
  0xdb   : > { %6329 = vmatpush3.bf16.msra.mxu0 %v7261_v9  ;;  %1787 = vmatprep.mubr.bf16.mxu1 %v11872_v29  ;;  %v8841_v9 = vld [vmem:[%s7658_s8 + $0x180] sm:$0xff]  ;;  %v11903_v29 = vpack.c.bf16 %v8629_v43, %v8438_v38 }
  0xdc   : > { %6940 = vmatprep.mubr.bf16.mxu0 %v11874_v11  ;;  %6330 = vmatprep.subr.bf16.mxu0 %v7262_v39  ;;  %v2215_v39 = vrot.slane %v8835_v7, 2  ;;  %v2237_v7 = vrot.slane %v8925_v37, 2 }
  0xdf   : > { %6331 = vmatpush3.bf16.msra.mxu0 %v7263_v40  ;;  %v2217_v40 = vrot.slane %v5763_v50, 2 }
  0xe0   : > { %6332 = vmatprep.subr.bf16.mxu0 %v7265_v30  ;;  %v2106_v30 = vsel %vm333_vm0, %v2103_v10, %v2105_v41 }
  0xe1   : > { %v2218_v38 = vsel %vm446_vm1, %v2215_v39, %v2217_v40  ;;  %v8937_v40 = vld [vmem:[%s7658_s8 + $0xa8] sm:$0xff] }
  0xe2   : > { %1788 = vmatmul.mubr.bf16.gmra.mxu1 %v8213_v56  ;;  %6941 = vmatmul.mubr.bf16.gmra.mxu0 %v11875_v2  ;;  %v7270_v56 = vld [vmem:[%s11597_s2 + $0x1d8] sm:$0xff]   ;;  %v8874_v2 = vld [vmem:[%s7658_s8 + $0x60] sm:$0xff] }
  0xe3   : > { %1795 = vmatprep.mubr.bf16.mxu1 %v11877_v28  ;;  %6944 = vmatprep.mubr.bf16.mxu0 %v11879_v16  ;;  %v2112_v17 = vrot.slane %v8874_v2, 1 }
  0xe4   : > { %6333 = vmatpush3.bf16.msra.mxu0 %v7266_v25  ;;  %v8863_v25 = vld [vmem:[%s7658_s8 + $0x48] sm:$0xff] }
  0xe5   : > { %6334 = vmatprep.subr.bf16.mxu0 %v7267_v24  ;;  %v2219_v15 = vrot.slane %v8863_v25, 2  ;;  %v2222_v24 = vrot.slane %v5766_v0, 2  ;;  %v2107_v46 = vrot.slane %v8863_v25, 1 }
  0xe8   : > { %6335 = vmatpush3.bf16.msra.mxu0 %v7268_v31  ;;  %v2110_v31 = vrot.slane %v5766_v0, 1  ;;  %v8945_v0 = vld [vmem:[%s7658_s8 + $0xb8] sm:$0x3] }
  0xe9   : > { %6336 = vmatprep.subr.bf16.mxu0 %v7270_v56  ;;  %v8880_v56 = vld [vmem:[%s7658_s8 + $0x68] sm:$0xff] }
  0xea   : > { %1796 = vmatmul.mubr.bf16.gmra.mxu1 %v11827_v60  ;;  %6945 = vmatmul.mubr.bf16.gmra.mxu0 %v11880_v21  ;;  %v7275_v60 = vld [vmem:[%s11597_s2 + $0x1c8] sm:$0xff]   ;;  %v2224_v21 = vrot.slane %v8874_v2, 2 }
  0xeb   : > { %1803 = vmatprep.mubr.bf16.mxu1 %v11881_v62  ;;  %6948 = vmatprep.mubr.bf16.mxu0 %v11882_v14  ;;  %v2225_v62 = vrot.slane %v8880_v56, 2  ;;  %v2227_v14 = vrot.slane %v5769_v57, 2 }
  0xec   : > { %6337 = vmatpush3.bf16.msra.mxu0 %v7271_v45  ;;  %v8883_v45 = vld [vmem:[%s7658_s8 + $0x198] sm:$0xff] }
  0xed   : > { %6338 = vmatprep.subr.bf16.mxu0 %v7272_v44  ;;  %v8886_v44 = vld [vmem:[%s7658_s8 + $0x1a0] sm:$0xff] }
  0xf0   : > { %6339 = vmatpush3.bf16.msra.mxu0 %v7273_v51 }
  0xf1   : > { %6340 = vmatprep.subr.bf16.mxu0 %v7275_v60  ;;  %v11905_v60 = vld [vmem:[#allocation63_spill] sm:$0xff] }
  0xf2   : > { %1804 = vmatmul.mubr.bf16.gmra.mxu1 %v8633_v48  ;;  %6949 = vmatmul.mubr.bf16.gmra.mxu0 %v11883_v35  ;;  %v7280_v48 = vld [vmem:[%s11597_s2 + $0x180] sm:$0xff]  }
  0xf3   : > { %1811 = vmatprep.mubr.bf16.mxu1 %v11885_v42  ;;  %6952 = vmatprep.mubr.bf16.mxu0 %v11886_v36 }
  0xf4   : > { %6341 = vmatpush3.bf16.msra.mxu0 %v7276_v6  ;;  %v11906_v6 = vpack.c.bf16 %v8647_v54, %v11905_v60  ;;  %v2228_v54 = vsel %vm446_vm1, %v2225_v62, %v2227_v14  ;;  %v8963_v14 = vld [vmem:[%s7658_s8 + $0xc8] sm:$0xff]  ;;  %v8966_v60 = vld [vmem:[%s7658_s8 + $0xd0] sm:$0x3] }
  0xf5   : > { %6342 = vmatprep.subr.bf16.mxu0 %v7279_v23 }
  0xf8   : > { %6343 = vmatpush3.bf16.msra.mxu0 %v7280_v48  ;;  %v8906_v48 = vld [vmem:[%s7658_s8 + $0x80] sm:$0xff] }
  0xf9   : > { %v2230_v5 = vrot.slane %v8906_v48, 2 }
  0xfa   : > { %1812 = vmatmul.mubr.bf16.gmra.mxu1 %v8669_v8  ;;  %6953 = vmatmul.mubr.bf16.gmra.mxu0 %v11889_v53  ;;  %v11898_v8 = vpack.c.bf16 %v8604_v49, %v8421_v52  ;;  %v8844_v52 = vld [vmem:[%s7658_s8 + $0x188] sm:$0xff]  ;;  %v2214_v49 = vrot.slane %v8832_v18, 2 }
  0xfb   : > { %1819 = vmatprep.mubr.bf16.mxu1 %v11891_v1  ;;  %6956 = vmatprep.mubr.bf16.mxu0 %v11894_v4  ;;  %v2113_v1 = vrot.slane %v8880_v56, 1 }
  0xfc   : > { %v2216_v32 = vsel %vm446_vm1, %v2214_v49, %v2215_v39  ;;  %v2231_v49 = vsel %vm446_vm1, %v2229_v27, %v2230_v5  ;;  %v8980_v27 = vld [vmem:[%s7658_s8 + $0xd8] sm:$0xff] }
  0xfd   : > { %v2328_v28 = vpack.c.bf16 %v2218_v38, %v2216_v32  ;;  %v2116_v41 = vsel %vm333_vm0, %v2113_v1, %v2115_v61 }
 0x102   : > { %1820 = vmatmul.mubr.bf16.gmra.mxu1 %v8685_v26  ;;  %6957 = vmatmul.mubr.bf16.gmra.mxu0 %v11897_v13  ;;  %v2102_v26 = vrot.slane %v8832_v18, 1  ;;  %v2232_v13 = vrot.slane %v8909_v63, 2  ;;  %v2235_v18 = vrot.slane %v8922_v59, 2 }
 0x103   : > { %1827 = vmatprep.mubr.bf16.mxu1 %v11898_v8  ;;  %6960 = vmatprep.mubr.bf16.mxu0 %v11901_v33  ;;  %v8919_v8 = vld [vmem:[%s7658_s8 + $0x90] sm:$0xff] }
 0x104   : > { %v2104_v11 = vsel %vm333_vm0, %v2102_v26, %v2103_v10  ;;  %v2234_v33 = vrot.slane %v8919_v8, 2  ;;  %v2114_v10 = vsel %vm333_vm0, %v2112_v17, %v2113_v1  ;;  %v2233_v39 = vsel %vm446_vm1, %v2230_v5, %v2232_v13 }
 0x105   : > { %v2327_v43 = vpack.c.bf16 %v2106_v30, %v2104_v11  ;;  %v2238_v11 = vsel %vm446_vm1, %v2235_v18, %v2237_v7  ;;  %v8942_v30 = vld [vmem:[%s7658_s8 + $0xb0] sm:$0xff]  ;;  %v2337_v57 = vpack.c.bf16 %v2233_v39, %v2231_v49 }
 0x10a   : > { %1828 = vmatmul.mubr.bf16.gmra.mxu1 %v8701_v12  ;;  %6961 = vmatmul.mubr.bf16.gmra.mxu0 %v11902_v34  ;;  %v8866_v12 = vld [vmem:[%s7658_s8 + $0x50] sm:$0xff] }
 0x10b   : > { %1835 = vmatprep.mubr.bf16.mxu1 %v11903_v29  ;;  %6964 = vmatprep.mubr.bf16.mxu0 %v11904_v20  ;;  %v2220_v47 = vrot.slane %v8866_v12, 2  ;;  %v2108_v16 = vrot.slane %v8866_v12, 1  ;;  %v2236_v20 = vsel %vm446_vm1, %v2234_v33, %v2235_v18  ;;  %v2329_v38 = vpack.c.bf16 %v8866_v12, %v8863_v25  ;;  %v8960_v12 = vld [vmem:[%s7658_s8 + $0xc0] sm:$0xff]  ;;  %v8988_v18 = vld [vmem:[%s7658_s8 + $0xe8] sm:$0x3] }
 0x10c   : > { %v2242_v25 = vrot.slane %v8945_v0, 2  ;;  %v8985_v33 = vld [vmem:[%s7658_s8 + $0xe0] sm:$0xff] }
 0x10d   : > { %v2221_v23 = vsel %vm446_vm1, %v2219_v15, %v2220_v47  ;;  %v2223_v35 = vsel %vm446_vm1, %v2220_v47, %v2222_v24  ;;  %v2109_v42 = vsel %vm333_vm0, %v2107_v46, %v2108_v16  ;;  %v2111_v36 = vsel %vm333_vm0, %v2108_v16, %v2110_v31 }
 0x10e   : > { %v2331_v53 = vpack.c.bf16 %v2223_v35, %v2221_v23  ;;  %v2330_v4 = vpack.c.bf16 %v2111_v36, %v2109_v42  ;;  %v2117_v15 = vrot.slane %v8899_v19, 1  ;;  %v2120_v46 = vrot.slane %v8909_v63, 1 }
 0x10f   : > { %v2239_v16 = vrot.slane %v8937_v40, 2  ;;  %v2244_v35 = vrot.slane %v8960_v12, 2  ;;  %v2245_v42 = vrot.slane %v8963_v14, 2  ;;  %v2247_v36 = vrot.slane %v8966_v60, 2 }
 0x111   : > { %v2246_v5 = vsel %vm446_vm1, %v2244_v35, %v2245_v42  ;;  %v2248_v13 = vsel %vm446_vm1, %v2245_v42, %v2247_v36  ;;  %v9025_v36 = vld [vmem:[%s7658_s8 + $0x108] sm:$0xff] }
 0x112   : > { %1836 = vmatmul.mubr.bf16.gmra.mxu1 %v11862_v58  ;;  %6965 = vmatmul.mubr.bf16.gmra.mxu0 %v11906_v6  ;;  %v2226_v58 = vsel %vm446_vm1, %v2224_v21, %v2225_v62  ;;  %v2340_v21 = vpack.c.bf16 %v2238_v11, %v2236_v20  ;;  %v2240_v62 = vrot.slane %v8942_v30, 2  ;;  %v2249_v11 = vrot.slane %v8980_v27, 2 }
 0x113   : > { %2599 = vmatprep.mubr.bf16.mxu0 %v2327_v43  ;;  %6984 = vmatprep.mubr.bf16.mxu1 %v2328_v28  ;;  %v2334_v3 = vpack.c.bf16 %v2228_v54, %v2226_v58  ;;  %v2333_v43 = vpack.c.bf16 %v2116_v41, %v2114_v10  ;;  %v2118_v28 = vrot.slane %v8906_v48, 1  ;;  %v2122_v10 = vrot.slane %v8919_v8, 1 }
 0x114   : > { %v2241_v1 = vsel %vm446_vm1, %v2239_v16, %v2240_v62  ;;  %v2243_v61 = vsel %vm446_vm1, %v2240_v62, %v2242_v25  ;;  %v2123_v41 = vrot.slane %v8922_v59, 1 }
 0x115   : > { %v2343_v20 = vpack.c.bf16 %v2243_v61, %v2241_v1  ;;  %v9032_v1 = vld [vmem:[%s7658_s8 + $0x110] sm:$0xff] }
 0x116   : > { %v2124_v25 = vsel %vm333_vm0, %v2122_v10, %v2123_v41  ;;  %v2128_v10 = vrot.slane %v8942_v30, 1 }
 0x11a   : > { %v6072_v50 = vpop.f32.mrf.mxu0  ;;  %v8930_v26 = vpop.f32.mrf.mxu1  ;;  %2600 = vmatmul.mubr.bf16.vlgmr.msra.gmra.mxu0 %v2326_v22  ;;  %6985 = vmatmul.mubr.bf16.vlgmr.msra.gmra.mxu1 %v2331_v53  ;;  %v2119_v22 = vsel %vm333_vm0, %v2117_v15, %v2118_v28  ;;  %v2121_v53 = vsel %vm333_vm0, %v2118_v28, %v2120_v46  ;;  %v9007_v15 = vld [vmem:[%s7658_s8 + $0xf8] sm:$0xff] }
 0x11b   : > { %2607 = vmatprep.mubr.bf16.mxu0 %v2330_v4  ;;  %6988 = vmatprep.mubr.bf16.mxu1 %v2334_v3  ;;  %v2255_v46 = vrot.slane %v9007_v15, 2 }
 0x11c   : > { %v6073_v34 = vpop.f32.mrf.mxu0  ;;  %v1412_v29 = vpop.f32.mrf.mxu1 }
 0x11d   : > { %v6074_v32 = vadd.f32 %v6073_v34, %v6072_v50  ;;  %v2332_v50 = vpack.c.bf16 %v8880_v56, %v8874_v2  ;;  %v2336_v34 = vpack.c.bf16 %v2121_v53, %v2119_v22  ;;  %v2252_v2 = vrot.slane %v8988_v18, 2  ;;  %v9004_v56 = vld [vmem:[%s7658_s8 + $0xf0] sm:$0xff] }
 0x11e   : > { %v6075_v47 = vpop.f32.mrf.mxu0  ;;  %v8950_v24 = vpop.f32.mrf.mxu1 }
 0x11f   : > { %v8955_v31 = vadd.f32 %v6074_v32, %v1412_v29  ;;  %v2125_v29 = vrot.slane %v8925_v37, 1  ;;  %v2254_v37 = vrot.slane %v9004_v56, 2 }
 0x120   : > { %v6076_v6 = vpop.f32.mrf.mxu0  ;;  %v1415_v23 = vpop.f32.mrf.mxu1 }
 0x121   : > { %v6077_v58 = vadd.f32 %v6076_v6, %v6075_v47  ;;  %v9010_v47 = vld [vmem:[%s7658_s8 + $0x100] sm:$0x3]  ;;  %v2126_v6 = vsel %vm333_vm0, %v2123_v41, %v2125_v29  ;;  %v2256_v22 = vsel %vm446_vm1, %v2254_v37, %v2255_v46  ;;  %v2130_v41 = vrot.slane %v8945_v0, 1 }
 0x122   : > { %v6078_v54 = vpop.f32.mrf.mxu0  ;;  %v8971_v63 = vpop.f32.mrf.mxu1  ;;  %2608 = vmatmul.mubr.bf16.gmra.mxu0 %v2329_v38  ;;  %6989 = vmatmul.mubr.bf16.gmra.mxu1 %v2337_v57  ;;  %v2346_v38 = vpack.c.bf16 %v2248_v13, %v2246_v5  ;;  %v2339_v5 = vpack.c.bf16 %v2126_v6, %v2124_v25  ;;  %v2127_v13 = vrot.slane %v8937_v40, 1 }
 0x123   : > { %v8975_v17 = vadd.f32 %v6077_v58, %v1415_v23  ;;  %2615 = vmatprep.mubr.bf16.mxu0 %v2333_v43  ;;  %6992 = vmatprep.mubr.bf16.mxu1 %v2340_v21  ;;  %v2250_v43 = vrot.slane %v8985_v33, 2  ;;  %v2131_v25 = vsel %vm333_vm0, %v2128_v10, %v2130_v41  ;;  %v2132_v41 = vrot.slane %v8960_v12, 1 }
 0x124   : > { %v6079_v4 = vpop.f32.mrf.mxu0  ;;  %v1428_v3 = vpop.f32.mrf.mxu1 }
 0x125   : > { %v6080_v7 = vadd.f32 %v6079_v4, %v6078_v54  ;;  %v2251_v35 = vsel %vm446_vm1, %v2249_v11, %v2250_v43  ;;  %v2253_v42 = vsel %vm446_vm1, %v2250_v43, %v2252_v2  ;;  %v2335_v4 = vpack.c.bf16 %v8906_v48, %v8899_v19  ;;  %v9050_v48 = vld [vmem:[%s7658_s8 + $0x120] sm:$0xff]  ;;  %v9056_v43 = vld [vmem:[%s7658_s8 + $0x130] sm:$0x3] }
 0x126   : > { %v6081_v49 = vpop.f32.mrf.mxu0  ;;  %v8994_v39 = vpop.f32.mrf.mxu1  ;;  %v2260_v11 = vrot.slane %v9032_v1, 2  ;;  %v2264_v0 = vrot.slane %v9050_v48, 2  ;;  %v2267_v37 = vrot.slane %v9056_v43, 2 }
 0x127   : > { %v8999_v32 = vadd.f32 %v8930_v26, %v6080_v7  ;;  %v2257_v26 = vrot.slane %v9010_v47, 2 }
 0x128   : > { %v6082_v57 = vpop.f32.mrf.mxu0  ;;  %v1431_v28 = vpop.f32.mrf.mxu1 }
 0x129   : > { %v6083_v16 = vadd.f32 %v6082_v57, %v6081_v49  ;;  %v2258_v53 = vsel %vm446_vm1, %v2255_v46, %v2257_v26  ;;  %v2349_v49 = vpack.c.bf16 %v2253_v42, %v2251_v35 }
 0x12a   : > { %v6084_v21 = vpop.f32.mrf.mxu0  ;;  %v9015_v62 = vpop.f32.mrf.mxu1  ;;  %2616 = vmatmul.mubr.bf16.gmra.mxu0 %v2332_v50  ;;  %6993 = vmatmul.mubr.bf16.gmra.mxu1 %v2343_v20  ;;  %v2352_v20 = vpack.c.bf16 %v2258_v53, %v2256_v22 }
 0x12b   : > { %v9020_v23 = vadd.f32 %v8950_v24, %v6083_v16  ;;  %2623 = vmatprep.mubr.bf16.mxu0 %v2336_v34  ;;  %6996 = vmatprep.mubr.bf16.mxu1 %v2346_v38  ;;  %v9035_v24 = vld [vmem:[%s7658_s8 + $0x118] sm:$0x3]  ;;  %v2259_v34 = vrot.slane %v9025_v36, 2  ;;  %v9053_v38 = vld [vmem:[%s7658_s8 + $0x128] sm:$0xff] }
 0x12c   : > { %v6085_v58 = vpop.f32.mrf.mxu0  ;;  %v9027_v54 = vpop.f32.mrf.mxu1  ;;  %v2262_v19 = vrot.slane %v9035_v24, 2 }
 0x12d   : > { %v6086_v61 = vadd.f32 %v6085_v58, %v6084_v21  ;;  %v2129_v21 = vsel %vm333_vm0, %v2127_v13, %v2128_v10  ;;  %v2261_v35 = vsel %vm446_vm1, %v2259_v34, %v2260_v11  ;;  %v9072_v58 = vld [vmem:[%s7658_s8 + $0x138] sm:$0xff]  ;;  %v9079_v13 = vld [vmem:[%s7658_s8 + $0x140] sm:$0xff] }
 0x12e   : > { %v6087_v7 = vpop.f32.mrf.mxu0  ;;  %v9040_v50 = vpop.f32.mrf.mxu1  ;;  %v2263_v42 = vsel %vm446_vm1, %v2260_v11, %v2262_v19  ;;  %v2342_v10 = vpack.c.bf16 %v2131_v25, %v2129_v21  ;;  %v2135_v11 = vrot.slane %v8966_v60, 1 }
 0x12f   : > { %v9045_v29 = vadd.f32 %v6086_v61, %v1428_v3  ;;  %v2265_v3 = vrot.slane %v9053_v38, 2  ;;  %v2355_v19 = vpack.c.bf16 %v2263_v42, %v2261_v35 }
 0x130   : > { %v6088_v2 = vpop.f32.mrf.mxu0  ;;  %v9058_v57 = vpop.f32.mrf.mxu1 }
 0x131   : > { %11907 = vst [vmem:[#allocation13_spill] sm:$0xff] %v9045_v29  ;;  %v6089_v46 = vadd.f32 %v6088_v2, %v6087_v7  ;;  %v2266_v61 = vsel %vm446_vm1, %v2264_v0, %v2265_v3  ;;  %v2338_v7 = vpack.c.bf16 %v8922_v59, %v8919_v8  ;;  %v2269_v2 = vrot.slane %v9072_v58, 2  ;;  %v9098_v59 = vld [vmem:[%s7658_s8 + $0x150] sm:$0xff] }
 0x132   : > { %v6090_v26 = vpop.f32.mrf.mxu0  ;;  %v9063_v16 = vpop.f32.mrf.mxu1  ;;  %2624 = vmatmul.mubr.bf16.gmra.mxu0 %v2335_v4  ;;  %6997 = vmatmul.mubr.bf16.gmra.mxu1 %v2349_v49  ;;  %v2268_v4 = vsel %vm446_vm1, %v2265_v3, %v2267_v37  ;;  %v2270_v37 = vrot.slane %v9079_v13, 2  ;;  %v2274_v60 = vrot.slane %v9098_v59, 2  ;;  %v2285_v29 = vrot.slane %v8844_v52, 2 }
 0x133   : > { %v9067_v6 = vadd.f32 %v6089_v46, %v1431_v28  ;;  %2631 = vmatprep.mubr.bf16.mxu0 %v2339_v5  ;;  %7000 = vmatprep.mubr.bf16.mxu1 %v2352_v20  ;;  %v9082_v28 = vld [vmem:[%s7658_s8 + $0x148] sm:$0x3]  ;;  %v2133_v20 = vrot.slane %v8963_v14, 1  ;;  %v2358_v3 = vpack.c.bf16 %v2268_v4, %v2266_v61  ;;  %v9101_v46 = vld [vmem:[%s7658_s8 + $0x158] sm:$0xff] }
 0x134   : > { %v6091_v22 = vpop.f32.mrf.mxu0  ;;  %v9074_v53 = vpop.f32.mrf.mxu1  ;;  %v2272_v8 = vrot.slane %v9082_v28, 2  ;;  %v2271_v55 = vsel %vm446_vm1, %v2269_v2, %v2270_v37  ;;  %v2137_v2 = vrot.slane %v8980_v27, 1 }
 0x135   : > { %11908 = vst [vmem:[#allocation15_spill] sm:$0xff] %v9067_v6  ;;  %v6092_v5 = vadd.f32 %v6091_v22, %v6090_v26  ;;  %v9104_v26 = vld [vmem:[%s7658_s8 + $0x160] sm:$0x3]  ;;  %v2134_v4 = vsel %vm333_vm0, %v2132_v41, %v2133_v20 }
 0x136   : > { %v6093_v49 = vpop.f32.mrf.mxu0  ;;  %v9087_v34 = vpop.f32.mrf.mxu1  ;;  %v2277_v35 = vrot.slane %v9104_v26, 2 }
 0x137   : > { %v9093_v0 = vadd.f32 %v8971_v63, %v6092_v5  ;;  %v2275_v63 = vrot.slane %v9101_v46, 2  ;;  %v2136_v5 = vsel %vm333_vm0, %v2133_v20, %v2135_v11  ;;  %v9128_v20 = vld [vmem:[%s7658_s8 + $0x170] sm:$0xff] }
 0x138   : > { %v6094_v21 = vpop.f32.mrf.mxu0  ;;  %v9106_v25 = vpop.f32.mrf.mxu1 }
 0x139   : > { %11909 = vst [vmem:[#allocation16_spill] sm:$0xff] %v9093_v0  ;;  %v6095_v42 = vadd.f32 %v6094_v21, %v6093_v49  ;;  %v2273_v49 = vsel %vm446_vm1, %v2270_v37, %v2272_v8  ;;  %v9121_v21 = vld [vmem:[%s7658_s8 + $0x168] sm:$0xff]  ;;  %v2278_v41 = vsel %vm446_vm1, %v2275_v63, %v2277_v35 }
 0x13a   : > { %v6096_v22 = vpop.f32.mrf.mxu0  ;;  %v9111_v61 = vpop.f32.mrf.mxu1  ;;  %2632 = vmatmul.mubr.bf16.gmra.mxu0 %v2338_v7  ;;  %7001 = vmatmul.mubr.bf16.gmra.mxu1 %v2355_v19  ;;  %11911 = vst [vmem:[#allocation20_spill] sm:$0xff] %v9121_v21  ;;  %v2276_v7 = vsel %vm446_vm1, %v2274_v60, %v2275_v63  ;;  %v2345_v19 = vpack.c.bf16 %v2136_v5, %v2134_v4  ;;  %v2138_v60 = vrot.slane %v8985_v33, 1  ;;  %v2140_v63 = vrot.slane %v8988_v18, 1 }
 0x13b   : > { %v9116_v51 = vadd.f32 %v8994_v39, %v6095_v42  ;;  %2639 = vmatprep.mubr.bf16.mxu0 %v2342_v10  ;;  %7004 = vmatprep.mubr.bf16.mxu1 %v2358_v3  ;;  %v9131_v39 = vld [vmem:[%s7658_s8 + $0x178] sm:$0x3]  ;;  %v2341_v10 = vpack.c.bf16 %v8942_v30, %v8937_v40  ;;  %v9137_v3 = vld [vmem:[%s7658_s8 + $0x190] sm:$0x3]  ;;  %v2361_v35 = vpack.c.bf16 %v2273_v49, %v2271_v55  ;;  %v2279_v42 = vrot.slane %v9121_v21, 2 }
 0x13c   : > { %v6097_v0 = vpop.f32.mrf.mxu0  ;;  %v9123_v6 = vpop.f32.mrf.mxu1  ;;  %v2280_v40 = vrot.slane %v9128_v20, 2  ;;  %v2282_v30 = vrot.slane %v9131_v39, 2  ;;  %v2287_v18 = vrot.slane %v9137_v3, 2 }
 0x13d   : > { %11910 = vst [vmem:[#allocation18_spill] sm:$0xff] %v9116_v51  ;;  %v6098_v11 = vadd.f32 %v6097_v0, %v6096_v22  ;;  %v2364_v22 = vpack.c.bf16 %v2278_v41, %v2276_v7  ;;  %v2284_v51 = vrot.slane %v8841_v9, 2  ;;  %v2141_v7 = vsel %vm333_vm0, %v2138_v60, %v2140_v63 }
 0x13e   : > { %v6099_v37 = vpop.f32.mrf.mxu0  ;;  %v9139_v8 = vpop.f32.mrf.mxu1 }
 0x13f   : > { %v9145_v0 = vadd.f32 %v6098_v11, %v9027_v54  ;;  %v2139_v54 = vsel %vm333_vm0, %v2137_v2, %v2138_v60  ;;  %v2281_v11 = vsel %vm446_vm1, %v2279_v42, %v2280_v40  ;;  %v9168_v2 = vld [vmem:[%s7658_s8 + $0x1a8] sm:$0x3] }
 0x140   : > { %v6100_v4 = vpop.f32.mrf.mxu0  ;;  %v9149_v5 = vpop.f32.mrf.mxu1 }
 0x141   : > { %11912 = vst [vmem:[#allocation21_spill] sm:$0xff] %v9145_v0  ;;  %11913 = vst [vmem:[#allocation25_spill] sm:$0xff] %v9149_v5  ;;  %v6101_v55 = vadd.f32 %v6100_v4, %v6099_v37  ;;  %v2283_v5 = vsel %vm446_vm1, %v2280_v40, %v2282_v30  ;;  %v2286_v0 = vsel %vm446_vm1, %v2284_v51, %v2285_v29  ;;  %v2290_v51 = vrot.slane %v8886_v44, 2 }
 0x142   : > { %v6102_v49 = vpop.f32.mrf.mxu0  ;;  %v9154_v21 = vpop.f32.mrf.mxu1  ;;  %2640 = vmatmul.mubr.bf16.gmra.mxu0 %v2341_v10  ;;  %7005 = vmatmul.mubr.bf16.gmra.mxu1 %v2361_v35  ;;  %v2288_v10 = vsel %vm446_vm1, %v2285_v29, %v2287_v18  ;;  %v2367_v42 = vpack.c.bf16 %v2283_v5, %v2281_v11  ;;  %v2292_v29 = vrot.slane %v9168_v2, 2 }
 0x143   : > { %v9159_v41 = vadd.f32 %v6101_v55, %v9058_v57  ;;  %2647 = vmatprep.mubr.bf16.mxu0 %v2345_v19  ;;  %7008 = vmatprep.mubr.bf16.mxu1 %v2364_v22  ;;  %v2344_v57 = vpack.c.bf16 %v8963_v14, %v8960_v12  ;;  %v2348_v19 = vpack.c.bf16 %v2141_v7, %v2139_v54  ;;  %v2289_v22 = vrot.slane %v8883_v45, 2 }
 0x144   : > { %v6103_v37 = vpop.f32.mrf.mxu0  ;;  %v9163_v4 = vpop.f32.mrf.mxu1  ;;  %v2370_v30 = vpack.c.bf16 %v2288_v10, %v2286_v0  ;;  %v2145_v12 = vrot.slane %v9010_v47, 1  ;;  %v2293_v7 = vsel %vm446_vm1, %v2290_v51, %v2292_v29  ;;  %v2147_v29 = vrot.slane %v9025_v36, 1 }
 0x145   : > { %v6104_v60 = vadd.f32 %v6103_v37, %v6102_v49  ;;  %v2142_v49 = vrot.slane %v9004_v56, 1  ;;  %v2143_v37 = vrot.slane %v9007_v15, 1  ;;  %v2291_v0 = vsel %vm446_vm1, %v2289_v22, %v2290_v51 }
 0x146   : > { %v6105_v63 = vpop.f32.mrf.mxu0  ;;  %v9170_v35 = vpop.f32.mrf.mxu1 }
 0x147   : > { %v9176_v40 = vadd.f32 %v9015_v62, %v6104_v60  ;;  %v2144_v47 = vsel %vm333_vm0, %v2142_v49, %v2143_v37  ;;  %v2146_v60 = vsel %vm333_vm0, %v2143_v37, %v2145_v12  ;;  %v2148_v49 = vrot.slane %v9032_v1, 1 }
 0x148   : > { %v6106_v18 = vpop.f32.mrf.mxu0  ;;  %v9180_v55 = vpop.f32.mrf.mxu1  ;;  %v2351_v22 = vpack.c.bf16 %v2146_v60, %v2144_v47  ;;  %v2150_v37 = vrot.slane %v9035_v24, 1  ;;  %v2350_v60 = vpack.c.bf16 %v9007_v15, %v9004_v56 }
 0x149   : > { %v6107_v14 = vadd.f32 %v6106_v18, %v6105_v63 }
 0x14a   : > { %v6108_v5 = vpop.f32.mrf.mxu0  ;;  %v9185_v54 = vpop.f32.mrf.mxu1  ;;  %2648 = vmatmul.mubr.bf16.gmra.mxu0 %v2344_v57  ;;  %7009 = vmatmul.mubr.bf16.gmra.mxu1 %v2367_v42 }
 0x14b   : > { %v9188_v62 = vadd.f32 %v9040_v50, %v6107_v14  ;;  %2655 = vmatprep.mubr.bf16.mxu0 %v2348_v19  ;;  %7012 = vmatprep.mubr.bf16.mxu1 %v2370_v30  ;;  %v2347_v50 = vpack.c.bf16 %v8985_v33, %v8980_v27  ;;  %v2373_v19 = vpack.c.bf16 %v2293_v7, %v2291_v0 }
 0x14c   : > { %v6109_v11 = vpop.f32.mrf.mxu0  ;;  %v9192_v10 = vpop.f32.mrf.mxu1  ;;  %v2149_v0 = vsel %vm333_vm0, %v2147_v29, %v2148_v49  ;;  %v2151_v7 = vsel %vm333_vm0, %v2148_v49, %v2150_v37 }
 0x14d   : > { %v6110_v63 = vadd.f32 %v6109_v11, %v6108_v5 }
 0x14e   : > { %v6111_v18 = vpop.f32.mrf.mxu0  ;;  %v9196_v57 = vpop.f32.mrf.mxu1 }
 0x14f   : > { %v9201_v42 = vadd.f32 %v6110_v63, %v9074_v53 }
 0x150   : > { %v6112_v30 = vpop.f32.mrf.mxu0  ;;  %v9203_v51 = vpop.f32.mrf.mxu1 }
 0x151   : > { %v6113_v12 = vadd.f32 %v6112_v30, %v6111_v18  ;;  %v2155_v30 = vrot.slane %v9056_v43, 1  ;;  %v2353_v43 = vpack.c.bf16 %v9032_v1, %v9025_v36 }
 0x152   : > { %v6114_v14 = vpop.f32.mrf.mxu0  ;;  %v9208_v5 = vpop.f32.mrf.mxu1  ;;  %2656 = vmatmul.mubr.bf16.gmra.mxu0 %v2347_v50  ;;  %7013 = vmatmul.mubr.bf16.gmra.mxu1 %v2373_v19  ;;  %v2152_v19 = vrot.slane %v9050_v48, 1 }
 0x153   : > { %v9211_v27 = vadd.f32 %v6113_v12, %v9106_v25  ;;  %2663 = vmatprep.mubr.bf16.mxu0 %v2351_v22  ;;  %v2354_v25 = vpack.c.bf16 %v2151_v7, %v2149_v0  ;;  %v2153_v22 = vrot.slane %v9053_v38, 1 }
 0x154   : > { %v6115_v33 = vpop.f32.mrf.mxu0  ;;  %v9213_v53 = vpop.f32.mrf.mxu1 }
 0x155   : > { %v6116_v11 = vadd.f32 %v6115_v33, %v6114_v14  ;;  %v2156_v14 = vsel %vm333_vm0, %v2153_v22, %v2155_v30  ;;  %v2160_v30 = vrot.slane %v9082_v28, 1 }
 0x156   : > { %v6117_v47 = vpop.f32.mrf.mxu0  ;;  %v9217_v24 = vpop.f32.mrf.mxu1 }
 0x157   : > { %v9222_v63 = vadd.f32 %v9063_v16, %v6116_v11  ;;  %v2154_v16 = vsel %vm333_vm0, %v2152_v19, %v2153_v22  ;;  %v2157_v19 = vrot.slane %v9072_v58, 1  ;;  %v2158_v22 = vrot.slane %v9079_v13, 1 }
 0x158   : > { %v6118_v18 = vpop.f32.mrf.mxu0  ;;  %v9224_v50 = vpop.f32.mrf.mxu1 }
 0x159   : > { %v6119_v29 = vadd.f32 %v6118_v18, %v6117_v47 }
 0x15a   : > { %v6120_v49 = vpop.f32.mrf.mxu0  ;;  %v6208_v37 = vpop.f32.mrf.mxu1  ;;  %2664 = vmatmul.mubr.bf16.gmra.mxu0 %v2350_v60  ;;  %v2357_v60 = vpack.c.bf16 %v2156_v14, %v2154_v16 }
 0x15b   : > { %v9230_v12 = vadd.f32 %v9087_v34, %v6119_v29  ;;  %2671 = vmatprep.mubr.bf16.mxu0 %v2354_v25 }
 0x15c   : > { %v6121_v56 = vpop.f32.mrf.mxu0  ;;  %v6209_v15 = vpop.f32.mrf.mxu1 }
 0x15d   : > { %v6122_v33 = vadd.f32 %v6121_v56, %v6120_v49  ;;  %v6210_v0 = vadd.f32 %v6209_v15, %v6208_v37  ;;  %v2159_v56 = vsel %vm333_vm0, %v2157_v19, %v2158_v22  ;;  %v2161_v15 = vsel %vm333_vm0, %v2158_v22, %v2160_v30 }
 0x15e   : > { %v6123_v7 = vpop.f32.mrf.mxu0  ;;  %v6211_v11 = vpop.f32.mrf.mxu1  ;;  %v2165_v19 = vrot.slane %v9104_v26, 1 }
 0x15f   : > { %v9237_v47 = vadd.f32 %v6122_v33, %v9123_v6  ;;  %v9240_v34 = vadd.f32 %v6210_v0, %v8955_v31  ;;  %v2356_v0 = vpack.c.bf16 %v9053_v38, %v9050_v48 }
 0x160   : > { %v6124_v25 = vpop.f32.mrf.mxu0  ;;  %v6212_v18 = vpop.f32.mrf.mxu1 }
 0x161   : > { %v9245_v29 = vadd.f32 %v6124_v25, %v6123_v7  ;;  %v6213_v49 = vadd.f32 %v6212_v18, %v6211_v11  ;;  %v2360_v11 = vpack.c.bf16 %v2161_v15, %v2159_v56  ;;  %v2162_v25 = vrot.slane %v9098_v59, 1 }
 0x162   : > { %v6126_v37 = vpop.f32.mrf.mxu0  ;;  %v6214_v36 = vpop.f32.mrf.mxu1  ;;  %2672 = vmatmul.mubr.bf16.gmra.mxu0 %v2353_v43  ;;  %v2163_v18 = vrot.slane %v9101_v46, 1 }
 0x163   : > { %2679 = vmatprep.mubr.bf16.mxu0 %v2357_v60  ;;  %v9248_v1 = vadd.f32 %v6213_v49, %v8975_v17 }
 0x164   : > { %v6127_v31 = vpop.f32.mrf.mxu0  ;;  %v6215_v6 = vpop.f32.mrf.mxu1 }
 0x165   : > { %v6128_v16 = vadd.f32 %v6127_v31, %v6126_v37  ;;  %v6216_v14 = vadd.f32 %v6215_v6, %v6214_v36  ;;  %v2164_v36 = vsel %vm333_vm0, %v2162_v25, %v2163_v18  ;;  %v2166_v31 = vsel %vm333_vm0, %v2163_v18, %v2165_v19 }
 0x166   : > { %v6129_v33 = vpop.f32.mrf.mxu0  ;;  %v6217_v28 = vpop.f32.mrf.mxu1  ;;  %v2170_v25 = vrot.slane %v9131_v39, 1 }
 0x167   : > { %v9255_v7 = vadd.f32 %v9111_v61, %v6128_v16  ;;  %v9258_v17 = vadd.f32 %v6216_v14, %v8999_v32  ;;  %v2359_v16 = vpack.c.bf16 %v9079_v13, %v9072_v58  ;;  %v2363_v14 = vpack.c.bf16 %v2166_v31, %v2164_v36  ;;  %v11916_v13 = vld [vmem:[#allocation15_spill] sm:$0xff] }
 0x168   : > { %v6130_v43 = vpop.f32.mrf.mxu0  ;;  %v6218_v60 = vpop.f32.mrf.mxu1 }
 0x169   : > { %v6131_v22 = vadd.f32 %v6130_v43, %v6129_v33  ;;  %v6219_v30 = vadd.f32 %v6218_v60, %v6217_v28  ;;  %v11914_v33 = vld [vmem:[#allocation13_spill] sm:$0xff]  ;;  %v2168_v60 = vrot.slane %v9128_v20, 1 }
 0x16a   : > { %v6132_v49 = vpop.f32.mrf.mxu0  ;;  %v6220_v37 = vpop.f32.mrf.mxu1  ;;  %2680 = vmatmul.mubr.bf16.gmra.mxu0 %v2356_v0 }
 0x16b   : > { %v9264_v48 = vadd.f32 %v9139_v8, %v6131_v22  ;;  %2687 = vmatprep.mubr.bf16.mxu0 %v2360_v11  ;;  %v9267_v32 = vadd.f32 %v6219_v30, %v9020_v23  ;;  %v11915_v11 = vld [vmem:[#allocation20_spill] sm:$0xff] }
 0x16c   : > { %v6133_v38 = vpop.f32.mrf.mxu0  ;;  %v6221_v61 = vpop.f32.mrf.mxu1  ;;  %v2167_v43 = vrot.slane %v11915_v11, 1 }
 0x16d   : > { %v6134_v6 = vadd.f32 %v6133_v38, %v6132_v49  ;;  %v6222_v26 = vadd.f32 %v6221_v61, %v6220_v37  ;;  %v2171_v38 = vsel %vm333_vm0, %v2168_v60, %v2170_v25 }
 0x16e   : > { %v6135_v56 = vpop.f32.mrf.mxu0  ;;  %v6223_v15 = vpop.f32.mrf.mxu1  ;;  %v2169_v37 = vsel %vm333_vm0, %v2167_v43, %v2168_v60  ;;  %v2175_v43 = vrot.slane %v9137_v3, 1 }
 0x16f   : > { %v9274_v8 = vadd.f32 %v6134_v6, %v9163_v4  ;;  %v9277_v23 = vadd.f32 %v6222_v26, %v11914_v33  ;;  %v2362_v6 = vpack.c.bf16 %v9101_v46, %v9098_v59  ;;  %v11918_v46 = vld [vmem:[#allocation18_spill] sm:$0xff] }
 0x170   : > { %v6136_v28 = vpop.f32.mrf.mxu0  ;;  %v6224_v0 = vpop.f32.mrf.mxu1 }
 0x171   : > { %v9282_v18 = vadd.f32 %v6136_v28, %v6135_v56  ;;  %v6225_v19 = vadd.f32 %v6224_v0, %v6223_v15  ;;  %v2366_v56 = vpack.c.bf16 %v2171_v38, %v2169_v37  ;;  %v11917_v15 = vld [vmem:[#allocation16_spill] sm:$0xff]  ;;  %v2172_v28 = vrot.slane %v8841_v9, 1 }
 0x172   : > { %v6138_v22 = vpop.f32.mrf.mxu0  ;;  %v6226_v58 = vpop.f32.mrf.mxu1  ;;  %2688 = vmatmul.mubr.bf16.gmra.mxu0 %v2359_v16  ;;  %v2173_v0 = vrot.slane %v8844_v52, 1 }
 0x173   : > { %2695 = vmatprep.mubr.bf16.mxu0 %v2363_v14  ;;  %v9285_v4 = vadd.f32 %v6225_v19, %v11916_v13 }
 0x174   : > { %v6139_v30 = vpop.f32.mrf.mxu0  ;;  %v6227_v49 = vpop.f32.mrf.mxu1 }
 0x175   : > { %v6140_v61 = vadd.f32 %v6139_v30, %v6138_v22  ;;  %v6228_v36 = vadd.f32 %v6227_v49, %v6226_v58  ;;  %v2174_v30 = vsel %vm333_vm0, %v2172_v28, %v2173_v0  ;;  %v2176_v49 = vsel %vm333_vm0, %v2173_v0, %v2175_v43 }
 0x176   : > { %v6141_v31 = vpop.f32.mrf.mxu0  ;;  %v6229_v39 = vpop.f32.mrf.mxu1  ;;  %v2180_v28 = vrot.slane %v9168_v2, 1 }
 0x177   : > { %v9292_v26 = vadd.f32 %v9154_v21, %v6140_v61  ;;  %v9295_v16 = vadd.f32 %v6228_v36, %v11917_v15  ;;  %v2365_v36 = vpack.c.bf16 %v9128_v20, %v11915_v11 }
 0x178   : > { %v6142_v14 = vpop.f32.mrf.mxu0  ;;  %v6230_v33 = vpop.f32.mrf.mxu1 }
 0x179   : > { %v6143_v60 = vadd.f32 %v6142_v14, %v6141_v31  ;;  %v6231_v25 = vadd.f32 %v6230_v33, %v6229_v39  ;;  %v2369_v31 = vpack.c.bf16 %v2176_v49, %v2174_v30  ;;  %v11919_v39 = vld [vmem:[#allocation21_spill] sm:$0xff]  ;;  %v2177_v14 = vrot.slane %v8883_v45, 1 }
 0x17a   : > { %v6144_v19 = vpop.f32.mrf.mxu0  ;;  %v6232_v22 = vpop.f32.mrf.mxu1  ;;  %2696 = vmatmul.mubr.bf16.gmra.mxu0 %v2362_v6  ;;  %v2178_v33 = vrot.slane %v8886_v44, 1 }
 0x17b   : > { %v9301_v59 = vadd.f32 %v9170_v35, %v6143_v60  ;;  %2703 = vmatprep.mubr.bf16.mxu0 %v2366_v56  ;;  %v9304_v21 = vadd.f32 %v6231_v25, %v11918_v46 }
 0x17c   : > { %v6145_v58 = vpop.f32.mrf.mxu0  ;;  %v6233_v13 = vpop.f32.mrf.mxu1  ;;  %v2179_v25 = vsel %vm333_vm0, %v2177_v14, %v2178_v33 }
 0x17d   : > { %v6146_v37 = vadd.f32 %v6145_v58, %v6144_v19  ;;  %v6234_v3 = vadd.f32 %v6233_v13, %v6232_v22  ;;  %v2181_v19 = vsel %vm333_vm0, %v2178_v33, %v2180_v28 }
 0x17e   : > { %v9308_v38 = vpop.f32.mrf.mxu0  ;;  %v6235_v61 = vpop.f32.mrf.mxu1  ;;  %v2372_v30 = vpack.c.bf16 %v2181_v19, %v2179_v25  ;;  %v11921_v25 = vpack.c.bf16 %v8886_v44, %v8883_v45 }
 0x17f   : > { %v9313_v35 = vadd.f32 %v6146_v37, %v9192_v10  ;;  %v9316_v6 = vadd.f32 %v6234_v3, %v11919_v39  ;;  %v11920_v39 = vpack.c.bf16 %v8844_v52, %v8841_v9 }
 0x180   : > { %v9318_v56 = vpop.f32.mrf.mxu0  ;;  %v6236_v15 = vpop.f32.mrf.mxu1 }
 0x181   : > { %v6237_v0 = vadd.f32 %v6236_v15, %v6235_v61 }
 0x182   : > { %v6150_v43 = vpop.f32.mrf.mxu0  ;;  %v6238_v60 = vpop.f32.mrf.mxu1  ;;  %2704 = vmatmul.mubr.bf16.gmra.mxu0 %v2365_v36 }
 0x183   : > { %2711 = vmatprep.mubr.bf16.mxu0 %v2369_v31  ;;  %v9324_v20 = vadd.f32 %v6237_v0, %v9159_v41 }
 0x184   : > { %v6151_v10 = vpop.f32.mrf.mxu0  ;;  %v6239_v11 = vpop.f32.mrf.mxu1 }
 0x185   : > { %v6152_v22 = vadd.f32 %v6151_v10, %v6150_v43  ;;  %v6240_v46 = vadd.f32 %v6239_v11, %v6238_v60 }
 0x186   : > { %v6153_v58 = vpop.f32.mrf.mxu0  ;;  %v6241_v13 = vpop.f32.mrf.mxu1 }
 0x187   : > { %v9329_v2 = vadd.f32 %v9185_v54, %v6152_v22  ;;  %v9332_v49 = vadd.f32 %v6240_v46, %v9176_v40 }
 0x188   : > { %v6154_v37 = vpop.f32.mrf.mxu0  ;;  %v6242_v41 = vpop.f32.mrf.mxu1 }
 0x189   : > { %v6155_v3 = vadd.f32 %v6154_v37, %v6153_v58  ;;  %v6243_v61 = vadd.f32 %v6242_v41, %v6241_v13 }
 0x18a   : > { %v6156_v36 = vpop.f32.mrf.mxu0  ;;  %v6244_v31 = vpop.f32.mrf.mxu1  ;;  %2712 = vmatmul.mubr.bf16.gmra.mxu0 %v11920_v39 }
 0x18b   : > { %v9338_v15 = vadd.f32 %v9196_v57, %v6155_v3  ;;  %2719 = vmatprep.mubr.bf16.mxu0 %v2372_v30  ;;  %v9341_v54 = vadd.f32 %v6243_v61, %v9188_v62 }
 0x18c   : > { %v6157_v14 = vpop.f32.mrf.mxu0  ;;  %v6245_v40 = vpop.f32.mrf.mxu1 }
 0x18d   : > { %v6158_v33 = vadd.f32 %v6157_v14, %v6156_v36  ;;  %v6246_v28 = vadd.f32 %v6245_v40, %v6244_v31 }
 0x18e   : > { %v9343_v0 = vpop.f32.mrf.mxu0  ;;  %v6247_v43 = vpop.f32.mrf.mxu1 }
 0x18f   : > { %v9346_v60 = vadd.f32 %v6158_v33, %v9213_v53  ;;  %v9349_v9 = vadd.f32 %v6246_v28, %v9201_v42 }
 0x190   : > { %v9351_v52 = vpop.f32.mrf.mxu0  ;;  %v6248_v57 = vpop.f32.mrf.mxu1 }
 0x191   : > { %v6249_v10 = vadd.f32 %v6248_v57, %v6247_v43 }
 0x192   : > { %v6162_v11 = vpop.f32.mrf.mxu0  ;;  %v6250_v62 = vpop.f32.mrf.mxu1  ;;  %2720 = vmatmul.mubr.bf16.gmra.mxu0 %v11921_v25 }
 0x193   : > { %v9357_v19 = vadd.f32 %v6249_v10, %v9211_v27 }
 0x194   : > { %v6163_v22 = vpop.f32.mrf.mxu0  ;;  %v6251_v46 = vpop.f32.mrf.mxu1 }
 0x195   : > { %v9359_v53 = vadd.f32 %v6163_v22, %v6162_v11  ;;  %v6252_v58 = vadd.f32 %v6251_v46, %v6250_v62 }
 0x196   : > { %v9361_v42 = vpop.f32.mrf.mxu0  ;;  %v6253_v13 = vpop.f32.mrf.mxu1 }
 0x197   : > { %v1774_v30 = vadd.f32 %v6252_v58, %v9222_v63 }
 0x198   : > { %v9364_v37 = vpop.f32.mrf.mxu0  ;;  %v6254_v41 = vpop.f32.mrf.mxu1 }
 0x199   : > { %v6255_v3 = vadd.f32 %v6254_v41, %v6253_v13 }
 0x19a   : > { %v6256_v61 = vpop.f32.mrf.mxu1  ;;  %v6938_v45 = vpop.f32.mrf.mxu0 }
 0x19b   : > { %v9367_v44 = vadd.f32 %v6938_v45, %v9258_v17  ;;  %v1777_v27 = vadd.f32 %v6255_v3, %v9230_v12  ;;  %v11922_v17 = vld [vmem:[#allocation25_spill] sm:$0xff] }
 0x19c   : > { %v6257_v36 = vpop.f32.mrf.mxu1  ;;  %v1878_v31 = vpop.f32.mrf.mxu0  ;;  %v1480_v10 = vadd.f32 %v9245_v29, %v11922_v17 }
 0x19d   : > { %v6258_v39 = vadd.f32 %v6257_v36, %v6256_v61  ;;  %v9371_v14 = vadd.f32 %v1878_v31, %v9240_v34 }
 0x19e   : > { %v6259_v40 = vpop.f32.mrf.mxu1  ;;  %v6939_v33 = vpop.f32.mrf.mxu0 }
 0x19f   : > { %v9374_v63 = vadd.f32 %v6939_v33, %v9267_v32  ;;  %v1782_v28 = vadd.f32 %v6258_v39, %v9237_v47 }
 0x1a0   : > { %v6260_v43 = vpop.f32.mrf.mxu1  ;;  %v9377_v57 = vpop.f32.mrf.mxu0 }
 0x1a1   : > { %v6261_v12 = vadd.f32 %v6260_v43, %v6259_v40 }
 0x1a2   : > { %v6262_v11 = vpop.f32.mrf.mxu1  ;;  %v6942_v62 = vpop.f32.mrf.mxu0 }
 0x1a3   : > { %v9382_v25 = vadd.f32 %v6942_v62, %v9295_v16  ;;  %v9384_v34 = vadd.f32 %v6261_v12, %v1480_v10 }
 0x1a4   : > { %v6263_v22 = vpop.f32.mrf.mxu1  ;;  %v1894_v46 = vpop.f32.mrf.mxu0 }
 0x1a5   : > { %v6264_v32 = vadd.f32 %v6263_v22, %v6262_v11  ;;  %v9387_v58 = vadd.f32 %v1894_v46, %v9277_v23 }
 0x1a6   : > { %v6265_v47 = vpop.f32.mrf.mxu1  ;;  %v6943_v13 = vpop.f32.mrf.mxu0 }
 0x1a7   : > { %v9390_v41 = vadd.f32 %v6943_v13, %v9304_v21  ;;  %v1790_v29 = vadd.f32 %v6264_v32, %v9255_v7 }
 0x1a8   : > { %v6266_v3 = vpop.f32.mrf.mxu1  ;;  %v9393_v61 = vpop.f32.mrf.mxu0 }
 0x1a9   : > { %v6267_v16 = vadd.f32 %v6266_v3, %v6265_v47 }
 0x1aa   : > { %v6268_v45 = vpop.f32.mrf.mxu1  ;;  %v6946_v36 = vpop.f32.mrf.mxu0 }
 0x1ab   : > { %v9396_v31 = vadd.f32 %v6946_v36, %v9332_v49  ;;  %v1793_v39 = vadd.f32 %v6267_v16, %v9264_v48  ;;  %v1496_v49 = vadd.f32 %v9282_v18, %v9180_v55 }
 0x1ac   : > { %v6269_v23 = vpop.f32.mrf.mxu1  ;;  %v1910_v40 = vpop.f32.mrf.mxu0 }
 0x1ad   : > { %v6270_v33 = vadd.f32 %v6269_v23, %v6268_v45  ;;  %v9400_v43 = vadd.f32 %v1910_v40, %v9316_v6 }
 0x1ae   : > { %v6271_v21 = vpop.f32.mrf.mxu1  ;;  %v6947_v17 = vpop.f32.mrf.mxu0 }
 0x1af   : > { %v9403_v7 = vadd.f32 %v6947_v17, %v9341_v54  ;;  %v1798_v10 = vadd.f32 %v6270_v33, %v9274_v8 }
 0x1b0   : > { %v6272_v12 = vpop.f32.mrf.mxu1  ;;  %v9406_v11 = vpop.f32.mrf.mxu0 }
 0x1b1   : > { %v6273_v48 = vadd.f32 %v6272_v12, %v6271_v21 }
 0x1b2   : > { %v6274_v62 = vpop.f32.mrf.mxu1  ;;  %v6950_v22 = vpop.f32.mrf.mxu0 }
 0x1b3   : > { %v9410_v46 = vadd.f32 %v6950_v22, %v1774_v30  ;;  %v9412_v6 = vadd.f32 %v6273_v48, %v1496_v49 }
 0x1b4   : > { %v6275_v32 = vpop.f32.mrf.mxu1  ;;  %v1926_v47 = vpop.f32.mrf.mxu0 }
 0x1b5   : > { %11923 = vst [vmem:[#allocation24_spill] sm:$0xff] %v9412_v6  ;;  %v6276_v13 = vadd.f32 %v6275_v32, %v6274_v62  ;;  %v9415_v54 = vadd.f32 %v1926_v47, %v9349_v9  ;;  %v6149_v9 = vadd.f32 %v9318_v56, %v9308_v38 }
 0x1b6   : > { %v6277_v8 = vpop.f32.mrf.mxu1  ;;  %v6951_v3 = vpop.f32.mrf.mxu0 }
 0x1b7   : > { %v9417_v16 = vadd.f32 %v6951_v3, %v1777_v27  ;;  %v1806_v45 = vadd.f32 %v6276_v13, %v9292_v26 }
 0x1b8   : > { %v6278_v55 = vpop.f32.mrf.mxu1  ;;  %v9420_v18 = vpop.f32.mrf.mxu0 }
 0x1b9   : > { %v6279_v36 = vadd.f32 %v6278_v55, %v6277_v8 }
 0x1ba   : > { %v6280_v30 = vpop.f32.mrf.mxu1  ;;  %v6954_v23 = vpop.f32.mrf.mxu0 }
 0x1bb   : > { %v9422_v40 = vadd.f32 %v6954_v23, %v1790_v29  ;;  %v1809_v33 = vadd.f32 %v6279_v36, %v9301_v59  ;;  %v1512_v29 = vadd.f32 %v6149_v9, %v9203_v51 }
 0x1bc   : > { %v6281_v21 = vpop.f32.mrf.mxu1  ;;  %v1942_v17 = vpop.f32.mrf.mxu0 }
 0x1bd   : > { %11924 = vst [vmem:[#allocation27_spill] sm:$0xff] %v9422_v40  ;;  %v6282_v12 = vadd.f32 %v6281_v21, %v6280_v30  ;;  %v9427_v27 = vadd.f32 %v1942_v17, %v1782_v28 }
 0x1be   : > { %v6283_v49 = vpop.f32.mrf.mxu1  ;;  %v6955_v26 = vpop.f32.mrf.mxu0 }
 0x1bf   : > { %11925 = vst [vmem:[#allocation28_spill] sm:$0xff] %v9427_v27  ;;  %v9429_v48 = vadd.f32 %v6955_v26, %v1793_v39  ;;  %v1814_v62 = vadd.f32 %v6282_v12, %v9313_v35 }
 0x1c0   : > { %v6284_v22 = vpop.f32.mrf.mxu1  ;;  %v9432_v32 = vpop.f32.mrf.mxu0 }
 0x1c1   : > { %11926 = vst [vmem:[#allocation38_spill] sm:$0xff] %v9429_v48  ;;  %v6285_v59 = vadd.f32 %v6284_v22, %v6283_v49 }
 0x1c2   : > { %v6286_v47 = vpop.f32.mrf.mxu1  ;;  %v6958_v13 = vpop.f32.mrf.mxu0 }
 0x1c3   : > { %v9435_v8 = vadd.f32 %v6958_v13, %v1806_v45  ;;  %v9437_v38 = vadd.f32 %v6285_v59, %v1512_v29 }
 0x1c4   : > { %v6287_v56 = vpop.f32.mrf.mxu1  ;;  %v1958_v28 = vpop.f32.mrf.mxu0 }
 0x1c5   : > { %11927 = vst [vmem:[#allocation30_spill] sm:$0xff] %v9435_v8  ;;  %11928 = vst [vmem:[#allocation37_spill] sm:$0xff] %v9437_v38  ;;  %v6288_v3 = vadd.f32 %v6287_v56, %v6286_v47  ;;  %v9439_v55 = vadd.f32 %v1958_v28, %v1798_v10  ;;  %v6161_v10 = vadd.f32 %v9351_v52, %v9343_v0 }
 0x1c6   : > { %v6289_v39 = vpop.f32.mrf.mxu1  ;;  %v6959_v36 = vpop.f32.mrf.mxu0 }
 0x1c7   : > { %11929 = vst [vmem:[#allocation40_spill] sm:$0xff] %v9439_v55  ;;  %v9441_v35 = vadd.f32 %v6959_v36, %v1809_v33  ;;  %v1822_v30 = vadd.f32 %v6288_v3, %v9329_v2  ;;  %v1528_v28 = vadd.f32 %v6161_v10, %v9224_v50  ;;  %v7283_v50 = vld [vmem:[%s11598_s3 + $0x178] sm:$0xff]  }
 0x1c8   : > { %v6290_v23 = vpop.f32.mrf.mxu1  ;;  %v9444_v51 = vpop.f32.mrf.mxu0  ;;  %7016 = vmatprep.subr.bf16.mxu0 %v7283_v50 }
 0x1c9   : > { %11930 = vst [vmem:[#allocation64_spill] sm:$0xff] %v9441_v35  ;;  %11931 = vst [vmem:[#allocation12_spill] sm:$0xff] %v9444_v51  ;;  %v6291_v21 = vadd.f32 %v6290_v23, %v6289_v39  ;;  %7017 = vmatpush3.bf16.msra.mxu0 %v7283_v50  ;;  %v1882_v35 = vadd.f32 %v9377_v57, %v9248_v1 }
 0x1ca   : > { %v6292_v17 = vpop.f32.mrf.mxu1  ;;  %v6962_v45 = vpop.f32.mrf.mxu0 }
 0x1cb   : > { %v9446_v9 = vadd.f32 %v6962_v45, %v1822_v30  ;;  %v1825_v12 = vadd.f32 %v6291_v21, %v9338_v15  ;;  %v6167_v30 = vadd.f32 %v9364_v37, %v9361_v42  ;;  %v7284_v37 = vld [vmem:[%s11598_s3 + $0x138] sm:$0xff]  }
 0x1cc   : > { %v6293_v49 = vpop.f32.mrf.mxu1  ;;  %v1974_v26 = vpop.f32.mrf.mxu0  ;;  %6464 = vmatprep.subr.bf16.mxu1 %v7284_v37 }
 0x1cd   : > { %11932 = vst [vmem:[#allocation65_spill] sm:$0xff] %v9446_v9  ;;  %v6294_v22 = vadd.f32 %v6293_v49, %v6292_v17  ;;  %v9451_v33 = vadd.f32 %v1974_v26, %v1814_v62  ;;  %v1533_v62 = vadd.f32 %v9208_v5, %v9359_v53  ;;  %v1536_v5 = vadd.f32 %v9217_v24, %v6167_v30  ;;  %v7285_v26 = vld [vmem:[%s11598_s3 + $0xf8] sm:$0xff]  }
 0x1ce   : > { %v6295_v29 = vpop.f32.mrf.mxu1  ;;  %v6963_v2 = vpop.f32.mrf.mxu0  ;;  %6465 = vmatpush3.bf16.msra.mxu1 %v7285_v26 }
 0x1cf   : > { %11933 = vst [vmem:[#allocation14_spill] sm:$0xff] %v9451_v33  ;;  %v9453_v59 = vadd.f32 %v6963_v2, %v1825_v12  ;;  %v1830_v47 = vadd.f32 %v6294_v22, %v9346_v60 }
 0x1d0   : > { %v6296_v13 = vpop.f32.mrf.mxu1  ;;  %v9456_v56 = vpop.f32.mrf.mxu0 }
 0x1d1   : > { %11934 = vst [vmem:[#allocation44_spill] sm:$0xff] %v9453_v59  ;;  %11935 = vst [vmem:[#allocation48_spill] sm:$0xff] %v9456_v56  ;;  %v6297_v15 = vadd.f32 %v6296_v13, %v6295_v29 }
 0x1d2   : > { %v6298_v3 = vpop.f32.mrf.mxu1  ;;  %v6966_v39 = vpop.f32.mrf.mxu0 }
 0x1d3   : > { %v9459_v36 = vadd.f32 %v6297_v15, %v1528_v28 }
 0x1d4   : > { %v6299_v0 = vpop.f32.mrf.mxu1  ;;  %v1990_v52 = vpop.f32.mrf.mxu0 }
 0x1d5   : > { %11936 = vst [vmem:[#allocation31_spill] sm:$0xff] %v9459_v36  ;;  %v6300_v23 = vadd.f32 %v6299_v0, %v6298_v3  ;;  %v9465_v60 = vadd.f32 %v1990_v52, %v1830_v47 }
 0x1d6   : > { %v6301_v21 = vpop.f32.mrf.mxu1  ;;  %v6967_v17 = vpop.f32.mrf.mxu0 }
 0x1d7   : > { %11937 = vst [vmem:[#allocation33_spill] sm:$0xff] %v9465_v60  ;;  %v1838_v45 = vadd.f32 %v6300_v23, %v1533_v62 }
 0x1d8   : > { %v6302_v12 = vpop.f32.mrf.mxu1  ;;  %v9470_v49 = vpop.f32.mrf.mxu0 }
 0x1d9   : > { %11938 = vst [vmem:[#allocation56_spill] sm:$0xff] %v9470_v49  ;;  %v9473_v53 = vadd.f32 %v6966_v39, %v1838_v45  ;;  %v6303_v42 = vadd.f32 %v6302_v12, %v6301_v21 }
 0x1da   : > { %v6344_v10 = vpop.f32.mrf.mxu0  ;;  %v6986_v22 = vpop.f32.mrf.mxu1 }
 0x1db   : > { %11939 = vst [vmem:[#allocation51_spill] sm:$0xff] %v9473_v53  ;;  %v1841_v29 = vadd.f32 %v6303_v42, %v1536_v5 }
 0x1dc   : > { %v6345_v2 = vpop.f32.mrf.mxu0  ;;  %v2762_v47 = vpop.f32.mrf.mxu1 }
 0x1dd   : > { %v9481_v13 = vadd.f32 %v6967_v17, %v1841_v29  ;;  %v6346_v24 = vadd.f32 %v6345_v2, %v6344_v10 }
 0x1de   : > { %v6347_v28 = vpop.f32.mrf.mxu0  ;;  %v6987_v62 = vpop.f32.mrf.mxu1 }
 0x1df   : > { %11940 = vst [vmem:[#allocation57_spill] sm:$0xff] %v9481_v13  ;;  %v2763_v15 = vadd.f32 %v6346_v24, %v2762_v47 }
 0x1e0   : > { %v6348_v3 = vpop.f32.mrf.mxu0  ;;  %v2765_v50 = vpop.f32.mrf.mxu1 }
 0x1e1   : > { %v9484_v39 = vadd.f32 %v2763_v15, %v9371_v14  ;;  %v6349_v49 = vadd.f32 %v6348_v3, %v6347_v28 }
 0x1e2   : > { %v6350_v0 = vpop.f32.mrf.mxu0  ;;  %v6990_v12 = vpop.f32.mrf.mxu1 }
 0x1e3   : > { %v2766_v56 = vadd.f32 %v6349_v49, %v2765_v50 }
 0x1e4   : > { %v6351_v52 = vpop.f32.mrf.mxu0  ;;  %v2778_v42 = vpop.f32.mrf.mxu1 }
 0x1e5   : > { %v6352_v60 = vadd.f32 %v6351_v52, %v6350_v0  ;;  %v9492_v48 = vadd.f32 %v2766_v56, %v1882_v35 }
 0x1e6   : > { %v6353_v30 = vpop.f32.mrf.mxu0  ;;  %v6991_v26 = vpop.f32.mrf.mxu1 }
 0x1e7   : > { %v2771_v8 = vadd.f32 %v6986_v22, %v6352_v60  ;;  %v2959_v1 = vmul.f32 %v9492_v48, %v9492_v48 }
 0x1e8   : > { %v6354_v23 = vpop.f32.mrf.mxu0  ;;  %v2781_v2 = vpop.f32.mrf.mxu1 }
 0x1e9   : > { %v6355_v38 = vadd.f32 %v6354_v23, %v6353_v30  ;;  %v9497_v0 = vadd.f32 %v2771_v8, %v9367_v44  ;;  %v2958_v44 = vmul.f32 %v9484_v39, %v9484_v39 }
 0x1ea   : > { %v6356_v21 = vpop.f32.mrf.mxu0  ;;  %v9486_v24 = vpop.f32.mrf.mxu1 }
 0x1eb   : > { %v2774_v40 = vadd.f32 %v6987_v62, %v6355_v38  ;;  %v1898_v38 = vadd.f32 %v9393_v61, %v9285_v4  ;;  %v2960_v8 = vmul.f32 %v9497_v0, %v9497_v0  ;;  %v2990_v23 = vadd.f32 %v2959_v1, %v2958_v44 }
 0x1ec   : > { %v6357_v45 = vpop.f32.mrf.mxu0  ;;  %v2794_v53 = vpop.f32.mrf.mxu1 }
 0x1ed   : > { %v6358_v51 = vadd.f32 %v6357_v45, %v6356_v21  ;;  %v9502_v57 = vadd.f32 %v2774_v40, %v9374_v63  ;;  %v2921_v40 = vadd.f32 %v9492_v48, %v9484_v39  ;;  %v7288_v45 = vld [vmem:[%s11598_s3 + $0x170] sm:$0xff]  }
 0x1ee   : > { %v6359_v5 = vpop.f32.mrf.mxu0  ;;  %v9488_v59 = vpop.f32.mrf.mxu1  ;;  %7018 = vmatprep.subr.bf16.mxu0 %v7288_v45 }
 0x1ef   : > { %v2779_v49 = vadd.f32 %v6358_v51, %v2778_v42  ;;  %v2961_v4 = vmul.f32 %v9502_v57, %v9502_v57  ;;  %7019 = vmatpush3.bf16.msra.mxu0 %v7288_v45 }
 0x1f0   : > { %v6360_v17 = vpop.f32.mrf.mxu0  ;;  %v2797_v6 = vpop.f32.mrf.mxu1 }
 0x1f1   : > { %v6361_v27 = vadd.f32 %v6360_v17, %v6359_v5  ;;  %v9513_v51 = vadd.f32 %v2779_v49, %v9387_v58  ;;  %v7286_v58 = vld [vmem:[%s11598_s3 + $0x130] sm:$0xff]  }
 0x1f2   : > { %v6362_v37 = vpop.f32.mrf.mxu0  ;;  %v9494_v3 = vpop.f32.mrf.mxu1  ;;  %v7287_v17 = vld [vmem:[%s11598_s3 + $0xf0] sm:$0xff]   ;;  %6466 = vmatprep.subr.bf16.mxu1 %v7286_v58 }
 0x1f3   : > { %v2782_v60 = vadd.f32 %v6361_v27, %v2781_v2  ;;  %6467 = vmatpush3.bf16.msra.mxu1 %v7287_v17 }
 0x1f4   : > { %v6363_v10 = vpop.f32.mrf.mxu0  ;;  %v9504_v56 = vpop.f32.mrf.mxu1 }
 0x1f5   : > { %v6364_v52 = vadd.f32 %v6363_v10, %v6362_v37  ;;  %v9519_v61 = vadd.f32 %v2782_v60, %v1898_v38  ;;  %v2991_v37 = vadd.f32 %v2990_v23, %v2960_v8  ;;  %v2962_v10 = vmul.f32 %v9513_v51, %v9513_v51  ;;  %v7290_v60 = vld [vmem:[%s11598_s3 + $0xe8] sm:$0xff]  }
 0x1f6   : > { %v6365_v29 = vpop.f32.mrf.mxu0  ;;  %v9521_v21 = vpop.f32.mrf.mxu1 }
 0x1f7   : > { %v2787_v62 = vadd.f32 %v6990_v12, %v6364_v52  ;;  %v2922_v12 = vadd.f32 %v2921_v40, %v9497_v0  ;;  %v7293_v52 = vld [vmem:[%s11598_s3 + $0x168] sm:$0xff]   ;;  %v7291_v40 = vld [vmem:[%s11598_s3 + $0x120] sm:$0xff]  }
 0x1f8   : > { %v6366_v47 = vpop.f32.mrf.mxu0  ;;  %7020 = vmatprep.subr.bf16.mxu0 %v7293_v52 }
 0x1f9   : > { %v6367_v22 = vadd.f32 %v6366_v47, %v6365_v29  ;;  %v9536_v29 = vadd.f32 %v2787_v62, %v9382_v25  ;;  %v7289_v25 = vld [vmem:[%s11598_s3 + $0x128] sm:$0xff]   ;;  %7021 = vmatpush3.bf16.msra.mxu0 %v7293_v52 }
 0x1fa   : > { %v6368_v14 = vpop.f32.mrf.mxu0  ;;  %6468 = vmatprep.subr.bf16.mxu1 %v7289_v25 }
 0x1fb   : > { %v2790_v5 = vadd.f32 %v6991_v26, %v6367_v22  ;;  %v2963_v26 = vmul.f32 %v9519_v61, %v9519_v61  ;;  %v2964_v44 = vmul.f32 %v9536_v29, %v9536_v29  ;;  %6469 = vmatpush3.bf16.msra.mxu1 %v7290_v60  ;;  %v7296_v60 = vld [vmem:[%s11598_s3 + $0x110] sm:$0xff]  }
 0x1fc   : > { %v6369_v15 = vpop.f32.mrf.mxu0  ;;  %6470 = vmatprep.subr.bf16.mxu1 %v7291_v40 }
 0x1fd   : > { %v6370_v27 = vadd.f32 %v6369_v15, %v6368_v14  ;;  %v2813_v15 = vpop.f32.mrf.mxu1 }
 0x1fe   : > { %v6371_v13 = vpop.f32.mrf.mxu0 }
 0x1ff   : > { %v2795_v47 = vadd.f32 %v6370_v27, %v2794_v53  ;;  %v9558_v62 = vpop.f32.mrf.mxu1  ;;  %v7298_v27 = vld [vmem:[%s11598_s3 + $0x160] sm:$0xff]  }
 0x200   : > { %v6372_v36 = vpop.f32.mrf.mxu0  ;;  %7022 = vmatprep.subr.bf16.mxu0 %v7298_v27 }
 0x201   : > { %v6373_v42 = vadd.f32 %v6372_v36, %v6371_v13  ;;  %v2923_v36 = vadd.f32 %v2922_v12, %v9502_v57  ;;  %v2992_v13 = vadd.f32 %v2991_v37, %v2961_v4  ;;  %v2826_v12 = vpop.f32.mrf.mxu1  ;;  %7023 = vmatpush3.bf16.msra.mxu0 %v7298_v27 }
 0x202   : > { %v6374_v9 = vpop.f32.mrf.mxu0 }
 0x203   : > { %v2798_v53 = vadd.f32 %v6373_v42, %v2797_v6  ;;  %v2924_v38 = vadd.f32 %v2923_v36, %v9513_v51  ;;  %v2993_v22 = vadd.f32 %v2992_v13, %v2962_v10 }
 0x204   : > { %v6375_v33 = vpop.f32.mrf.mxu0 }
 0x205   : > { %v6376_v14 = vadd.f32 %v6375_v33, %v6374_v9  ;;  %v1914_v9 = vadd.f32 %v9406_v11, %v9324_v20  ;;  %v9550_v33 = vadd.f32 %v2790_v5, %v9390_v41  ;;  %v9561_v20 = vadd.f32 %v2795_v47, %v9400_v43 }
 0x206   : > { %v6377_v55 = vpop.f32.mrf.mxu0  ;;  %v2925_v6 = vadd.f32 %v2924_v38, %v9519_v61  ;;  %v7302_v38 = vld [vmem:[%s11598_s3 + $0x150] sm:$0xff]  }
 0x207   : > { %v2803_v41 = vadd.f32 %v9486_v24, %v6376_v14  ;;  %v2965_v43 = vmul.f32 %v9550_v33, %v9550_v33  ;;  %v9573_v23 = vadd.f32 %v2798_v53, %v1914_v9  ;;  %v2966_v5 = vmul.f32 %v9561_v20, %v9561_v20 }
 0x208   : > { %v6378_v28 = vpop.f32.mrf.mxu0  ;;  %v1930_v9 = vadd.f32 %v9420_v18, %v9357_v19  ;;  %v7297_v19 = vld [vmem:[%s11598_s3 + $0xd0] sm:$0xff]  }
 0x209   : > { %v6379_v1 = vadd.f32 %v6378_v28, %v6377_v55  ;;  %v2994_v55 = vadd.f32 %v2993_v22, %v2963_v26  ;;  %v9583_v42 = vadd.f32 %v2803_v41, %v9396_v31  ;;  %v2967_v31 = vmul.f32 %v9573_v23, %v9573_v23 }
 0x20a   : > { %v6380_v30 = vpop.f32.mrf.mxu0 }
 0x20b   : > { %v2806_v24 = vadd.f32 %v9488_v59, %v6379_v1  ;;  %v2995_v4 = vadd.f32 %v2994_v55, %v2964_v44  ;;  %v2968_v52 = vmul.f32 %v9583_v42, %v9583_v42 }
 0x20c   : > { %v6381_v35 = vpop.f32.mrf.mxu0 }
 0x20d   : > { %v6382_v11 = vadd.f32 %v6381_v35, %v6380_v30  ;;  %v7292_v30 = vld [vmem:[%s11598_s3 + $0xe0] sm:$0xff]   ;;  %v2926_v35 = vadd.f32 %v2925_v6, %v9536_v29  ;;  %v2996_v47 = vadd.f32 %v2995_v4, %v2965_v43 }
 0x20e   : > { %v6383_v63 = vpop.f32.mrf.mxu0  ;;  %6471 = vmatpush3.bf16.msra.mxu1 %v7292_v30  ;;  %v7304_v30 = vld [vmem:[%s11598_s3 + $0x148] sm:$0xff]  }
 0x20f   : > { %v2811_v59 = vadd.f32 %v6382_v11, %v9504_v56  ;;  %v2927_v17 = vadd.f32 %v2926_v35, %v9550_v33  ;;  %v9596_v56 = vadd.f32 %v2806_v24, %v9403_v7  ;;  %v2997_v25 = vadd.f32 %v2996_v47, %v2966_v5 }
 0x210   : > { %v6384_v50 = vpop.f32.mrf.mxu0 }
 0x211   : > { %v6385_v58 = vadd.f32 %v6384_v50, %v6383_v63  ;;  %v7294_v63 = vld [vmem:[%s11598_s3 + $0x118] sm:$0xff]   ;;  %v2928_v14 = vadd.f32 %v2927_v17, %v9561_v20  ;;  %v9607_v7 = vadd.f32 %v2811_v59, %v9415_v54  ;;  %v2998_v22 = vadd.f32 %v2997_v25, %v2967_v31  ;;  %v7303_v17 = vld [vmem:[%s11598_s3 + $0x100] sm:$0xff]  }
 0x212   : > { %v6386_v2 = vpop.f32.mrf.mxu0  ;;  %v7300_v50 = vld [vmem:[%s11598_s3 + $0x158] sm:$0xff]   ;;  %6472 = vmatprep.subr.bf16.mxu1 %v7294_v63  ;;  %v2969_v44 = vmul.f32 %v9596_v56, %v9596_v56  ;;  %v11941_v31 = vld [vmem:[#allocation28_spill] sm:$0xff] }
 0x213   : > { %v2814_v36 = vadd.f32 %v6385_v58, %v2813_v15  ;;  %7024 = vmatprep.subr.bf16.mxu0 %v7300_v50  ;;  %v2929_v54 = vadd.f32 %v2928_v14, %v9573_v23  ;;  %v2999_v55 = vadd.f32 %v2998_v22, %v2968_v52 }
 0x214   : > { %v6387_v49 = vpop.f32.mrf.mxu0  ;;  %7025 = vmatpush3.bf16.msra.mxu0 %v7300_v50 }
 0x215   : > { %v6388_v37 = vadd.f32 %v6387_v49, %v6386_v2  ;;  %v7295_v2 = vld [vmem:[%s11598_s3 + $0xd8] sm:$0xff]   ;;  %v9602_v49 = vpop.f32.mrf.mxu1  ;;  %v9624_v18 = vadd.f32 %v2814_v36, %v1930_v9  ;;  %7026 = vmatprep.subr.bf16.mxu0 %v7302_v38  ;;  %v2930_v6 = vadd.f32 %v2929_v54, %v9583_v42  ;;  %v3000_v4 = vadd.f32 %v2999_v55, %v2969_v44 }
 0x216   : > { %v6389_v8 = vpop.f32.mrf.mxu0  ;;  %6473 = vmatpush3.bf16.msra.mxu1 %v7295_v2 }
 0x217   : > { %v2819_v15 = vadd.f32 %v9494_v3, %v6388_v37  ;;  %v2829_v11 = vpop.f32.mrf.mxu1  ;;  %6474 = vmatprep.subr.bf16.mxu1 %v7296_v60  ;;  %v2931_v35 = vadd.f32 %v2930_v6, %v9596_v56  ;;  %v7306_v37 = vld [vmem:[%s11598_s3 + $0x140] sm:$0xff]   ;;  %v11942_v60 = vld [vmem:[#allocation27_spill] sm:$0xff]  ;;  %v11943_v6 = vld [vmem:[#allocation38_spill] sm:$0xff] }
 0x218   : > { %v6390_v28 = vpop.f32.mrf.mxu0  ;;  %7027 = vmatpush3.bf16.msra.mxu0 %v7302_v38 }
 0x219   : > { %v6391_v13 = vadd.f32 %v6390_v28, %v6389_v8  ;;  %v2970_v28 = vmul.f32 %v9607_v7, %v9607_v7  ;;  %v9631_v40 = vadd.f32 %v2819_v15, %v9410_v46  ;;  %v9633_v24 = vpop.f32.mrf.mxu1  ;;  %v7301_v46 = vld [vmem:[%s11598_s3 + $0xc8] sm:$0xff]   ;;  %7028 = vmatprep.subr.bf16.mxu0 %v7304_v30  ;;  %v2932_v63 = vadd.f32 %v2931_v35, %v9607_v7 }
 0x21a   : > { %v6392_v45 = vpop.f32.mrf.mxu0  ;;  %6475 = vmatpush3.bf16.msra.mxu1 %v7297_v19 }
 0x21b   : > { %v2822_v3 = vadd.f32 %v9521_v21, %v6391_v13  ;;  %v7299_v21 = vld [vmem:[%s11598_s3 + $0x108] sm:$0xff]   ;;  %v3001_v50 = vadd.f32 %v3000_v4, %v2970_v28  ;;  %v2972_v47 = vmul.f32 %v9631_v40, %v9631_v40  ;;  %v2842_v13 = vpop.f32.mrf.mxu1  ;;  %v11944_v4 = vld [vmem:[#allocation40_spill] sm:$0xff] }
 0x21c   : > { %v6393_v10 = vpop.f32.mrf.mxu0  ;;  %6476 = vmatprep.subr.bf16.mxu1 %v7299_v21  ;;  %7029 = vmatpush3.bf16.msra.mxu0 %v7304_v30 }
 0x21d   : > { %v6394_v53 = vadd.f32 %v6393_v10, %v6392_v45  ;;  %v2971_v45 = vmul.f32 %v9624_v18, %v9624_v18  ;;  %v1946_v10 = vadd.f32 %v9432_v32, %v9384_v34  ;;  %7030 = vmatprep.subr.bf16.mxu0 %v7306_v37  ;;  %v2933_v34 = vadd.f32 %v2932_v63, %v9624_v18  ;;  %v7007_v22 = vpop.f32.mrf.mxu1 }
 0x21e   : > { %v6395_v26 = vpop.f32.mrf.mxu0  ;;  %6477 = vmatpush3.bf16.msra.mxu1 %v7301_v46 }
 0x21f   : > { %v2827_v27 = vadd.f32 %v6394_v53, %v2826_v12  ;;  %v9648_v12 = vadd.f32 %v2822_v3, %v9417_v16  ;;  %v7305_v16 = vld [vmem:[%s11598_s3 + $0xc0] sm:$0xff]   ;;  %6478 = vmatprep.subr.bf16.mxu1 %v7303_v17  ;;  %v2934_v15 = vadd.f32 %v2933_v34, %v9631_v40  ;;  %v2845_v30 = vpop.f32.mrf.mxu1 }
 0x220   : > { %v6396_v1 = vpop.f32.mrf.mxu0  ;;  %7031 = vmatpush3.bf16.msra.mxu0 %v7306_v37  ;;  %v11946_v17 = vld [vmem:[#allocation12_spill] sm:$0xff] }
 0x221   : > { %v6397_v8 = vadd.f32 %v6396_v1, %v6395_v26  ;;  %v9665_v2 = vadd.f32 %v2827_v27, %v11941_v31  ;;  %v3002_v26 = vadd.f32 %v3001_v50, %v2971_v45  ;;  %v2973_v25 = vmul.f32 %v9648_v12, %v9648_v12  ;;  %v7010_v31 = vpop.f32.mrf.mxu1 }
 0x222   : > { %v6398_v41 = vpop.f32.mrf.mxu0  ;;  %6479 = vmatpush3.bf16.msra.mxu1 %v7305_v16  ;;  %v2935_v44 = vadd.f32 %v2934_v15, %v9648_v12 }
 0x223   : > { %v2830_v5 = vadd.f32 %v6397_v8, %v2829_v11  ;;  %v2974_v1 = vmul.f32 %v9665_v2, %v9665_v2 }
 0x224   : > { %v6399_v43 = vpop.f32.mrf.mxu0  ;;  %v2936_v11 = vadd.f32 %v2935_v44, %v9665_v2 }
 0x225   : > { %v6400_v58 = vadd.f32 %v6399_v43, %v6398_v41  ;;  %v9671_v52 = vadd.f32 %v2830_v5, %v1946_v10 }
 0x226   : > { %v6401_v59 = vpop.f32.mrf.mxu0 }
 0x227   : > { %v2835_v14 = vadd.f32 %v9558_v62, %v6400_v58  ;;  %v3003_v62 = vadd.f32 %v3002_v26, %v2972_v47  ;;  %v2975_v8 = vmul.f32 %v9671_v52, %v9671_v52  ;;  %v2937_v35 = vadd.f32 %v2936_v11, %v9671_v52 }
 0x228   : > { %v6402_v36 = vpop.f32.mrf.mxu0 }
 0x229   : > { %v6403_v32 = vadd.f32 %v6402_v36, %v6401_v59  ;;  %v9678_v38 = vadd.f32 %v2835_v14, %v11942_v60  ;;  %v3004_v3 = vadd.f32 %v3003_v62, %v2973_v25  ;;  %v11945_v59 = vld [vmem:[#allocation24_spill] sm:$0xff]  ;;  %v2858_v62 = vpop.f32.mrf.mxu1 }
 0x22a   : > { %v6404_v9 = vpop.f32.mrf.mxu0  ;;  %v1962_v37 = vadd.f32 %v11946_v17, %v11945_v59  ;;  %v11949_v17 = vld [vmem:[#allocation14_spill] sm:$0xff] }
 0x22b   : > { %v2838_v53 = vadd.f32 %v9602_v49, %v6403_v32  ;;  %v9686_v49 = vld [vmem:[%s11598_s3 + $0xb8] sm:$0xff]   ;;  %v3005_v27 = vadd.f32 %v3004_v3, %v2974_v1  ;;  %v2976_v43 = vmul.f32 %v9678_v38, %v9678_v38  ;;  %v2938_v10 = vadd.f32 %v2937_v35, %v9678_v38 }
 0x22c   : > { %v6405_v54 = vpop.f32.mrf.mxu0  ;;  %7064 = vmatprep.subr.bf16.mxu1 %v9686_v49 }
 0x22d   : > { %v6406_v19 = vadd.f32 %v6405_v54, %v6404_v9  ;;  %v9690_v55 = vadd.f32 %v2838_v53, %v11943_v6  ;;  %v3006_v45 = vadd.f32 %v3005_v27, %v2975_v8  ;;  %v11947_v54 = vld [vmem:[#allocation30_spill] sm:$0xff]  ;;  %v7011_v27 = vpop.f32.mrf.mxu1 }
 0x22e   : > { %v6407_v41 = vpop.f32.mrf.mxu0 }
 0x22f   : > { %v2843_v28 = vadd.f32 %v6406_v19, %v2842_v13  ;;  %v2977_v63 = vmul.f32 %v9690_v55, %v9690_v55  ;;  %v3007_v16 = vadd.f32 %v3006_v45, %v2976_v43  ;;  %v2939_v14 = vadd.f32 %v2938_v10, %v9690_v55  ;;  %v11948_v43 = vld [vmem:[#allocation64_spill] sm:$0xff]  ;;  %v2861_v59 = vpop.f32.mrf.mxu1 }
 0x230   : > { %v6408_v21 = vpop.f32.mrf.mxu0 }
 0x231   : > { %v9697_v58 = vadd.f32 %v2843_v28, %v11944_v4  ;;  %v6409_v46 = vadd.f32 %v6408_v21, %v6407_v41  ;;  %v3008_v25 = vadd.f32 %v3007_v16, %v2977_v63  ;;  %v11951_v16 = vld [vmem:[#allocation48_spill] sm:$0xff] }
 0x232   : > { %v6410_v5 = vpop.f32.mrf.mxu0 }
 0x233   : > { %v2846_v50 = vadd.f32 %v6409_v46, %v2845_v30  ;;  %v2978_v36 = vmul.f32 %v9697_v58, %v9697_v58  ;;  %v2940_v26 = vadd.f32 %v2939_v14, %v9697_v58 }
 0x234   : > { %v6411_v47 = vpop.f32.mrf.mxu0 }
 0x235   : > { %v9707_v13 = vadd.f32 %v2846_v50, %v1962_v37  ;;  %v6412_v34 = vadd.f32 %v6411_v47, %v6410_v5  ;;  %v3009_v1 = vadd.f32 %v3008_v25, %v2978_v36  ;;  %v11950_v50 = vld [vmem:[#allocation37_spill] sm:$0xff] }
 0x236   : > { %v6413_v32 = vpop.f32.mrf.mxu0  ;;  %v1978_v47 = vadd.f32 %v11951_v16, %v11950_v50 }
 0x237   : > { %v2979_v9 = vmul.f32 %v9707_v13, %v9707_v13  ;;  %v2851_v15 = vadd.f32 %v9633_v24, %v6412_v34  ;;  %v2941_v60 = vadd.f32 %v2940_v26, %v9707_v13 }
 0x238   : > { %v6414_v53 = vpop.f32.mrf.mxu0 }
 0x239   : > { %v9715_v44 = vadd.f32 %v2851_v15, %v11947_v54  ;;  %v6415_v19 = vadd.f32 %v6414_v53, %v6413_v32  ;;  %v3010_v8 = vadd.f32 %v3009_v1, %v2979_v9  ;;  %v7014_v53 = vpop.f32.mrf.mxu1 }
 0x23a   : > { %v6416_v3 = vpop.f32.mrf.mxu0 }
 0x23b   : > { %v2942_v41 = vadd.f32 %v2941_v60, %v9715_v44  ;;  %v2980_v11 = vmul.f32 %v9715_v44, %v9715_v44  ;;  %v2854_v6 = vadd.f32 %v7007_v22, %v6415_v19 }
 0x23c   : > { %v6417_v28 = vpop.f32.mrf.mxu0 }
 0x23d   : > { %v3011_v24 = vadd.f32 %v3010_v8, %v2980_v11  ;;  %v9721_v21 = vadd.f32 %v2854_v6, %v11948_v43  ;;  %v6418_v30 = vadd.f32 %v6417_v28, %v6416_v3  ;;  %v11952_v3 = vld [vmem:[#allocation65_spill] sm:$0xff]  ;;  %v2874_v6 = vpop.f32.mrf.mxu1 }
 0x23e   : > { %v6419_v35 = vpop.f32.mrf.mxu0 }
 0x23f   : > { %v2981_v4 = vmul.f32 %v9721_v21, %v9721_v21  ;;  %v2859_v46 = vadd.f32 %v6418_v30, %v2858_v62  ;;  %v2943_v45 = vadd.f32 %v2942_v41, %v9721_v21 }
 0x240   : > { %v6420_v5 = vpop.f32.mrf.mxu0 }
 0x241   : > { %v9727_v37 = vadd.f32 %v2859_v46, %v11949_v17  ;;  %v3012_v22 = vadd.f32 %v3011_v24, %v2981_v4  ;;  %v6421_v10 = vadd.f32 %v6420_v5, %v6419_v35  ;;  %v11953_v4 = vld [vmem:[#allocation44_spill] sm:$0xff]  ;;  %v7015_v5 = vpop.f32.mrf.mxu1 }
 0x242   : > { %v6422_v63 = vpop.f32.mrf.mxu0 }
 0x243   : > { %v2944_v14 = vadd.f32 %v2943_v45, %v9727_v37  ;;  %v2982_v36 = vmul.f32 %v9727_v37, %v9727_v37  ;;  %v2862_v34 = vadd.f32 %v6421_v10, %v2861_v59  ;;  %v7309_v59 = vld [vmem:[%s11598_s3 + $0x78] sm:$0xff]  }
 0x244   : > { %v6423_v32 = vpop.f32.mrf.mxu0  ;;  %6600 = vmatprep.subr.bf16.mxu0 %v7309_v59 }
 0x245   : > { %v3013_v26 = vadd.f32 %v3012_v22, %v2982_v36  ;;  %v9734_v25 = vadd.f32 %v2862_v34, %v1978_v47  ;;  %v6424_v9 = vadd.f32 %v6423_v32, %v6422_v63  ;;  %v11955_v34 = vld [vmem:[#allocation31_spill] sm:$0xff]  ;;  %v11956_v32 = vld [vmem:[#allocation56_spill] sm:$0xff] }
 0x246   : > { %v6425_v15 = vpop.f32.mrf.mxu0 }
 0x247   : > { %v2945_v62 = vadd.f32 %v2944_v14, %v9734_v25  ;;  %v2983_v1 = vmul.f32 %v9734_v25, %v9734_v25  ;;  %v2867_v60 = vadd.f32 %v7010_v31, %v6424_v9  ;;  %v2877_v14 = vpop.f32.mrf.mxu1 }
 0x248   : > { %v6426_v54 = vpop.f32.mrf.mxu0 }
 0x249   : > { %v3014_v19 = vadd.f32 %v3013_v26, %v2983_v1  ;;  %v9740_v8 = vadd.f32 %v2867_v60, %v11952_v3  ;;  %v6427_v41 = vadd.f32 %v6426_v54, %v6425_v15  ;;  %v1994_v26 = vadd.f32 %v11956_v32, %v11955_v34 }
 0x24a   : > { %v6428_v11 = vpop.f32.mrf.mxu0 }
 0x24b   : > { %v2946_v28 = vadd.f32 %v2945_v62, %v9740_v8  ;;  %v2984_v24 = vmul.f32 %v9740_v8, %v9740_v8  ;;  %v2870_v43 = vadd.f32 %v7011_v27, %v6427_v41  ;;  %v11954_v27 = vld [vmem:[#allocation33_spill] sm:$0xff] }
 0x24c   : > { %v6429_v30 = vpop.f32.mrf.mxu0 }
 0x24d   : > { %v3015_v35 = vadd.f32 %v3014_v19, %v2984_v24  ;;  %v9746_v46 = vadd.f32 %v2870_v43, %v11953_v4  ;;  %v6430_v31 = vadd.f32 %v6429_v30, %v6428_v11  ;;  %v11957_v43 = vld [vmem:[#allocation51_spill] sm:$0xff] }
 0x24e   : > { %v6431_v45 = vpop.f32.mrf.mxu0 }
 0x24f   : > { %v2985_v17 = vmul.f32 %v9746_v46, %v9746_v46  ;;  %v2875_v22 = vadd.f32 %v6430_v31, %v2874_v6  ;;  %v2947_v10 = vadd.f32 %v2946_v28, %v9746_v46 }
 0x250   : > { %v6432_v63 = vpop.f32.mrf.mxu0 }
 0x251   : > { %v9755_v50 = vadd.f32 %v2875_v22, %v11954_v27  ;;  %v3016_v16 = vadd.f32 %v3015_v35, %v2985_v17  ;;  %v6433_v47 = vadd.f32 %v6432_v63, %v6431_v45  ;;  %v11958_v17 = vld [vmem:[#allocation57_spill] sm:$0xff] }
 0x252   : > { %v6434_v36 = vpop.f32.mrf.mxu0 }
 0x253   : > { %v2948_v9 = vadd.f32 %v2947_v10, %v9755_v50  ;;  %v2986_v15 = vmul.f32 %v9755_v50, %v9755_v50  ;;  %v2878_v62 = vadd.f32 %v6433_v47, %v2877_v14 }
 0x254   : > { %v6435_v1 = vpop.f32.mrf.mxu0 }
 0x255   : > { %v3017_v60 = vadd.f32 %v3016_v16, %v2986_v15  ;;  %v9762_v54 = vadd.f32 %v2878_v62, %v1994_v26  ;;  %v6436_v19 = vadd.f32 %v6435_v1, %v6434_v36 }
 0x256   : > { %v6437_v3 = vpop.f32.mrf.mxu0 }
 0x257   : > { %v2949_v41 = vadd.f32 %v2948_v9, %v9762_v54  ;;  %v2987_v11 = vmul.f32 %v9762_v54, %v9762_v54  ;;  %v2883_v6 = vadd.f32 %v7014_v53, %v6436_v19 }
 0x258   : > { %v6438_v28 = vpop.f32.mrf.mxu0 }
 0x259   : > { %v3018_v24 = vadd.f32 %v3017_v60, %v2987_v11  ;;  %v9768_v30 = vadd.f32 %v2883_v6, %v11957_v43  ;;  %v6439_v35 = vadd.f32 %v6438_v28, %v6437_v3 }
 0x25b   : > { %v2950_v4 = vadd.f32 %v2949_v41, %v9768_v30  ;;  %v2988_v31 = vmul.f32 %v9768_v30, %v9768_v30  ;;  %v2886_v45 = vadd.f32 %v7015_v5, %v6439_v35 }
 0x25d   : > { %v3019_v59 = vadd.f32 %v3018_v24, %v2988_v31  ;;  %v2920_v22 = vadd.f32 %v2886_v45, %v11958_v17 }
 0x25f   : > { %v2951_v10 = vadd.f32 %v2950_v4, %v2920_v22  ;;  %v2989_v63 = vmul.f32 %v2920_v22, %v2920_v22 }
 0x261   : > { %v2952_v27 = vrot.slane %v2951_v10, 4  ;;  %v3020_v16 = vadd.f32 %v3019_v59, %v2989_v63 }
 0x263   : > { %v2953_v53 = vadd.f32 %v2952_v27, %v2951_v10  ;;  %v3021_v47 = vrot.slane %v3020_v16, 4 }
 0x265   : > { %v2954_v14 = vrot.slane %v2953_v53, 2  ;;  %v3022_v36 = vadd.f32 %v3021_v47, %v3020_v16 }
 0x267   : > { %v2955_v34 = vadd.f32 %v2954_v14, %v2953_v53  ;;  %v3023_v32 = vrot.slane %v3022_v36, 2 }
 0x269   : > { %v2956_v26 = vrot.slane %v2955_v34, 1  ;;  %v3024_v9 = vadd.f32 %v3023_v32, %v3022_v36 }
 0x26b   : > { %v2957_v15 = vadd.f32 %v2956_v26, %v2955_v34  ;;  %v3025_v62 = vrot.slane %v3024_v9, 1 }
 0x26d   : > { %v3026_v1 = vadd.f32 %v3025_v62, %v3024_v9  ;;  %v9774_v60 = vmul.f32 0.00390625, %v2957_v15 }
 0x26f   : > { %v3028_v5 = vmul.f32 0.00390625, %v3026_v1  ;;  %v3029_v19 = vmul.f32 %v9774_v60, %v9774_v60  ;;  %v3063_v3 = vsub.f32 %v2920_v22, %v9774_v60  ;;  %v3053_v28 = vsub.f32 %v9707_v13, %v9774_v60 }
 0x270   : > { %v3054_v24 = vsub.f32 %v9715_v44, %v9774_v60  ;;  %v3055_v43 = vsub.f32 %v9721_v21, %v9774_v60  ;;  %v3056_v35 = vsub.f32 %v9727_v37, %v9774_v60  ;;  %v3057_v4 = vsub.f32 %v9734_v25, %v9774_v60 }
 0x271   : > { %v3030_v41 = vsub.f32 %v3028_v5, %v3029_v19  ;;  %v3058_v31 = vsub.f32 %v9740_v8, %v9774_v60  ;;  %v3059_v45 = vsub.f32 %v9746_v46, %v9774_v60  ;;  %v3060_v13 = vsub.f32 %v9755_v50, %v9774_v60 }
 0x272   : > { %v3061_v44 = vsub.f32 %v9762_v54, %v9774_v60  ;;  %v3062_v21 = vsub.f32 %v9768_v30, %v9774_v60  ;;  %v3032_v37 = vsub.f32 %v9484_v39, %v9774_v60  ;;  %v3033_v25 = vsub.f32 %v9492_v48, %v9774_v60 }
 0x273   : > { %v3031_v11 = vmax.f32 %v3030_v41, 0.0  ;;  %v3034_v8 = vsub.f32 %v9497_v0, %v9774_v60  ;;  %v3035_v46 = vsub.f32 %v9502_v57, %v9774_v60  ;;  %v3036_v50 = vsub.f32 %v9513_v51, %v9774_v60 }
 0x274   : > { %v3037_v54 = vsub.f32 %v9519_v61, %v9774_v60  ;;  %v3038_v30 = vsub.f32 %v9536_v29, %v9774_v60  ;;  %v3039_v39 = vsub.f32 %v9550_v33, %v9774_v60  ;;  %v3040_v48 = vsub.f32 %v9561_v20, %v9774_v60 }
 0x275   : > { %v3064_v6 = vadd.f32 1e-05, %v3031_v11  ;;  %v3041_v0 = vsub.f32 %v9573_v23, %v9774_v60  ;;  %v3042_v57 = vsub.f32 %v9583_v42, %v9774_v60  ;;  %v3043_v51 = vsub.f32 %v9596_v56, %v9774_v60 }
 0x276   : > { %v3044_v61 = vsub.f32 %v9607_v7, %v9774_v60  ;;  %v3045_v29 = vsub.f32 %v9624_v18, %v9774_v60  ;;  %v3046_v33 = vsub.f32 %v9631_v40, %v9774_v60  ;;  %v3047_v20 = vsub.f32 %v9648_v12, %v9774_v60 }
 0x277   : > { %7355 = vrsqrt.f32 %v3064_v6  ;;  %v3048_v23 = vsub.f32 %v9665_v2, %v9774_v60  ;;  %v3049_v42 = vsub.f32 %v9671_v52, %v9774_v60  ;;  %v3050_v56 = vsub.f32 %v9678_v38, %v9774_v60 }
 0x278   : > { %v3051_v7 = vsub.f32 %v9690_v55, %v9774_v60  ;;  %v3052_v18 = vsub.f32 %v9697_v58, %v9774_v60 }
 0x284   : > { %v7356_v59 = vpop.eup %7355 }
 0x285   : > { %v3097_v40 = vmul.f32 %v7356_v59, %v3063_v3  ;;  %v9841_v17 = vmul.f32 %v7356_v59, %v3032_v37  ;;  %v9843_v12 = vmul.f32 %v7356_v59, %v3033_v25  ;;  %v9845_v22 = vmul.f32 %v7356_v59, %v3034_v8 }
 0x286   : > { %v9847_v2 = vmul.f32 %v7356_v59, %v3035_v46  ;;  %v9849_v10 = vmul.f32 %v7356_v59, %v3036_v50  ;;  %v9851_v52 = vmul.f32 %v7356_v59, %v3037_v54  ;;  %v9853_v38 = vmul.f32 %v7356_v59, %v3038_v30 }
 0x287   : > { %v3129_v63 = vmax.f32 %v3097_v40, 0.0  ;;  %v9855_v55 = vmul.f32 %v7356_v59, %v3039_v39  ;;  %v9857_v27 = vmul.f32 %v7356_v59, %v3040_v48  ;;  %v9859_v58 = vmul.f32 %v7356_v59, %v3041_v0 }
 0x288   : > { %v9861_v16 = vmul.f32 %v7356_v59, %v3042_v57  ;;  %v9863_v53 = vmul.f32 %v7356_v59, %v3043_v51  ;;  %v9865_v47 = vmul.f32 %v7356_v59, %v3044_v61  ;;  %v9867_v14 = vmul.f32 %v7356_v59, %v3045_v29 }
 0x289   : > { %v9869_v36 = vrot.slane %v3129_v63, 7  ;;  %v9871_v34 = vrot.slane %v3129_v63, 5  ;;  %v9873_v32 = vmul.f32 %v7356_v59, %v3046_v33  ;;  %v9875_v26 = vmul.f32 %v7356_v59, %v3047_v20 }
 0x28a   : > { %v9877_v9 = vmul.f32 %v7356_v59, %v3048_v23  ;;  %v9879_v15 = vmul.f32 %v7356_v59, %v3049_v42  ;;  %v9881_v62 = vmul.f32 %v7356_v59, %v3050_v56  ;;  %v9883_v1 = vmul.f32 %v7356_v59, %v3051_v7 }
 0x28b   : > { %11959 = vst [vmem:[#allocation43_spill] sm:$0xff] %v9869_v36  ;;  %11960 = vst [vmem:[#allocation23_spill] sm:$0xff] %v9871_v34  ;;  %v9885_v60 = vmul.f32 %v7356_v59, %v3052_v18  ;;  %v9887_v5 = vmul.f32 %v7356_v59, %v3053_v28  ;;  %v9889_v19 = vmul.f32 %v7356_v59, %v3054_v24  ;;  %v3098_v28 = vmax.f32 %v9841_v17, 0.0 }
 0x28c   : > { %v9891_v3 = vmul.f32 %v7356_v59, %v3055_v43  ;;  %v9893_v41 = vmul.f32 %v7356_v59, %v3056_v35  ;;  %v9895_v11 = vmul.f32 %v7356_v59, %v3057_v4  ;;  %v9897_v6 = vmul.f32 %v7356_v59, %v3058_v31 }
 0x28d   : > { %v9899_v37 = vmul.f32 %v7356_v59, %v3059_v45  ;;  %v9901_v25 = vmul.f32 %v7356_v59, %v3060_v13  ;;  %v9903_v8 = vmul.f32 %v7356_v59, %v3061_v44  ;;  %v9905_v46 = vmul.f32 %v7356_v59, %v3062_v21 }
 0x28e   : > { %v11690_v24 = vmax.f32 %v9843_v12, 0.0  ;;  %v3100_v43 = vmax.f32 %v9845_v22, 0.0  ;;  %v11687_v35 = vmax.f32 %v9847_v2, 0.0  ;;  %v3102_v4 = vmax.f32 %v9849_v10, 0.0 }
 0x28f   : > { %v11688_v31 = vmax.f32 %v9851_v52, 0.0  ;;  %v3104_v45 = vmax.f32 %v9853_v38, 0.0  ;;  %v11689_v13 = vmax.f32 %v9855_v55, 0.0  ;;  %v3106_v44 = vmax.f32 %v9857_v27, 0.0 }
 0x290   : > { %v11691_v21 = vmax.f32 %v9859_v58, 0.0  ;;  %v3108_v50 = vmax.f32 %v9861_v16, 0.0  ;;  %v11693_v54 = vmax.f32 %v9863_v53, 0.0  ;;  %v3110_v30 = vmax.f32 %v9865_v47, 0.0 }
 0x291   : > { %v3112_v48 = vmax.f32 %v9873_v32, 0.0  ;;  %v3114_v57 = vmax.f32 %v9877_v9, 0.0  ;;  %v3116_v61 = vmax.f32 %v9881_v62, 0.0  ;;  %v3118_v33 = vmax.f32 %v9885_v60, 0.0 }
 0x292   : > { %v3120_v23 = vmax.f32 %v9889_v19, 0.0  ;;  %v3122_v42 = vmax.f32 %v9893_v41, 0.0  ;;  %v3124_v7 = vmax.f32 %v9897_v6, 0.0  ;;  %v3126_v40 = vmax.f32 %v9901_v25, 0.0 }
 0x293   : > { %v3128_v22 = vmax.f32 %v9905_v46, 0.0  ;;  %v9938_v10 = vrot.slane %v3098_v28, 1  ;;  %v9940_v38 = vrot.slane %v3100_v43, 1  ;;  %v9942_v63 = vrot.slane %v3102_v4, 1 }
 0x294   : > { %v9944_v27 = vrot.slane %v3104_v45, 1  ;;  %v9946_v16 = vrot.slane %v3106_v44, 1  ;;  %v9948_v47 = vrot.slane %v3108_v50, 1  ;;  %v9950_v32 = vrot.slane %v3110_v30, 1 }
 0x295   : > { %v9952_v9 = vrot.slane %v3112_v48, 1  ;;  %v9954_v62 = vrot.slane %v3114_v57, 1  ;;  %v9956_v60 = vrot.slane %v3116_v61, 1  ;;  %v9958_v19 = vrot.slane %v3118_v33, 1 }
 0x296   : > { %v9960_v41 = vrot.slane %v3120_v23, 1  ;;  %v9962_v6 = vrot.slane %v3122_v42, 1  ;;  %v9964_v25 = vrot.slane %v3124_v7, 1  ;;  %v9966_v46 = vrot.slane %v3126_v40, 1 }
 0x297   : > { %11961 = vst [vmem:[#allocation66_spill] sm:$0xff] %v9958_v19  ;;  %v9968_v17 = vrot.slane %v3128_v22, 1  ;;  %v3195_v18 = vrot.slane %v3098_v28, 7  ;;  %v3196_v56 = vrot.slane %v11690_v24, 7  ;;  %v3198_v59 = vrot.slane %v3100_v43, 7 }
 0x298   : > { %11962 = vst [vmem:[#allocation19_spill] sm:$0xff] %v9960_v41  ;;  %11963 = vst [vmem:[#allocation34_spill] sm:$0xff] %v9962_v6  ;;  %v3199_v20 = vrot.slane %v11687_v35, 7  ;;  %v9974_v29 = vrot.slane %v3102_v4, 7  ;;  %v9978_v51 = vrot.slane %v11688_v31, 7  ;;  %v9980_v0 = vrot.slane %v3104_v45, 7 }
 0x299   : > { %11964 = vst [vmem:[#allocation35_spill] sm:$0xff] %v9964_v25  ;;  %11965 = vst [vmem:[#allocation47_spill] sm:$0xff] %v9966_v46  ;;  %v9984_v39 = vrot.slane %v11689_v13, 7  ;;  %v9986_v28 = vrot.slane %v3106_v44, 7  ;;  %v9990_v43 = vrot.slane %v11691_v21, 7  ;;  %v9995_v4 = vrot.slane %v3108_v50, 7 }
 0x29a   : > { %11966 = vst [vmem:[#allocation32_spill] sm:$0xff] %v9968_v17  ;;  %v9993_v35 = vsel %vm3194_vm2, %v3198_v59, %v3199_v20  ;;  %v9999_v31 = vrot.slane %v11693_v54, 7  ;;  %v10001_v45 = vrot.slane %v3110_v30, 7  ;;  %v11967_v13 = vmax.f32 %v9867_v14, 0.0 }
 0x29b   : > { %v10007_v44 = vrot.slane %v3112_v48, 7  ;;  %v11968_v21 = vmax.f32 %v9875_v26, 0.0  ;;  %v10013_v17 = vrot.slane %v3114_v57, 7  ;;  %v11969_v50 = vmax.f32 %v9879_v15, 0.0 }
 0x29c   : > { %v10005_v24 = vrot.slane %v11967_v13, 7  ;;  %v10019_v54 = vrot.slane %v3116_v61, 7  ;;  %v11970_v30 = vmax.f32 %v9883_v1, 0.0  ;;  %v10025_v13 = vrot.slane %v3118_v33, 7 }
 0x29d   : > { %v10011_v34 = vrot.slane %v11968_v21, 7  ;;  %v10017_v36 = vrot.slane %v11969_v50, 7  ;;  %v11971_v48 = vmax.f32 %v9887_v5, 0.0  ;;  %v10031_v21 = vrot.slane %v3120_v23, 7 }
 0x29e   : > { %v10023_v46 = vrot.slane %v11970_v30, 7  ;;  %v11973_v57 = vmax.f32 %v9891_v3, 0.0  ;;  %v10037_v50 = vrot.slane %v3122_v42, 7  ;;  %v11975_v61 = vmax.f32 %v9895_v11, 0.0 }
 0x29f   : > { %v10029_v25 = vrot.slane %v11971_v48, 7  ;;  %11972 = vst [vmem:[#allocation41_spill] sm:$0xff] %v10031_v21  ;;  %v10043_v30 = vrot.slane %v3124_v7, 7  ;;  %v11978_v33 = vmax.f32 %v9899_v37, 0.0  ;;  %v10049_v48 = vrot.slane %v3126_v40, 7 }
 0x2a0   : > { %v10035_v6 = vrot.slane %v11973_v57, 7  ;;  %11974 = vst [vmem:[#allocation42_spill] sm:$0xff] %v10037_v50  ;;  %v10041_v41 = vrot.slane %v11975_v61, 7  ;;  %v11981_v23 = vmax.f32 %v9903_v8, 0.0  ;;  %v10055_v57 = vrot.slane %v3128_v22, 7 }
 0x2a1   : > { %11977 = vst [vmem:[#allocation49_spill] sm:$0xff] %v10043_v30  ;;  %v10047_v19 = vrot.slane %v11978_v33, 7  ;;  %11980 = vst [vmem:[#allocation46_spill] sm:$0xff] %v10049_v48  ;;  %v11984_v42 = vmax.f32 %v9843_v12, 0.0  ;;  %v11985_v61 = vmax.f32 %v9847_v2, 0.0  ;;  %v11986_v7 = vmax.f32 %v9851_v52, 0.0 }
 0x2a2   : > { %11976 = vst [vmem:[#allocation55_spill] sm:$0xff] %v10041_v41  ;;  %v10053_v21 = vrot.slane %v11981_v23, 7  ;;  %11983 = vst [vmem:[#allocation62_spill] sm:$0xff] %v10055_v57  ;;  %v11987_v33 = vmax.f32 %v9855_v55, 0.0  ;;  %v11988_v40 = vmax.f32 %v9859_v58, 0.0  ;;  %v11989_v23 = vmax.f32 %v9863_v53, 0.0 }
 0x2a3   : > { %11979 = vst [vmem:[#allocation58_spill] sm:$0xff] %v10047_v19  ;;  %v3291_v50 = vrot.slane %v11984_v42, 5  ;;  %v3292_v41 = vrot.slane %v11985_v61, 5  ;;  %v3293_v30 = vrot.slane %v11986_v7, 5  ;;  %v11990_v12 = vmax.f32 %v9867_v14, 0.0 }
 0x2a4   : > { %11982 = vst [vmem:[#allocation59_spill] sm:$0xff] %v10053_v21  ;;  %v3294_v19 = vrot.slane %v11987_v33, 5  ;;  %v10067_v48 = vrot.slane %v11988_v40, 5  ;;  %v10071_v22 = vrot.slane %v11989_v23, 5  ;;  %v11991_v2 = vmax.f32 %v9875_v26, 0.0 }
 0x2a5   : > { %v10075_v42 = vrot.slane %v11990_v12, 5  ;;  %v11992_v52 = vmax.f32 %v9879_v15, 0.0  ;;  %v11993_v58 = vmax.f32 %v9883_v1, 0.0  ;;  %v11994_v53 = vmax.f32 %v9887_v5, 0.0 }
 0x2a6   : > { %v10079_v61 = vrot.slane %v11991_v2, 5  ;;  %v11995_v14 = vmax.f32 %v9891_v3, 0.0  ;;  %v11996_v26 = vmax.f32 %v9895_v11, 0.0  ;;  %v11997_v15 = vmax.f32 %v9899_v37, 0.0 }
 0x2a7   : > { %v10083_v55 = vrot.slane %v11992_v52, 5  ;;  %v10087_v7 = vrot.slane %v11993_v58, 5  ;;  %v10091_v33 = vrot.slane %v11994_v53, 5  ;;  %v11999_v1 = vmax.f32 %v9903_v8, 0.0 }
 0x2a8   : > { %v10095_v40 = vrot.slane %v11995_v14, 5  ;;  %v10099_v23 = vrot.slane %v11996_v26, 5  ;;  %v10103_v12 = vrot.slane %v11997_v15, 5  ;;  %v3324_v5 = vsel %vm3194_vm2, %v9940_v38, %v3198_v59 }
 0x2a9   : > { %v10107_v2 = vrot.slane %v11999_v1, 5  ;;  %v3340_v52 = vsel %vm3194_vm2, %v3199_v20, %v3292_v41  ;;  %v3491_v3 = vrot.slane %v9993_v35, 2  ;;  %v3490_v58 = vrot.slane %v3324_v5, 2 }
 0x2aa   : > { %11998 = vst [vmem:[#allocation60_spill] sm:$0xff] %v10103_v12  ;;  %v3493_v53 = vrot.slane %v3340_v52, 2  ;;  %v3197_v11 = vsel %vm3194_vm2, %v3195_v18, %v3196_v56  ;;  %v3323_v37 = vsel %vm3194_vm2, %v9938_v10, %v3195_v18  ;;  %v3339_v14 = vsel %vm3194_vm2, %v3196_v56, %v3291_v50 }
 0x2ab   : > { %12000 = vst [vmem:[#allocation54_spill] sm:$0xff] %v10107_v2  ;;  %v3390_v26 = vrot.slane %v3323_v37, 1  ;;  %v3391_v8 = vrot.slane %v3197_v11, 1  ;;  %v10117_v15 = vpack.c.bf16 %v3197_v11, %v3323_v37  ;;  %v3393_v1 = vrot.slane %v3339_v14, 1 }
 0x2ac   : > { %v3495_v57 = vrot.slane %v3323_v37, 2  ;;  %v3496_v59 = vrot.slane %v3197_v11, 2  ;;  %v3498_v38 = vrot.slane %v3339_v14, 2  ;;  %v3492_v41 = vsel %vm446_vm1, %v3490_v58, %v3491_v3 }
 0x2ad   : > { %v3392_v20 = vsel %vm333_vm0, %v3390_v26, %v3391_v8  ;;  %v3494_v2 = vsel %vm446_vm1, %v3491_v3, %v3493_v53  ;;  %v3385_v21 = vrot.slane %v3324_v5, 1  ;;  %v3394_v12 = vsel %vm333_vm0, %v3391_v8, %v3393_v1  ;;  %v7311_v3 = vld [vmem:[%s11598_s3 + $0x38] sm:$0xff]  }
 0x2ae   : > { %v3497_v18 = vsel %vm446_vm1, %v3495_v57, %v3496_v59  ;;  %v3499_v56 = vsel %vm446_vm1, %v3496_v59, %v3498_v38  ;;  %v10125_v10 = vpack.c.bf16 %v3494_v2, %v3492_v41  ;;  %v10127_v50 = vpack.c.bf16 %v3394_v12, %v3392_v20 }
 0x2af   : > { %v10129_v37 = vpack.c.bf16 %v3499_v56, %v3497_v18  ;;  %v3386_v11 = vrot.slane %v9993_v35, 1  ;;  %v3388_v14 = vrot.slane %v3340_v52, 1  ;;  %v3203_v58 = vsel %vm3194_vm2, %v9974_v29, %v9978_v51  ;;  %v7308_v52 = vld [vmem:[%s11598_s3 + $0xb0] sm:$0xff]  }
 0x2b0   : > { %v3325_v57 = vsel %vm3194_vm2, %v9942_v63, %v9974_v29  ;;  %v3341_v12 = vsel %vm3194_vm2, %v9978_v51, %v3293_v30  ;;  %v10144_v2 = vpack.c.bf16 %v9993_v35, %v3324_v5  ;;  %3932 = vmatprep.mubr.bf16.mxu1 %v10127_v50  ;;  %v3501_v29 = vrot.slane %v3203_v58, 2  ;;  %v7312_v51 = vld [vmem:[%s11598_s3 + $0x70] sm:$0xff]  }
 0x2b1   : > { %7032 = vmatprep.mubr.bf16.mxu0 %v10129_v37  ;;  %v3387_v53 = vsel %vm333_vm0, %v3385_v21, %v3386_v11  ;;  %v3389_v26 = vsel %vm333_vm0, %v3386_v11, %v3388_v14  ;;  %v3500_v8 = vrot.slane %v3325_v57, 2  ;;  %3933 = vmatmul.mubr.bf16.vlgmr.msra.gmra.mxu1 %v10117_v15  ;;  %v3503_v63 = vrot.slane %v3341_v12, 2  ;;  %v7314_v14 = vld [vmem:[%s11598_s3 + $0x68] sm:$0xff]  }
 0x2b2   : > { %7033 = vmatmul.mubr.bf16.vlgmr.msra.gmra.mxu0 %v10125_v10  ;;  %v10158_v35 = vpack.c.bf16 %v3389_v26, %v3387_v53  ;;  %v10163_v30 = vsel %vm3194_vm2, %v9980_v0, %v9984_v39  ;;  %v10168_v21 = vsel %vm3194_vm2, %v9944_v27, %v9980_v0  ;;  %7065 = vmatpush3.bf16.msra.mxu1 %v9686_v49  ;;  %v3395_v27 = vrot.slane %v3325_v57, 1  ;;  %v7310_v49 = vld [vmem:[%s11598_s3 + $0xa8] sm:$0xff]  }
 0x2b3   : > { %v3502_v5 = vsel %vm446_vm1, %v3500_v8, %v3501_v29  ;;  %v10174_v1 = vsel %vm3194_vm2, %v9984_v39, %v3294_v19  ;;  %v3505_v59 = vrot.slane %v10168_v21, 2  ;;  %v3506_v38 = vrot.slane %v10163_v30, 2  ;;  %6601 = vmatpush3.bf16.msra.mxu0 %v7311_v3  ;;  %7066 = vmatprep.subr.bf16.mxu1 %v7308_v52  ;;  %v7313_v39 = vld [vmem:[%s11598_s3 + $0x30] sm:$0xff]  }
 0x2b4   : > { %3940 = vmatprep.mubr.bf16.mxu1 %v10158_v35  ;;  %v3504_v20 = vsel %vm446_vm1, %v3501_v29, %v3503_v63  ;;  %v3508_v0 = vrot.slane %v10174_v1, 2  ;;  %v3396_v41 = vrot.slane %v3203_v58, 1  ;;  %v3398_v56 = vrot.slane %v3341_v12, 1  ;;  %6602 = vmatprep.subr.bf16.mxu0 %v7312_v51 }
 0x2b5   : > { %v10187_v19 = vpack.c.bf16 %v3504_v20, %v3502_v5  ;;  %v3507_v18 = vsel %vm446_vm1, %v3505_v59, %v3506_v38  ;;  %v10193_v11 = vsel %vm3194_vm2, %v9986_v28, %v9990_v43  ;;  %v10203_v26 = vsel %vm3194_vm2, %v9946_v16, %v9986_v28 }
 0x2b6   : > { %v3509_v3 = vsel %vm446_vm1, %v3506_v38, %v3508_v0  ;;  %v3397_v53 = vsel %vm333_vm0, %v3395_v27, %v3396_v41  ;;  %v10208_v12 = vsel %vm3194_vm2, %v9990_v43, %v10067_v48  ;;  %v3399_v29 = vsel %vm333_vm0, %v3396_v41, %v3398_v56  ;;  %7067 = vmatpush3.bf16.msra.mxu1 %v7308_v52  ;;  %v7315_v48 = vld [vmem:[%s11598_s3 + $0x28] sm:$0xff]   ;;  %v7316_v38 = vld [vmem:[%s11598_s3 + $0x60] sm:$0xff]  }
 0x2b7   : > { %7036 = vmatprep.mubr.bf16.mxu0 %v10187_v19  ;;  %v10211_v8 = vpack.c.bf16 %v3509_v3, %v3507_v18  ;;  %v3510_v51 = vrot.slane %v10203_v26, 2  ;;  %v3511_v63 = vrot.slane %v10193_v11, 2  ;;  %v10216_v5 = vpack.c.bf16 %v3399_v29, %v3397_v53  ;;  %7068 = vmatprep.subr.bf16.mxu1 %v7310_v49 }
 0x2b8   : > { %v3513_v16 = vrot.slane %v10208_v12, 2  ;;  %v10219_v28 = vpack.c.bf16 %v3203_v58, %v3325_v57  ;;  %v10224_v43 = vsel %vm3194_vm2, %v9995_v4, %v9999_v31  ;;  %6603 = vmatpush3.bf16.msra.mxu0 %v7313_v39  ;;  %v10233_v52 = vsel %vm3194_vm2, %v9948_v47, %v9995_v4 }
 0x2b9   : > { %v3512_v59 = vsel %vm446_vm1, %v3510_v51, %v3511_v63  ;;  %v10238_v58 = vsel %vm3194_vm2, %v9999_v31, %v10071_v22  ;;  %v3516_v57 = vrot.slane %v10224_v43, 2  ;;  %6604 = vmatprep.subr.bf16.mxu0 %v7314_v14  ;;  %3941 = vmatmul.mubr.bf16.gmra.mxu1 %v10144_v2  ;;  %v3515_v47 = vrot.slane %v10233_v52, 2  ;;  %v7319_v22 = vld [vmem:[%s11598_s3 + $0xa0] sm:$0xff]  }
 0x2ba   : > { %7037 = vmatmul.mubr.bf16.gmra.mxu0 %v10211_v8  ;;  %v3514_v20 = vsel %vm446_vm1, %v3511_v63, %v3513_v16  ;;  %v3518_v4 = vrot.slane %v10238_v58, 2  ;;  %v3400_v31 = vrot.slane %v10168_v21, 1  ;;  %3948 = vmatprep.mubr.bf16.mxu1 %v10216_v5  ;;  %v3401_v27 = vrot.slane %v10163_v30, 1 }
 0x2bb   : > { %v10254_v0 = vpack.c.bf16 %v3514_v20, %v3512_v59  ;;  %v3403_v41 = vrot.slane %v10174_v1, 1  ;;  %v10261_v39 = vsel %vm3194_vm2, %v10001_v45, %v10005_v24  ;;  %7069 = vmatpush3.bf16.msra.mxu1 %v7310_v49  ;;  %v3517_v18 = vsel %vm446_vm1, %v3515_v47, %v3516_v57  ;;  %v7317_v1 = vld [vmem:[%s11598_s3 + $0x20] sm:$0xff]   ;;  %v7327_v49 = vld [vmem:[%s11598_s3 + $0x98] sm:$0xff]  }
 0x2bc   : > { %v3519_v56 = vsel %vm446_vm1, %v3516_v57, %v3518_v4  ;;  %v10268_v14 = vsel %vm3194_vm2, %v9950_v32, %v10001_v45  ;;  %v10273_v3 = vsel %vm3194_vm2, %v10005_v24, %v10075_v42  ;;  %6605 = vmatpush3.bf16.msra.mxu0 %v7315_v48  ;;  %v3402_v32 = vsel %vm333_vm0, %v3400_v31, %v3401_v27  ;;  %v7318_v42 = vld [vmem:[%s11598_s3 + $0x58] sm:$0xff]   ;;  %v7321_v31 = vld [vmem:[%s11598_s3 + $0x50] sm:$0xff]  }
 0x2bd   : > { %7040 = vmatprep.mubr.bf16.mxu0 %v10254_v0  ;;  %v10282_v53 = vpack.c.bf16 %v3519_v56, %v3517_v18  ;;  %v3404_v45 = vsel %vm333_vm0, %v3401_v27, %v3403_v41  ;;  %v3520_v24 = vrot.slane %v10268_v14, 2  ;;  %6606 = vmatprep.subr.bf16.mxu0 %v7316_v38  ;;  %v3521_v51 = vrot.slane %v10261_v39, 2 }
 0x2be   : > { %v10290_v29 = vpack.c.bf16 %v3404_v45, %v3402_v32  ;;  %v3523_v63 = vrot.slane %v10273_v3, 2  ;;  %v10296_v16 = vpack.c.bf16 %v10163_v30, %v10168_v21  ;;  %7070 = vmatprep.subr.bf16.mxu1 %v7319_v22  ;;  %v10301_v48 = vsel %vm3194_vm2, %v10007_v44, %v10011_v34 }
 0x2bf   : > { %v10306_v59 = vsel %vm3194_vm2, %v9952_v9, %v10007_v44  ;;  %v10311_v57 = vsel %vm3194_vm2, %v10011_v34, %v10079_v61  ;;  %v3405_v38 = vrot.slane %v10203_v26, 1  ;;  %7071 = vmatpush3.bf16.msra.mxu1 %v7319_v22  ;;  %v3522_v30 = vsel %vm446_vm1, %v3520_v24, %v3521_v51  ;;  %v7320_v9 = vld [vmem:[%s11598_s3 + $0x18] sm:$0xff]   ;;  %v10332_v22 = vld [vmem:[%s11598_s3 + $0x90] sm:$0xff]  }
 0x2c0   : > { %v3524_v21 = vsel %vm446_vm1, %v3521_v51, %v3523_v63  ;;  %v3525_v20 = vrot.slane %v10306_v59, 2  ;;  %v3526_v47 = vrot.slane %v10301_v48, 2  ;;  %6607 = vmatpush3.bf16.msra.mxu0 %v7317_v1  ;;  %7072 = vmatprep.subr.bf16.mxu1 %v7327_v49  ;;  %v3528_v34 = vrot.slane %v10311_v57, 2  ;;  %v7322_v51 = vld [vmem:[%s11598_s3 + $0x10] sm:$0xff]  }
 0x2c1   : > { %v10321_v44 = vpack.c.bf16 %v3524_v21, %v3522_v30  ;;  %v3406_v61 = vrot.slane %v10193_v11, 1  ;;  %v3408_v4 = vrot.slane %v10208_v12, 1  ;;  %6608 = vmatprep.subr.bf16.mxu0 %v7318_v42  ;;  %3949 = vmatmul.mubr.bf16.gmra.mxu1 %v10219_v28  ;;  %v10340_v12 = vsel %vm3194_vm2, %v10013_v17, %v10017_v36 }
 0x2c2   : > { %7041 = vmatmul.mubr.bf16.gmra.mxu0 %v10282_v53  ;;  %v3527_v27 = vsel %vm446_vm1, %v3525_v20, %v3526_v47  ;;  %v10345_v41 = vsel %vm3194_vm2, %v9954_v62, %v10013_v17  ;;  %v3410_v18 = vrot.slane %v10233_v52, 1  ;;  %3956 = vmatprep.mubr.bf16.mxu1 %v10290_v29  ;;  %v3529_v56 = vsel %vm446_vm1, %v3526_v47, %v3528_v34 }
 0x2c3   : > { %12001 = vst [vmem:[#allocation61_spill] sm:$0xff] %v10321_v44  ;;  %7044 = vmatprep.mubr.bf16.mxu0 %v10321_v44  ;;  %v3407_v1 = vsel %vm333_vm0, %v3405_v38, %v3406_v61  ;;  %v3409_v32 = vsel %vm333_vm0, %v3406_v61, %v3408_v4  ;;  %v3530_v45 = vrot.slane %v10345_v41, 2  ;;  %v10354_v24 = vpack.c.bf16 %v3529_v56, %v3527_v27  ;;  %v7324_v4 = vld [vmem:[%s11598_s3 + $0x8] sm:$0xff]  }
 0x2c4   : > { %v10356_v42 = vpack.c.bf16 %v3409_v32, %v3407_v1  ;;  %v10361_v17 = vsel %vm3194_vm2, %v10017_v36, %v10083_v55  ;;  %v3531_v62 = vrot.slane %v10340_v12, 2  ;;  %6609 = vmatpush3.bf16.msra.mxu0 %v7320_v9  ;;  %7073 = vmatpush3.bf16.msra.mxu1 %v7327_v49  ;;  %v10370_v38 = vpack.c.bf16 %v10193_v11, %v10203_v26  ;;  %v7323_v55 = vld [vmem:[%s11598_s3 + $0x48] sm:$0xff]  }
 0x2c5   : > { %12002 = vst [vmem:[#allocation10_spill] sm:$0xff] %v10354_v24  ;;  %v3533_v63 = vrot.slane %v10361_v17, 2  ;;  %v10375_v30 = vsel %vm3194_vm2, %v10019_v54, %v10023_v46  ;;  %v10380_v36 = vsel %vm3194_vm2, %v9956_v60, %v10019_v54  ;;  %6610 = vmatprep.subr.bf16.mxu0 %v7321_v31  ;;  %7074 = vmatprep.subr.bf16.mxu1 %v10332_v22  ;;  %v3411_v20 = vrot.slane %v10224_v43, 1  ;;  %v7329_v1 = vld [vmem:[%s11598_s3 + $0x88] sm:$0xff]  }
 0x2c6   : > { %v3532_v11 = vsel %vm446_vm1, %v3530_v45, %v3531_v62  ;;  %v10390_v26 = vsel %vm3194_vm2, %v10023_v46, %v10087_v7  ;;  %v3535_v49 = vrot.slane %v10380_v36, 2  ;;  %v3536_v21 = vrot.slane %v10375_v30, 2  ;;  %v12004_v7 = vld [vmem:[#allocation66_spill] sm:$0xff] }
 0x2c7   : > { %v3534_v54 = vsel %vm446_vm1, %v3531_v62, %v3533_v63  ;;  %v3538_v60 = vrot.slane %v10390_v26, 2  ;;  %v3413_v47 = vrot.slane %v10238_v58, 1  ;;  %v10404_v46 = vsel %vm3194_vm2, %v10025_v13, %v10029_v25 }
 0x2c8   : > { %v10398_v9 = vpack.c.bf16 %v3534_v54, %v3532_v11  ;;  %v3537_v34 = vsel %vm446_vm1, %v3535_v49, %v3536_v21  ;;  %v10409_v61 = vsel %vm3194_vm2, %v12004_v7, %v10025_v13  ;;  %6611 = vmatpush3.bf16.msra.mxu0 %v7322_v51  ;;  %v3412_v31 = vsel %vm333_vm0, %v3410_v18, %v3411_v20  ;;  %v7325_v13 = vld [vmem:[%s11598_s3 + $0x40] sm:$0xff]   ;;  %v12006_v51 = vld [vmem:[#allocation41_spill] sm:$0xff] }
 0x2c9   : > { %v3539_v58 = vsel %vm446_vm1, %v3536_v21, %v3538_v60  ;;  %v3414_v27 = vsel %vm333_vm0, %v3411_v20, %v3413_v47  ;;  %v10420_v56 = vsel %vm3194_vm2, %v10029_v25, %v10091_v33  ;;  %6612 = vmatprep.subr.bf16.mxu0 %v7323_v55  ;;  %3957 = vmatmul.mubr.bf16.gmra.mxu1 %v10296_v16  ;;  %v3540_v25 = vrot.slane %v10409_v61, 2  ;;  %v12007_v55 = vld [vmem:[#allocation19_spill] sm:$0xff]  ;;  %v7326_v54 = vld [vmem:[%s11598_s3] sm:$0xff]  }
 0x2ca   : > { %12003 = vst [vmem:[#allocation11_spill] sm:$0xff] %v10398_v9  ;;  %7045 = vmatmul.mubr.bf16.gmra.mxu0 %v10354_v24  ;;  %v10430_v18 = vpack.c.bf16 %v3539_v58, %v3537_v34  ;;  %v10432_v32 = vpack.c.bf16 %v3414_v27, %v3412_v31  ;;  %v3541_v33 = vrot.slane %v10404_v46, 2  ;;  %3964 = vmatprep.mubr.bf16.mxu1 %v10356_v42  ;;  %v3543_v45 = vrot.slane %v10420_v56, 2  ;;  %v10475_v34 = vld [vmem:[%s11598_s3 + $0x238] sm:$0xff]   ;;  %v12010_v31 = vld [vmem:[#allocation42_spill] sm:$0xff] }
 0x2cb   : > { %7048 = vmatprep.mubr.bf16.mxu0 %v10398_v9  ;;  %v10441_v62 = vpack.c.bf16 %v10224_v43, %v10233_v52  ;;  %v10446_v63 = vsel %vm3194_vm2, %v12006_v51, %v10035_v6  ;;  %v10451_v11 = vsel %vm3194_vm2, %v12007_v55, %v12006_v51  ;;  %v10457_v21 = vsel %vm3194_vm2, %v10035_v6, %v10095_v40  ;;  %v7330_v40 = vld [vmem:[%s11598_s3 + $0x80] sm:$0xff]   ;;  %v12009_v58 = vld [vmem:[#allocation55_spill] sm:$0xff] }
 0x2cc   : > { %12005 = vst [vmem:[#allocation36_spill] sm:$0xff] %v10430_v18  ;;  %v3542_v49 = vsel %vm446_vm1, %v3540_v25, %v3541_v33  ;;  %v3545_v43 = vrot.slane %v10451_v11, 2  ;;  %v3546_v52 = vrot.slane %v10446_v63, 2  ;;  %6613 = vmatpush3.bf16.msra.mxu0 %v7324_v4  ;;  %7075 = vmatpush3.bf16.msra.mxu1 %v10332_v22  ;;  %v3544_v60 = vsel %vm446_vm1, %v3541_v33, %v3543_v45  ;;  %v12011_v33 = vld [vmem:[#allocation34_spill] sm:$0xff] }
 0x2cd   : > { %v3548_v20 = vrot.slane %v10457_v21, 2  ;;  %v3415_v47 = vrot.slane %v10268_v14, 1  ;;  %v3416_v6 = vrot.slane %v10261_v39, 1  ;;  %6614 = vmatprep.subr.bf16.mxu0 %v7325_v13  ;;  %7076 = vmatprep.subr.bf16.mxu1 %v7329_v1  ;;  %v10477_v22 = vpack.c.bf16 %v3544_v60, %v3542_v49 }
 0x2ce   : > { %v3547_v7 = vsel %vm446_vm1, %v3545_v43, %v3546_v52  ;;  %v3418_v4 = vrot.slane %v10273_v3, 1  ;;  %v10484_v27 = vsel %vm3194_vm2, %v12010_v31, %v12009_v58  ;;  %v10491_v45 = vsel %vm3194_vm2, %v12011_v33, %v12010_v31 }
 0x2cf   : > { %12008 = vst [vmem:[#allocation17_spill] sm:$0xff] %v10477_v22  ;;  %v3549_v13 = vsel %vm446_vm1, %v3546_v52, %v3548_v20  ;;  %v3417_v25 = vsel %vm333_vm0, %v3415_v47, %v3416_v6  ;;  %v10496_v51 = vsel %vm3194_vm2, %v12009_v58, %v10099_v23  ;;  %v3550_v49 = vrot.slane %v10491_v45, 2  ;;  %v12013_v23 = vld [vmem:[#allocation58_spill] sm:$0xff]  ;;  %v12014_v47 = vld [vmem:[#allocation49_spill] sm:$0xff] }
 0x2d0   : > { %v10498_v3 = vpack.c.bf16 %v3549_v13, %v3547_v7  ;;  %v3419_v55 = vsel %vm333_vm0, %v3416_v6, %v3418_v4  ;;  %v3551_v43 = vrot.slane %v10484_v27, 2  ;;  %6615 = vmatpush3.bf16.msra.mxu0 %v7326_v54  ;;  %7077 = vmatpush3.bf16.msra.mxu1 %v7329_v1  ;;  %v3553_v60 = vrot.slane %v10496_v51, 2  ;;  %v7332_v1 = vld [vmem:[%s11598_s3 + $0x1f8] sm:$0xff]   ;;  %v12016_v6 = vld [vmem:[#allocation60_spill] sm:$0xff] }
 0x2d1   : > { %v10503_v52 = vpack.c.bf16 %v3419_v55, %v3417_v25  ;;  %v10508_v20 = vpack.c.bf16 %v10261_v39, %v10268_v14  ;;  %v10513_v7 = vsel %vm3194_vm2, %v12014_v47, %v12013_v23  ;;  %7078 = vmatprep.subr.bf16.mxu1 %v7330_v40  ;;  %7112 = vmatprep.subr.bf16.mxu0 %v10475_v34  ;;  %v12015_v39 = vld [vmem:[#allocation35_spill] sm:$0xff]  ;;  %v3420_v33 = vrot.slane %v10306_v59, 1 }
 0x2d2   : > { %12012 = vst [vmem:[#allocation22_spill] sm:$0xff] %v10498_v3  ;;  %3965 = vmatmul.mubr.bf16.gmra.mxu1 %v10370_v38  ;;  %7049 = vmatmul.mubr.bf16.gmra.mxu0 %v10430_v18  ;;  %v3552_v54 = vsel %vm446_vm1, %v3550_v49, %v3551_v43  ;;  %v10525_v14 = vsel %vm3194_vm2, %v12015_v39, %v12014_v47  ;;  %v3556_v58 = vrot.slane %v10513_v7, 2  ;;  %v3421_v49 = vrot.slane %v10301_v48, 1  ;;  %v12018_v47 = vld [vmem:[#allocation59_spill] sm:$0xff]  ;;  %v12019_v39 = vld [vmem:[#allocation46_spill] sm:$0xff] }
 0x2d3   : > { %v10530_v4 = vsel %vm3194_vm2, %v12013_v23, %v12016_v6  ;;  %3972 = vmatprep.mubr.bf16.mxu1 %v10432_v32  ;;  %7052 = vmatprep.mubr.bf16.mxu0 %v10477_v22  ;;  %v3554_v31 = vsel %vm446_vm1, %v3551_v43, %v3553_v60  ;;  %v3555_v13 = vrot.slane %v10525_v14, 2  ;;  %v3423_v23 = vrot.slane %v10311_v57, 1  ;;  %v12020_v22 = vld [vmem:[#allocation47_spill] sm:$0xff] }
 0x2d4   : > { %v3558_v25 = vrot.slane %v10530_v4, 2  ;;  %v10539_v55 = vpack.c.bf16 %v3554_v31, %v3552_v54  ;;  %v10546_v6 = vsel %vm3194_vm2, %v12019_v39, %v12018_v47  ;;  %7079 = vmatpush3.bf16.msra.mxu1 %v7330_v40  ;;  %v10553_v18 = vsel %vm3194_vm2, %v12020_v22, %v12019_v39  ;;  %v12021_v54 = vld [vmem:[#allocation54_spill] sm:$0xff] }
 0x2d5   : > { %v3557_v43 = vsel %vm446_vm1, %v3555_v13, %v3556_v58  ;;  %v10558_v31 = vsel %vm3194_vm2, %v12018_v47, %v12021_v54  ;;  %6736 = vmatprep.subr.bf16.mxu1 %v7332_v1  ;;  %v3422_v9 = vsel %vm333_vm0, %v3420_v33, %v3421_v49  ;;  %v3424_v40 = vsel %vm333_vm0, %v3421_v49, %v3423_v23  ;;  %v12022_v47 = vld [vmem:[#allocation43_spill] sm:$0xff]  ;;  %v12023_v1 = vld [vmem:[#allocation62_spill] sm:$0xff]  ;;  %v12024_v33 = vld [vmem:[#allocation32_spill] sm:$0xff] }
 0x2d6   : > { %12017 = vst [vmem:[#allocation26_spill] sm:$0xff] %v10539_v55  ;;  %v3559_v60 = vsel %vm446_vm1, %v3556_v58, %v3558_v25  ;;  %v3560_v13 = vrot.slane %v10553_v18, 2  ;;  %v10565_v58 = vpack.c.bf16 %v3424_v40, %v3422_v9  ;;  %v3561_v25 = vrot.slane %v10546_v6, 2  ;;  %v12025_v9 = vld [vmem:[#allocation23_spill] sm:$0xff] }
 0x2d7   : > { %v10560_v57 = vpack.c.bf16 %v3559_v60, %v3557_v43  ;;  %v3563_v22 = vrot.slane %v10558_v31, 2  ;;  %v10571_v39 = vpack.c.bf16 %v10301_v48, %v10306_v59  ;;  %v10576_v43 = vsel %vm3194_vm2, %v12023_v1, %v12022_v47 }
 0x2d8   : > { %v10581_v49 = vsel %vm3194_vm2, %v12024_v33, %v12023_v1  ;;  %v10586_v23 = vsel %vm3194_vm2, %v12022_v47, %v12025_v9  ;;  %v3425_v60 = vrot.slane %v10345_v41, 1  ;;  %v3562_v48 = vsel %vm446_vm1, %v3560_v13, %v3561_v25 }
 0x2d9   : > { %v3564_v59 = vsel %vm446_vm1, %v3561_v25, %v3563_v22  ;;  %v3697_v54 = vrot.slane %v10581_v49, 2  ;;  %v3698_v40 = vrot.slane %v10576_v43, 2  ;;  %v3700_v33 = vrot.slane %v10586_v23, 2 }
 0x2da   : > { %3973 = vmatmul.mubr.bf16.gmra.mxu1 %v10441_v62  ;;  %7053 = vmatmul.mubr.bf16.gmra.mxu0 %v10498_v3  ;;  %v10595_v1 = vpack.c.bf16 %v3564_v59, %v3562_v48  ;;  %v3426_v47 = vrot.slane %v10340_v12, 1  ;;  %v3428_v9 = vrot.slane %v10361_v17, 1  ;;  %v10605_v25 = vpack.c.bf16 %v10340_v12, %v10345_v41 }
 0x2db   : > { %3980 = vmatprep.mubr.bf16.mxu1 %v10503_v52  ;;  %7056 = vmatprep.mubr.bf16.mxu0 %v10539_v55  ;;  %v3699_v13 = vsel %vm446_vm1, %v3697_v54, %v3698_v40  ;;  %v3430_v22 = vrot.slane %v10380_v36, 1  ;;  %v3431_v48 = vrot.slane %v10375_v30, 1  ;;  %v3701_v59 = vsel %vm446_vm1, %v3698_v40, %v3700_v33 }
 0x2dc   : > { %v3427_v3 = vsel %vm333_vm0, %v3425_v60, %v3426_v47  ;;  %v3429_v17 = vsel %vm333_vm0, %v3426_v47, %v3428_v9  ;;  %v3433_v24 = vrot.slane %v10390_v26, 1  ;;  %v10613_v44 = vpack.c.bf16 %v3701_v59, %v3699_v13 }
 0x2dd   : > { %v10615_v55 = vpack.c.bf16 %v3429_v17, %v3427_v3  ;;  %v3432_v54 = vsel %vm333_vm0, %v3430_v22, %v3431_v48  ;;  %v10620_v12 = vpack.c.bf16 %v10375_v30, %v10380_v36  ;;  %v3435_v40 = vrot.slane %v10409_v61, 1 }
 0x2de   : > { %v3434_v41 = vsel %vm333_vm0, %v3431_v48, %v3433_v24  ;;  %v3436_v60 = vrot.slane %v10404_v46, 1  ;;  %v3438_v33 = vrot.slane %v10420_v56, 1  ;;  %v10630_v26 = vpack.c.bf16 %v10404_v46, %v10409_v61 }
 0x2df   : > { %v10626_v47 = vpack.c.bf16 %v3434_v41, %v3432_v54  ;;  %v3440_v3 = vrot.slane %v10451_v11, 1  ;;  %v3441_v9 = vrot.slane %v10446_v63, 1  ;;  %v3443_v36 = vrot.slane %v10457_v21, 1 }
 0x2e0   : > { %v3437_v30 = vsel %vm333_vm0, %v3435_v40, %v3436_v60  ;;  %v3439_v24 = vsel %vm333_vm0, %v3436_v60, %v3438_v33  ;;  %v10639_v13 = vpack.c.bf16 %v10446_v63, %v10451_v11  ;;  %v3445_v46 = vrot.slane %v10491_v45, 1 }
 0x2e1   : > { %v10641_v56 = vpack.c.bf16 %v3439_v24, %v3437_v30  ;;  %v3442_v22 = vsel %vm333_vm0, %v3440_v3, %v3441_v9  ;;  %v3446_v61 = vrot.slane %v10484_v27, 1  ;;  %v3444_v48 = vsel %vm333_vm0, %v3441_v9, %v3443_v36 }
 0x2e2   : > { %3981 = vmatmul.mubr.bf16.gmra.mxu1 %v10508_v20  ;;  %7057 = vmatmul.mubr.bf16.gmra.mxu0 %v10560_v57  ;;  %v3448_v21 = vrot.slane %v10496_v51, 1  ;;  %v10652_v63 = vpack.c.bf16 %v10484_v27, %v10491_v45  ;;  %v3450_v11 = vrot.slane %v10525_v14, 1  ;;  %v10657_v59 = vpack.c.bf16 %v3444_v48, %v3442_v22 }
 0x2e3   : > { %3988 = vmatprep.mubr.bf16.mxu1 %v10565_v58  ;;  %7060 = vmatprep.mubr.bf16.mxu0 %v10595_v1  ;;  %v3447_v17 = vsel %vm333_vm0, %v3445_v46, %v3446_v61  ;;  %v3451_v54 = vrot.slane %v10513_v7, 1  ;;  %v3453_v41 = vrot.slane %v10530_v4, 1  ;;  %v10665_v27 = vpack.c.bf16 %v10513_v7, %v10525_v14 }
 0x2e4   : > { %v3449_v51 = vsel %vm333_vm0, %v3446_v61, %v3448_v21  ;;  %v3455_v45 = vrot.slane %v10553_v18, 1  ;;  %v3456_v40 = vrot.slane %v10546_v6, 1  ;;  %v3458_v9 = vrot.slane %v10558_v31, 1  ;;  %v7333_v21 = vld [vmem:[%s11598_s3 + $0x1b8] sm:$0xff]  }
 0x2e5   : > { %v10669_v60 = vpack.c.bf16 %v3449_v51, %v3447_v17  ;;  %v3452_v33 = vsel %vm333_vm0, %v3450_v11, %v3451_v54  ;;  %v3454_v3 = vsel %vm333_vm0, %v3451_v54, %v3453_v41  ;;  %v10679_v7 = vpack.c.bf16 %v10546_v6, %v10553_v18  ;;  %v7336_v6 = vld [vmem:[%s11598_s3 + $0x230] sm:$0xff]   ;;  %v7337_v54 = vld [vmem:[%s11598_s3 + $0x1e8] sm:$0xff]   ;;  %v7340_v51 = vld [vmem:[%s11598_s3 + $0x1a0] sm:$0xff]  }
 0x2e6   : > { %v10674_v30 = vpack.c.bf16 %v3454_v3, %v3452_v33  ;;  %v3457_v4 = vsel %vm333_vm0, %v3455_v45, %v3456_v40  ;;  %v3690_v14 = vrot.slane %v10581_v49, 1  ;;  %v3459_v24 = vsel %vm333_vm0, %v3456_v40, %v3458_v9  ;;  %v7334_v11 = vld [vmem:[%s11598_s3 + $0x1f0] sm:$0xff]   ;;  %v7338_v41 = vld [vmem:[%s11598_s3 + $0x1a8] sm:$0xff]   ;;  %v7342_v45 = vld [vmem:[%s11598_s3 + $0x1d8] sm:$0xff]  }
 0x2e7   : > { %v3691_v36 = vrot.slane %v10576_v43, 1  ;;  %v3693_v22 = vrot.slane %v10586_v23, 1  ;;  %v10687_v46 = vpack.c.bf16 %v10576_v43, %v10581_v49  ;;  %v10689_v31 = vpack.c.bf16 %v3459_v24, %v3457_v4  ;;  %v7341_v43 = vld [vmem:[%s11598_s3 + $0x228] sm:$0xff]   ;;  %v7346_v49 = vld [vmem:[%s11598_s3 + $0x220] sm:$0xff]   ;;  %v7335_v17 = vld [vmem:[%s11598_s3 + $0x1b0] sm:$0xff]  }
 0x2e8   : > { %v7354_v23 = vld [vmem:[%s11598_s3 + $0x200] sm:$0xff]   ;;  %v7343_v40 = vld [vmem:[%s11598_s3 + $0x198] sm:$0xff]   ;;  %v7344_v33 = vld [vmem:[%s11598_s3 + $0x1d0] sm:$0xff]  }
 0x2e9   : > { %v3692_v61 = vsel %vm333_vm0, %v3690_v14, %v3691_v36  ;;  %v3694_v48 = vsel %vm333_vm0, %v3691_v36, %v3693_v22  ;;  %v7345_v3 = vld [vmem:[%s11598_s3 + $0x190] sm:$0xff]   ;;  %v7347_v9 = vld [vmem:[%s11598_s3 + $0x1c8] sm:$0xff]   ;;  %v7351_v14 = vld [vmem:[%s11598_s3 + $0x1c0] sm:$0xff]  }
 0x2ea   : > { %3989 = vmatmul.mubr.bf16.gmra.mxu1 %v10571_v39  ;;  %7061 = vmatmul.mubr.bf16.gmra.mxu0 %v10613_v44  ;;  %v10695_v18 = vpack.c.bf16 %v3694_v48, %v3692_v61  ;;  %v7349_v4 = vld [vmem:[%s11598_s3 + $0x188] sm:$0xff]   ;;  %v12027_v36 = vld [vmem:[#allocation10_spill] sm:$0xff]  ;;  %v7353_v22 = vld [vmem:[%s11598_s3 + $0x180] sm:$0xff]  }
 0x2eb   : > { %3996 = vmatprep.mubr.bf16.mxu1 %v10615_v55  ;;  %4398 = vmatprep.mubr.bf16.mxu0 %v10158_v35  ;;  %v12026_v24 = vld [vmem:[#allocation61_spill] sm:$0xff]  ;;  %v12028_v61 = vld [vmem:[#allocation11_spill] sm:$0xff]  ;;  %v12029_v48 = vld [vmem:[#allocation36_spill] sm:$0xff] }
 0x2f2   : > { %3997 = vmatmul.mubr.bf16.gmra.mxu1 %v10605_v25  ;;  %4399 = vmatmul.mubr.bf16.vlgmr.msra.gmra.mxu0 %v10144_v2 }
 0x2f3   : > { %4004 = vmatprep.mubr.bf16.mxu1 %v10626_v47  ;;  %4406 = vmatprep.mubr.bf16.mxu0 %v10127_v50  ;;  %v7348_v50 = vld [vmem:[%s11598_s3 + $0x218] sm:$0xff]  }
 0x2f4   : > { %7113 = vmatpush3.bf16.msra.mxu0 %v10475_v34  ;;  %v7350_v34 = vld [vmem:[%s11598_s3 + $0x210] sm:$0xff]  }
 0x2f5   : > { %7114 = vmatprep.subr.bf16.mxu0 %v7336_v6 }
 0x2f8   : > { %7115 = vmatpush3.bf16.msra.mxu0 %v7336_v6  ;;  %v12030_v6 = vld [vmem:[#allocation17_spill] sm:$0xff] }
 0x2f9   : > { %7116 = vmatprep.subr.bf16.mxu0 %v7341_v43 }
 0x2fa   : > { %4005 = vmatmul.mubr.bf16.gmra.mxu1 %v10620_v12  ;;  %4407 = vmatmul.mubr.bf16.gmra.mxu0 %v10117_v15  ;;  %v7352_v15 = vld [vmem:[%s11598_s3 + $0x208] sm:$0xff]  }
 0x2fb   : > { %4012 = vmatprep.mubr.bf16.mxu1 %v10641_v56  ;;  %4414 = vmatprep.mubr.bf16.mxu0 %v10158_v35 }
 0x2fc   : > { %7117 = vmatpush3.bf16.msra.mxu0 %v7341_v43  ;;  %v12031_v43 = vld [vmem:[#allocation22_spill] sm:$0xff] }
 0x2fd   : > { %7118 = vmatprep.subr.bf16.mxu0 %v7346_v49 }
 0x300   : > { %7119 = vmatpush3.bf16.msra.mxu0 %v7346_v49  ;;  %v12032_v49 = vld [vmem:[#allocation26_spill] sm:$0xff] }
 0x301   : > { %7120 = vmatprep.subr.bf16.mxu0 %v7348_v50 }
 0x302   : > { %4013 = vmatmul.mubr.bf16.gmra.mxu1 %v10630_v26  ;;  %4415 = vmatmul.mubr.bf16.gmra.mxu0 %v10144_v2 }
 0x303   : > { %4020 = vmatprep.mubr.bf16.mxu1 %v10657_v59  ;;  %4422 = vmatprep.mubr.bf16.mxu0 %v10216_v5 }
 0x304   : > { %7121 = vmatpush3.bf16.msra.mxu0 %v7348_v50 }
 0x305   : > { %7122 = vmatprep.subr.bf16.mxu0 %v7350_v34 }
 0x308   : > { %7123 = vmatpush3.bf16.msra.mxu0 %v7350_v34 }
 0x309   : > { %7124 = vmatprep.subr.bf16.mxu0 %v7352_v15 }
 0x30a   : > { %4021 = vmatmul.mubr.bf16.gmra.mxu1 %v10639_v13  ;;  %4423 = vmatmul.mubr.bf16.gmra.mxu0 %v10219_v28 }
 0x30b   : > { %4028 = vmatprep.mubr.bf16.mxu1 %v10669_v60  ;;  %4430 = vmatprep.mubr.bf16.mxu0 %v10290_v29 }
 0x30c   : > { %7125 = vmatpush3.bf16.msra.mxu0 %v7352_v15 }
 0x30d   : > { %7126 = vmatprep.subr.bf16.mxu0 %v7354_v23 }
 0x310   : > { %7127 = vmatpush3.bf16.msra.mxu0 %v7354_v23 }
 0x312   : > { %4029 = vmatmul.mubr.bf16.gmra.mxu1 %v10652_v63  ;;  %4431 = vmatmul.mubr.bf16.gmra.mxu0 %v10296_v16 }
 0x313   : > { %4036 = vmatprep.mubr.bf16.mxu1 %v10674_v30  ;;  %4438 = vmatprep.mubr.bf16.mxu0 %v10356_v42 }
 0x31a   : > { %4037 = vmatmul.mubr.bf16.gmra.mxu1 %v10665_v27  ;;  %4439 = vmatmul.mubr.bf16.gmra.mxu0 %v10370_v38 }
 0x31b   : > { %4044 = vmatprep.mubr.bf16.mxu1 %v10689_v31  ;;  %4446 = vmatprep.mubr.bf16.mxu0 %v10432_v32 }
 0x322   : > { %4045 = vmatmul.mubr.bf16.gmra.mxu1 %v10679_v7  ;;  %4447 = vmatmul.mubr.bf16.gmra.mxu0 %v10441_v62 }
 0x323   : > { %4052 = vmatprep.mubr.bf16.mxu1 %v10695_v18  ;;  %4454 = vmatprep.mubr.bf16.mxu0 %v10503_v52 }
 0x32a   : > { %4053 = vmatmul.mubr.bf16.gmra.mxu1 %v10687_v46  ;;  %4455 = vmatmul.mubr.bf16.gmra.mxu0 %v10508_v20 }
 0x32b   : > { %4462 = vmatprep.mubr.bf16.mxu0 %v10565_v58  ;;  %7080 = vmatprep.mubr.bf16.mxu1 %v10125_v10 }
 0x332   : > { %4463 = vmatmul.mubr.bf16.gmra.mxu0 %v10571_v39  ;;  %7081 = vmatmul.mubr.bf16.vlgmr.msra.gmra.mxu1 %v10129_v37  ;;  %v7339_v37 = vld [vmem:[%s11598_s3 + $0x1e0] sm:$0xff]  }
 0x333   : > { %4470 = vmatprep.mubr.bf16.mxu0 %v10615_v55  ;;  %7084 = vmatprep.mubr.bf16.mxu1 %v10125_v10 }
 0x334   : > { %6737 = vmatpush3.bf16.msra.mxu1 %v7333_v21 }
 0x335   : > { %6738 = vmatprep.subr.bf16.mxu1 %v7334_v11 }
 0x338   : > { %6739 = vmatpush3.bf16.msra.mxu1 %v7335_v17 }
 0x339   : > { %6740 = vmatprep.subr.bf16.mxu1 %v7337_v54 }
 0x33a   : > { %4471 = vmatmul.mubr.bf16.gmra.mxu0 %v10605_v25  ;;  %7085 = vmatmul.mubr.bf16.gmra.mxu1 %v10187_v19 }
 0x33b   : > { %4478 = vmatprep.mubr.bf16.mxu0 %v10626_v47  ;;  %7088 = vmatprep.mubr.bf16.mxu1 %v10211_v8 }
 0x33c   : > { %6741 = vmatpush3.bf16.msra.mxu1 %v7338_v41 }
 0x33d   : > { %6742 = vmatprep.subr.bf16.mxu1 %v7339_v37 }
 0x340   : > { %6743 = vmatpush3.bf16.msra.mxu1 %v7340_v51 }
 0x341   : > { %6744 = vmatprep.subr.bf16.mxu1 %v7342_v45 }
 0x342   : > { %4479 = vmatmul.mubr.bf16.gmra.mxu0 %v10620_v12  ;;  %7089 = vmatmul.mubr.bf16.gmra.mxu1 %v10254_v0 }
 0x343   : > { %4486 = vmatprep.mubr.bf16.mxu0 %v10641_v56  ;;  %7092 = vmatprep.mubr.bf16.mxu1 %v10282_v53 }
 0x344   : > { %6745 = vmatpush3.bf16.msra.mxu1 %v7343_v40 }
 0x345   : > { %6746 = vmatprep.subr.bf16.mxu1 %v7344_v33 }
 0x348   : > { %6747 = vmatpush3.bf16.msra.mxu1 %v7345_v3 }
 0x349   : > { %6748 = vmatprep.subr.bf16.mxu1 %v7347_v9 }
 0x34a   : > { %4487 = vmatmul.mubr.bf16.gmra.mxu0 %v10630_v26  ;;  %7093 = vmatmul.mubr.bf16.gmra.mxu1 %v12026_v24 }
 0x34b   : > { %4494 = vmatprep.mubr.bf16.mxu0 %v10657_v59  ;;  %7096 = vmatprep.mubr.bf16.mxu1 %v12027_v36 }
 0x34c   : > { %6749 = vmatpush3.bf16.msra.mxu1 %v7349_v4 }
 0x34d   : > { %6750 = vmatprep.subr.bf16.mxu1 %v7351_v14 }
 0x350   : > { %6751 = vmatpush3.bf16.msra.mxu1 %v7353_v22 }
 0x352   : > { %4495 = vmatmul.mubr.bf16.gmra.mxu0 %v10639_v13  ;;  %7097 = vmatmul.mubr.bf16.gmra.mxu1 %v12028_v61 }
 0x353   : > { %4502 = vmatprep.mubr.bf16.mxu0 %v10669_v60  ;;  %7100 = vmatprep.mubr.bf16.mxu1 %v12029_v48 }
 0x35a   : > { %4503 = vmatmul.mubr.bf16.gmra.mxu0 %v10652_v63  ;;  %7101 = vmatmul.mubr.bf16.gmra.mxu1 %v12030_v6 }
 0x35b   : > { %4510 = vmatprep.mubr.bf16.mxu0 %v10674_v30  ;;  %7104 = vmatprep.mubr.bf16.mxu1 %v12031_v43 }
 0x362   : > { %4511 = vmatmul.mubr.bf16.gmra.mxu0 %v10665_v27  ;;  %7105 = vmatmul.mubr.bf16.gmra.mxu1 %v12032_v49 }
 0x363   : > { %4518 = vmatprep.mubr.bf16.mxu0 %v10689_v31  ;;  %7108 = vmatprep.mubr.bf16.mxu1 %v10560_v57 }
 0x36a   : > { %4519 = vmatmul.mubr.bf16.gmra.mxu0 %v10679_v7  ;;  %7109 = vmatmul.mubr.bf16.gmra.mxu1 %v10595_v1 }
 0x36b   : > { %4913 = vmatprep.mubr.bf16.mxu1 %v10158_v35  ;;  %7128 = vmatprep.mubr.bf16.mxu0 %v10125_v10 }
 0x371   : > { %v6480_v50 = vpop.f32.mrf.mxu1 }
 0x372   : > { %v7034_v34 = vpop.f32.mrf.mxu0  ;;  %4914 = vmatmul.mubr.bf16.vlgmr.msra.gmra.mxu1 %v10144_v2  ;;  %7129 = vmatmul.mubr.bf16.vlgmr.msra.gmra.mxu0 %v10187_v19 }
 0x373   : > { %4921 = vmatprep.mubr.bf16.mxu1 %v10216_v5  ;;  %7132 = vmatprep.mubr.bf16.mxu0 %v10211_v8  ;;  %v6481_v15 = vpop.f32.mrf.mxu1 }
 0x374   : > { %v4095_v23 = vpop.f32.mrf.mxu0  ;;  %v6482_v21 = vadd.f32 %v6481_v15, %v6480_v50 }
 0x375   : > { %v6483_v11 = vpop.f32.mrf.mxu1 }
 0x376   : > { %v7035_v17 = vpop.f32.mrf.mxu0  ;;  %v10834_v54 = vadd.f32 %v6482_v21, %v4095_v23 }
 0x377   : > { %v6484_v35 = vpop.f32.mrf.mxu1 }
 0x378   : > { %v4098_v41 = vpop.f32.mrf.mxu0  ;;  %v6485_v10 = vadd.f32 %v6484_v35, %v6483_v11 }
 0x379   : > { %v6486_v37 = vpop.f32.mrf.mxu1 }
 0x37a   : > { %v7038_v51 = vpop.f32.mrf.mxu0  ;;  %4922 = vmatmul.mubr.bf16.gmra.mxu1 %v10219_v28  ;;  %7133 = vmatmul.mubr.bf16.gmra.mxu0 %v10254_v0  ;;  %v10838_v2 = vadd.f32 %v6485_v10, %v4098_v41 }
 0x37b   : > { %4929 = vmatprep.mubr.bf16.mxu1 %v10290_v29  ;;  %7136 = vmatprep.mubr.bf16.mxu0 %v10282_v53  ;;  %v6487_v19 = vpop.f32.mrf.mxu1 }
 0x37c   : > { %v4111_v8 = vpop.f32.mrf.mxu0  ;;  %v6488_v5 = vadd.f32 %v6487_v19, %v6486_v37 }
 0x37d   : > { %v6489_v45 = vpop.f32.mrf.mxu1 }
 0x37e   : > { %v7039_v40 = vpop.f32.mrf.mxu0  ;;  %v10842_v33 = vadd.f32 %v7034_v34, %v6488_v5 }
 0x37f   : > { %v6490_v3 = vpop.f32.mrf.mxu1 }
 0x380   : > { %v4114_v9 = vpop.f32.mrf.mxu0  ;;  %v6491_v4 = vadd.f32 %v6490_v3, %v6489_v45 }
 0x381   : > { %v6492_v14 = vpop.f32.mrf.mxu1 }
 0x382   : > { %v7042_v28 = vpop.f32.mrf.mxu0  ;;  %4930 = vmatmul.mubr.bf16.gmra.mxu1 %v10296_v16  ;;  %7137 = vmatmul.mubr.bf16.gmra.mxu0 %v12026_v24  ;;  %v10846_v0 = vadd.f32 %v7035_v17, %v6491_v4 }
 0x383   : > { %4937 = vmatprep.mubr.bf16.mxu1 %v10356_v42  ;;  %7140 = vmatprep.mubr.bf16.mxu0 %v12027_v36  ;;  %v6493_v53 = vpop.f32.mrf.mxu1 }
 0x384   : > { %v4127_v29 = vpop.f32.mrf.mxu0  ;;  %v6494_v22 = vadd.f32 %v6493_v53, %v6492_v14 }
 0x385   : > { %v6495_v50 = vpop.f32.mrf.mxu1 }
 0x386   : > { %v7043_v34 = vpop.f32.mrf.mxu0  ;;  %v10850_v15 = vadd.f32 %v6494_v22, %v4111_v8 }
 0x387   : > { %v6496_v23 = vpop.f32.mrf.mxu1 }
 0x388   : > { %v4130_v21 = vpop.f32.mrf.mxu0  ;;  %v6497_v11 = vadd.f32 %v6496_v23, %v6495_v50 }
 0x389   : > { %v6498_v35 = vpop.f32.mrf.mxu1 }
 0x38a   : > { %v10852_v16 = vpop.f32.mrf.mxu0  ;;  %4938 = vmatmul.mubr.bf16.gmra.mxu1 %v10370_v38  ;;  %7141 = vmatmul.mubr.bf16.gmra.mxu0 %v12028_v61  ;;  %v10856_v42 = vadd.f32 %v6497_v11, %v4114_v9 }
 0x38b   : > { %4945 = vmatprep.mubr.bf16.mxu1 %v10432_v32  ;;  %7144 = vmatprep.mubr.bf16.mxu0 %v12029_v48  ;;  %v6499_v24 = vpop.f32.mrf.mxu1 }
 0x38c   : > { %v4143_v36 = vpop.f32.mrf.mxu0  ;;  %v6500_v17 = vadd.f32 %v6499_v24, %v6498_v35 }
 0x38d   : > { %v6501_v41 = vpop.f32.mrf.mxu1 }
 0x38e   : > { %v10860_v10 = vpop.f32.mrf.mxu0  ;;  %v10862_v37 = vadd.f32 %v7038_v51, %v6500_v17 }
 0x38f   : > { %v6502_v19 = vpop.f32.mrf.mxu1 }
 0x390   : > { %v4146_v8 = vpop.f32.mrf.mxu0  ;;  %v6503_v5 = vadd.f32 %v6502_v19, %v6501_v41 }
 0x392   : > { %v6504_v38 = vpop.f32.mrf.mxu1  ;;  %v10864_v45 = vpop.f32.mrf.mxu0  ;;  %4946 = vmatmul.mubr.bf16.gmra.mxu1 %v10441_v62  ;;  %7145 = vmatmul.mubr.bf16.gmra.mxu0 %v12030_v6  ;;  %v10868_v32 = vadd.f32 %v7039_v40, %v6503_v5 }
 0x393   : > { %4953 = vmatprep.mubr.bf16.mxu1 %v10503_v52  ;;  %7148 = vmatprep.mubr.bf16.mxu0 %v12031_v43 }
 0x394   : > { %v6505_v61 = vpop.f32.mrf.mxu1  ;;  %v10872_v48 = vpop.f32.mrf.mxu0 }
 0x395   : > { %v6506_v51 = vadd.f32 %v6505_v61, %v6504_v38 }
 0x396   : > { %v6507_v3 = vpop.f32.mrf.mxu1  ;;  %v10874_v9 = vpop.f32.mrf.mxu0 }
 0x397   : > { %v10876_v4 = vadd.f32 %v6506_v51, %v4127_v29 }
 0x398   : > { %v6508_v14 = vpop.f32.mrf.mxu1  ;;  %v10878_v53 = vpop.f32.mrf.mxu0 }
 0x399   : > { %v6509_v62 = vadd.f32 %v6508_v14, %v6507_v3 }
 0x39a   : > { %v6510_v6 = vpop.f32.mrf.mxu1  ;;  %v10880_v40 = vpop.f32.mrf.mxu0  ;;  %4954 = vmatmul.mubr.bf16.gmra.mxu1 %v10508_v20  ;;  %7149 = vmatmul.mubr.bf16.gmra.mxu0 %v12032_v49 }
 0x39b   : > { %v10884_v52 = vadd.f32 %v6509_v62, %v4130_v21  ;;  %4961 = vmatprep.mubr.bf16.mxu1 %v10565_v58  ;;  %7152 = vmatprep.mubr.bf16.mxu0 %v10560_v57 }
 0x39c   : > { %v6511_v43 = vpop.f32.mrf.mxu1  ;;  %v10888_v29 = vpop.f32.mrf.mxu0 }
 0x39d   : > { %v6512_v22 = vadd.f32 %v6511_v43, %v6510_v6 }
 0x39e   : > { %v6513_v50 = vpop.f32.mrf.mxu1  ;;  %v10890_v23 = vpop.f32.mrf.mxu0 }
 0x39f   : > { %v10892_v11 = vadd.f32 %v7042_v28, %v6512_v22 }
 0x3a0   : > { %v6514_v35 = vpop.f32.mrf.mxu1  ;;  %v10894_v24 = vpop.f32.mrf.mxu0 }
 0x3a1   : > { %v6515_v20 = vadd.f32 %v6514_v35, %v6513_v50 }
 0x3a2   : > { %v6516_v49 = vpop.f32.mrf.mxu1  ;;  %v10896_v21 = vpop.f32.mrf.mxu0  ;;  %4962 = vmatmul.mubr.bf16.gmra.mxu1 %v10571_v39  ;;  %7153 = vmatmul.mubr.bf16.gmra.mxu0 %v10595_v1 }
 0x3a3   : > { %v10900_v57 = vadd.f32 %v7043_v34, %v6515_v20  ;;  %4969 = vmatprep.mubr.bf16.mxu1 %v10615_v55  ;;  %7156 = vmatprep.mubr.bf16.mxu0 %v10613_v44 }
 0x3a4   : > { %v6517_v58 = vpop.f32.mrf.mxu1  ;;  %v10904_v28 = vpop.f32.mrf.mxu0 }
 0x3a5   : > { %v6518_v17 = vadd.f32 %v6517_v58, %v6516_v49 }
 0x3a6   : > { %v6519_v41 = vpop.f32.mrf.mxu1  ;;  %v10906_v19 = vpop.f32.mrf.mxu0 }
 0x3a7   : > { %v10908_v5 = vadd.f32 %v6518_v17, %v4143_v36 }
 0x3a8   : > { %v6520_v38 = vpop.f32.mrf.mxu1  ;;  %v10910_v61 = vpop.f32.mrf.mxu0 }
 0x3a9   : > { %v6521_v39 = vadd.f32 %v6520_v38, %v6519_v41 }
 0x3aa   : > { %v6522_v51 = vpop.f32.mrf.mxu1  ;;  %v10912_v34 = vpop.f32.mrf.mxu0  ;;  %4970 = vmatmul.mubr.bf16.gmra.mxu1 %v10605_v25  ;;  %7157 = vmatmul.mubr.bf16.gmra.mxu0 %v10595_v1 }
 0x3ab   : > { %v10916_v44 = vadd.f32 %v6521_v39, %v4146_v8  ;;  %4977 = vmatprep.mubr.bf16.mxu1 %v10626_v47 }
 0x3ac   : > { %v6523_v55 = vpop.f32.mrf.mxu1  ;;  %v10919_v3 = vpop.f32.mrf.mxu0 }
 0x3ad   : > { %v6524_v36 = vadd.f32 %v6523_v55, %v6522_v51 }
 0x3ae   : > { %v6525_v14 = vpop.f32.mrf.mxu1  ;;  %v10921_v62 = vpop.f32.mrf.mxu0 }
 0x3af   : > { %v10924_v6 = vadd.f32 %v10852_v16, %v6524_v36 }
 0x3b0   : > { %v6526_v43 = vpop.f32.mrf.mxu1  ;;  %v10926_v22 = vpop.f32.mrf.mxu0 }
 0x3b1   : > { %v6527_v25 = vadd.f32 %v6526_v43, %v6525_v14 }
 0x3b2   : > { %v6528_v50 = vpop.f32.mrf.mxu1  ;;  %v6616_v1 = vpop.f32.mrf.mxu0  ;;  %4978 = vmatmul.mubr.bf16.gmra.mxu1 %v10620_v12 }
 0x3b3   : > { %v10930_v47 = vadd.f32 %v10860_v10, %v6527_v25  ;;  %4985 = vmatprep.mubr.bf16.mxu1 %v10641_v56 }
 0x3b4   : > { %v6529_v8 = vpop.f32.mrf.mxu1  ;;  %v6617_v35 = vpop.f32.mrf.mxu0 }
 0x3b5   : > { %v6530_v20 = vadd.f32 %v6529_v8, %v6528_v50  ;;  %v6618_v49 = vadd.f32 %v6617_v35, %v6616_v1 }
 0x3b6   : > { %v6531_v58 = vpop.f32.mrf.mxu1  ;;  %v6619_v16 = vpop.f32.mrf.mxu0 }
 0x3b7   : > { %v10934_v17 = vadd.f32 %v6530_v20, %v10872_v48  ;;  %v10937_v41 = vadd.f32 %v6618_v49, %v10834_v54 }
 0x3b8   : > { %v6532_v38 = vpop.f32.mrf.mxu1  ;;  %v6620_v39 = vpop.f32.mrf.mxu0 }
 0x3b9   : > { %v6533_v12 = vadd.f32 %v6532_v38, %v6531_v58  ;;  %v6621_v51 = vadd.f32 %v6620_v39, %v6619_v16 }
 0x3ba   : > { %v6534_v10 = vpop.f32.mrf.mxu1  ;;  %v6622_v55 = vpop.f32.mrf.mxu0  ;;  %4986 = vmatmul.mubr.bf16.gmra.mxu1 %v10630_v26 }
 0x3bb   : > { %v10941_v56 = vadd.f32 %v6533_v12, %v10878_v53  ;;  %4993 = vmatprep.mubr.bf16.mxu1 %v10657_v59  ;;  %v10945_v36 = vadd.f32 %v6621_v51, %v10838_v2 }
 0x3bc   : > { %v6535_v48 = vpop.f32.mrf.mxu1  ;;  %v6623_v14 = vpop.f32.mrf.mxu0 }
 0x3bd   : > { %v6536_v54 = vadd.f32 %v6535_v48, %v6534_v10  ;;  %v6624_v43 = vadd.f32 %v6623_v14, %v6622_v55 }
 0x3be   : > { %v6537_v25 = vpop.f32.mrf.mxu1  ;;  %v6625_v50 = vpop.f32.mrf.mxu0 }
 0x3bf   : > { %v10948_v1 = vadd.f32 %v10864_v45, %v6536_v54  ;;  %v10951_v8 = vadd.f32 %v6624_v43, %v10842_v33 }
 0x3c0   : > { %v6538_v26 = vpop.f32.mrf.mxu1  ;;  %v6626_v53 = vpop.f32.mrf.mxu0 }
 0x3c1   : > { %v6539_v35 = vadd.f32 %v6538_v26, %v6537_v25  ;;  %v6627_v20 = vadd.f32 %v6626_v53, %v6625_v50 }
 0x3c2   : > { %v6540_v59 = vpop.f32.mrf.mxu1  ;;  %v6628_v49 = vpop.f32.mrf.mxu0  ;;  %4994 = vmatmul.mubr.bf16.gmra.mxu1 %v10639_v13 }
 0x3c3   : > { %v10955_v2 = vadd.f32 %v10874_v9, %v6539_v35  ;;  %5001 = vmatprep.mubr.bf16.mxu1 %v10669_v60  ;;  %v10959_v58 = vadd.f32 %v6627_v20, %v10846_v0 }
 0x3c4   : > { %v6541_v45 = vpop.f32.mrf.mxu1  ;;  %v6629_v16 = vpop.f32.mrf.mxu0 }
 0x3c5   : > { %v6542_v33 = vadd.f32 %v6541_v45, %v6540_v59  ;;  %v6630_v38 = vadd.f32 %v6629_v16, %v6628_v49 }
 0x3c6   : > { %v6543_v39 = vpop.f32.mrf.mxu1  ;;  %v6631_v12 = vpop.f32.mrf.mxu0 }
 0x3c7   : > { %v10962_v51 = vadd.f32 %v6542_v33, %v10888_v29  ;;  %v10965_v10 = vadd.f32 %v6630_v38, %v10850_v15 }
 0x3c8   : > { %v6544_v13 = vpop.f32.mrf.mxu1  ;;  %v6632_v9 = vpop.f32.mrf.mxu0 }
 0x3c9   : > { %v6545_v55 = vadd.f32 %v6544_v13, %v6543_v39  ;;  %v6633_v48 = vadd.f32 %v6632_v9, %v6631_v12 }
 0x3ca   : > { %v6546_v60 = vpop.f32.mrf.mxu1  ;;  %v6634_v14 = vpop.f32.mrf.mxu0  ;;  %5002 = vmatmul.mubr.bf16.gmra.mxu1 %v10652_v63 }
 0x3cb   : > { %v10969_v0 = vadd.f32 %v6545_v55, %v10894_v24  ;;  %5009 = vmatprep.mubr.bf16.mxu1 %v10674_v30  ;;  %v10973_v54 = vadd.f32 %v6633_v48, %v10856_v42 }
 0x3cc   : > { %v6547_v29 = vpop.f32.mrf.mxu1  ;;  %v6635_v43 = vpop.f32.mrf.mxu0 }
 0x3cd   : > { %v6548_v15 = vadd.f32 %v6547_v29, %v6546_v60  ;;  %v6636_v25 = vadd.f32 %v6635_v43, %v6634_v14 }
 0x3ce   : > { %v6549_v50 = vpop.f32.mrf.mxu1  ;;  %v6637_v26 = vpop.f32.mrf.mxu0 }
 0x3cf   : > { %v10976_v53 = vadd.f32 %v10880_v40, %v6548_v15  ;;  %v10979_v35 = vadd.f32 %v6636_v25, %v10862_v37 }
 0x3d0   : > { %v6550_v63 = vpop.f32.mrf.mxu1  ;;  %v6638_v24 = vpop.f32.mrf.mxu0 }
 0x3d1   : > { %v6551_v20 = vadd.f32 %v6550_v63, %v6549_v50  ;;  %v6639_v59 = vadd.f32 %v6638_v24, %v6637_v26 }
 0x3d2   : > { %v6552_v30 = vpop.f32.mrf.mxu1  ;;  %v6640_v49 = vpop.f32.mrf.mxu0  ;;  %5010 = vmatmul.mubr.bf16.gmra.mxu1 %v10665_v27 }
 0x3d3   : > { %v10983_v42 = vadd.f32 %v10890_v23, %v6551_v20  ;;  %5017 = vmatprep.mubr.bf16.mxu1 %v10689_v31  ;;  %v10987_v45 = vadd.f32 %v6639_v59, %v10868_v32 }
 0x3d4   : > { %v6553_v40 = vpop.f32.mrf.mxu1  ;;  %v6641_v16 = vpop.f32.mrf.mxu0 }
 0x3d5   : > { %v6554_v37 = vadd.f32 %v6553_v40, %v6552_v30  ;;  %v6642_v33 = vadd.f32 %v6641_v16, %v6640_v49 }
 0x3d6   : > { %v6555_v38 = vpop.f32.mrf.mxu1  ;;  %v6643_v39 = vpop.f32.mrf.mxu0 }
 0x3d7   : > { %v10990_v12 = vadd.f32 %v6554_v37, %v10904_v28  ;;  %v10993_v13 = vadd.f32 %v6642_v33, %v10876_v4 }
 0x3d8   : > { %v6556_v27 = vpop.f32.mrf.mxu1  ;;  %v6644_v23 = vpop.f32.mrf.mxu0 }
 0x3d9   : > { %v6557_v9 = vadd.f32 %v6556_v27, %v6555_v38  ;;  %v6645_v55 = vadd.f32 %v6644_v23, %v6643_v39 }
 0x3da   : > { %v6558_v48 = vpop.f32.mrf.mxu1  ;;  %v6646_v60 = vpop.f32.mrf.mxu0  ;;  %5018 = vmatmul.mubr.bf16.gmra.mxu1 %v10679_v7 }
 0x3db   : > { %v10997_v32 = vadd.f32 %v6557_v9, %v10910_v61  ;;  %5025 = vmatprep.mubr.bf16.mxu1 %v10695_v18  ;;  %v11001_v14 = vadd.f32 %v6645_v55, %v10884_v52 }
 0x3dc   : > { %v6559_v28 = vpop.f32.mrf.mxu1  ;;  %v6647_v29 = vpop.f32.mrf.mxu0 }
 0x3dd   : > { %v6560_v4 = vadd.f32 %v6559_v28, %v6558_v48  ;;  %v6648_v43 = vadd.f32 %v6647_v29, %v6646_v60 }
 0x3de   : > { %v6561_v15 = vpop.f32.mrf.mxu1  ;;  %v6649_v25 = vpop.f32.mrf.mxu0 }
 0x3df   : > { %v11004_v50 = vadd.f32 %v10896_v21, %v6560_v4  ;;  %v11007_v26 = vadd.f32 %v6648_v43, %v10892_v11 }
 0x3e0   : > { %v6562_v63 = vpop.f32.mrf.mxu1  ;;  %v6650_v61 = vpop.f32.mrf.mxu0 }
 0x3e1   : > { %v6563_v24 = vadd.f32 %v6562_v63, %v6561_v15  ;;  %v6651_v20 = vadd.f32 %v6650_v61, %v6649_v25 }
 0x3e2   : > { %v6564_v18 = vpop.f32.mrf.mxu1  ;;  %v6652_v59 = vpop.f32.mrf.mxu0  ;;  %5026 = vmatmul.mubr.bf16.gmra.mxu1 %v10687_v46 }
 0x3e3   : > { %v11011_v52 = vadd.f32 %v10906_v19, %v6563_v24  ;;  %5033 = vmatprep.mubr.bf16.mxu1 %v10689_v31  ;;  %v11015_v30 = vadd.f32 %v6651_v20, %v10900_v57 }
 0x3e4   : > { %v6565_v21 = vpop.f32.mrf.mxu1  ;;  %v6653_v49 = vpop.f32.mrf.mxu0 }
 0x3e5   : > { %v6566_v11 = vadd.f32 %v6565_v21, %v6564_v18  ;;  %v6654_v40 = vadd.f32 %v6653_v49, %v6652_v59 }
 0x3e6   : > { %v6567_v16 = vpop.f32.mrf.mxu1  ;;  %v6655_v37 = vpop.f32.mrf.mxu0 }
 0x3e7   : > { %v11018_v33 = vadd.f32 %v6566_v11, %v10919_v3  ;;  %v11021_v38 = vadd.f32 %v6654_v40, %v10908_v5 }
 0x3e8   : > { %v6568_v46 = vpop.f32.mrf.mxu1  ;;  %v6656_v19 = vpop.f32.mrf.mxu0 }
 0x3e9   : > { %v6569_v39 = vadd.f32 %v6568_v46, %v6567_v16  ;;  %v6657_v27 = vadd.f32 %v6656_v19, %v6655_v37 }
 0x3ea   : > { %v6570_v31 = vpop.f32.mrf.mxu1  ;;  %v6658_v23 = vpop.f32.mrf.mxu0  ;;  %5034 = vmatmul.mubr.bf16.gmra.mxu1 %v10679_v7 }
 0x3eb   : > { %v11025_v57 = vadd.f32 %v6569_v39, %v10926_v22  ;;  %v11028_v9 = vadd.f32 %v6657_v27, %v10916_v44 }
 0x3ec   : > { %v6571_v55 = vpop.f32.mrf.mxu1  ;;  %v6659_v3 = vpop.f32.mrf.mxu0 }
 0x3ed   : > { %v11030_v48 = vadd.f32 %v6571_v55, %v6570_v31  ;;  %v6660_v5 = vadd.f32 %v6659_v3, %v6658_v23 }
 0x3ee   : > { %v6573_v60 = vpop.f32.mrf.mxu1  ;;  %v6661_v28 = vpop.f32.mrf.mxu0 }
 0x3ef   : > { %v4457_v29 = vadd.f32 %v6660_v5, %v10924_v6 }
 0x3f0   : > { %v6574_v4 = vpop.f32.mrf.mxu1  ;;  %v6662_v43 = vpop.f32.mrf.mxu0 }
 0x3f1   : > { %v11033_v15 = vadd.f32 %v6574_v4, %v6573_v60  ;;  %v6663_v7 = vadd.f32 %v6662_v43, %v6661_v28 }
 0x3f2   : > { %v6664_v25 = vpop.f32.mrf.mxu0  ;;  %v7082_v22 = vpop.f32.mrf.mxu1 }
 0x3f3   : > { %v11036_v63 = vadd.f32 %v7082_v22, %v10951_v8  ;;  %v4460_v44 = vadd.f32 %v6663_v7, %v10930_v47 }
 0x3f4   : > { %v6665_v61 = vpop.f32.mrf.mxu0  ;;  %v4561_v24 = vpop.f32.mrf.mxu1 }
 0x3f5   : > { %v6666_v20 = vadd.f32 %v6665_v61, %v6664_v25  ;;  %v11040_v18 = vadd.f32 %v4561_v24, %v10937_v41 }
 0x3f6   : > { %v6667_v59 = vpop.f32.mrf.mxu0  ;;  %v7083_v6 = vpop.f32.mrf.mxu1 }
 0x3f7   : > { %v11043_v21 = vadd.f32 %v7083_v6, %v10959_v58  ;;  %v4465_v49 = vadd.f32 %v6666_v20, %v10934_v17 }
 0x3f8   : > { %v6668_v11 = vpop.f32.mrf.mxu0  ;;  %v4564_v40 = vpop.f32.mrf.mxu1 }
 0x3f9   : > { %v6669_v16 = vadd.f32 %v6668_v11, %v6667_v59  ;;  %v11047_v8 = vadd.f32 %v4564_v40, %v10945_v36 }
 0x3fa   : > { %v6670_v47 = vpop.f32.mrf.mxu0  ;;  %v7086_v37 = vpop.f32.mrf.mxu1 }
 0x3fb   : > { %v11050_v46 = vadd.f32 %v7086_v37, %v10979_v35  ;;  %v4468_v41 = vadd.f32 %v6669_v16, %v10941_v56 }
 0x3fc   : > { %v6671_v19 = vpop.f32.mrf.mxu0  ;;  %v4577_v39 = vpop.f32.mrf.mxu1 }
 0x3fd   : > { %v6672_v27 = vadd.f32 %v6671_v19, %v6670_v47  ;;  %v11054_v58 = vadd.f32 %v4577_v39, %v10965_v10 }
 0x3fe   : > { %v6673_v17 = vpop.f32.mrf.mxu0  ;;  %v7087_v31 = vpop.f32.mrf.mxu1 }
 0x3ff   : > { %v11057_v23 = vadd.f32 %v7087_v31, %v10987_v45  ;;  %v4473_v36 = vadd.f32 %v6672_v27, %v10948_v1 }
 0x400   : > { %v6674_v55 = vpop.f32.mrf.mxu0  ;;  %v4580_v3 = vpop.f32.mrf.mxu1 }
 0x401   : > { %v6675_v5 = vadd.f32 %v6674_v55, %v6673_v17  ;;  %v11061_v35 = vadd.f32 %v4580_v3, %v10973_v54 }
 0x402   : > { %v6676_v56 = vpop.f32.mrf.mxu0  ;;  %v7090_v60 = vpop.f32.mrf.mxu1 }
 0x403   : > { %v11064_v28 = vadd.f32 %v7090_v60, %v11007_v26  ;;  %v4476_v10 = vadd.f32 %v6675_v5, %v10955_v2 }
 0x404   : > { %v6677_v4 = vpop.f32.mrf.mxu0  ;;  %v4593_v43 = vpop.f32.mrf.mxu1 }
 0x405   : > { %v6678_v7 = vadd.f32 %v6677_v4, %v6676_v56  ;;  %v11068_v45 = vadd.f32 %v4593_v43, %v10993_v13 }
 0x406   : > { %v6679_v1 = vpop.f32.mrf.mxu0  ;;  %v7091_v25 = vpop.f32.mrf.mxu1 }
 0x407   : > { %v11071_v22 = vadd.f32 %v7091_v25, %v11015_v30  ;;  %v4481_v54 = vadd.f32 %v6678_v7, %v10962_v51 }
 0x408   : > { %v6680_v61 = vpop.f32.mrf.mxu0  ;;  %v4596_v24 = vpop.f32.mrf.mxu1 }
 0x409   : > { %v6681_v20 = vadd.f32 %v6680_v61, %v6679_v1  ;;  %v11075_v26 = vadd.f32 %v4596_v24, %v11001_v14 }
 0x40a   : > { %v6682_v2 = vpop.f32.mrf.mxu0  ;;  %v7094_v59 = vpop.f32.mrf.mxu1 }
 0x40b   : > { %v11077_v6 = vadd.f32 %v7094_v59, %v4457_v29  ;;  %v4484_v13 = vadd.f32 %v6681_v20, %v10969_v0 }
 0x40c   : > { %v6683_v11 = vpop.f32.mrf.mxu0  ;;  %v4609_v40 = vpop.f32.mrf.mxu1 }
 0x40d   : > { %v6684_v16 = vadd.f32 %v6683_v11, %v6682_v2  ;;  %v11081_v30 = vadd.f32 %v4609_v40, %v11021_v38 }
 0x40e   : > { %v6685_v47 = vpop.f32.mrf.mxu0  ;;  %v7095_v51 = vpop.f32.mrf.mxu1 }
 0x40f   : > { %v11083_v37 = vadd.f32 %v7095_v51, %v4460_v44  ;;  %v4489_v19 = vadd.f32 %v6684_v16, %v10976_v53 }
 0x410   : > { %v6686_v14 = vpop.f32.mrf.mxu0  ;;  %v4612_v39 = vpop.f32.mrf.mxu1 }
 0x411   : > { %v6687_v27 = vadd.f32 %v6686_v14, %v6685_v47  ;;  %v11087_v29 = vadd.f32 %v4612_v39, %v11028_v9 }
 0x412   : > { %v6688_v17 = vpop.f32.mrf.mxu0  ;;  %v7098_v0 = vpop.f32.mrf.mxu1 }
 0x413   : > { %v11089_v31 = vadd.f32 %v7098_v0, %v4473_v36  ;;  %v4492_v55 = vadd.f32 %v6687_v27, %v10983_v42 }
 0x414   : > { %v6689_v38 = vpop.f32.mrf.mxu0  ;;  %v4625_v3 = vpop.f32.mrf.mxu1 }
 0x415   : > { %v6690_v5 = vadd.f32 %v6689_v38, %v6688_v17  ;;  %v11092_v56 = vadd.f32 %v4625_v3, %v4465_v49 }
 0x416   : > { %v6691_v44 = vpop.f32.mrf.mxu0  ;;  %v7099_v60 = vpop.f32.mrf.mxu1 }
 0x417   : > { %v11094_v53 = vadd.f32 %v7099_v60, %v4476_v10  ;;  %v4497_v4 = vadd.f32 %v6690_v5, %v10990_v12 }
 0x418   : > { %v6692_v43 = vpop.f32.mrf.mxu0  ;;  %v4628_v9 = vpop.f32.mrf.mxu1 }
 0x419   : > { %v6693_v7 = vadd.f32 %v6692_v43, %v6691_v44  ;;  %v11097_v1 = vadd.f32 %v4628_v9, %v4468_v41 }
 0x41a   : > { %v6694_v36 = vpop.f32.mrf.mxu0  ;;  %v7102_v25 = vpop.f32.mrf.mxu1 }
 0x41b   : > { %v11099_v61 = vadd.f32 %v7102_v25, %v4489_v19  ;;  %v4500_v42 = vadd.f32 %v6693_v7, %v10997_v32 }
 0x41c   : > { %v6695_v24 = vpop.f32.mrf.mxu0  ;;  %v4641_v49 = vpop.f32.mrf.mxu1 }
 0x41d   : > { %12033 = vst [vmem:[#allocation39_spill] sm:$0xff] %v11099_v61  ;;  %v6696_v20 = vadd.f32 %v6695_v24, %v6694_v36  ;;  %v11102_v2 = vadd.f32 %v4641_v49, %v4481_v54 }
 0x41e   : > { %v6697_v10 = vpop.f32.mrf.mxu0  ;;  %v7103_v59 = vpop.f32.mrf.mxu1 }
 0x41f   : > { %12034 = vst [vmem:[#allocation29_spill] sm:$0xff] %v11102_v2  ;;  %v11104_v11 = vadd.f32 %v7103_v59, %v4492_v55  ;;  %v4505_v12 = vadd.f32 %v6696_v20, %v11004_v50 }
 0x420   : > { %v6698_v40 = vpop.f32.mrf.mxu0  ;;  %v4644_v41 = vpop.f32.mrf.mxu1 }
 0x421   : > { %12035 = vst [vmem:[#allocation45_spill] sm:$0xff] %v11104_v11  ;;  %v6699_v16 = vadd.f32 %v6698_v40, %v6697_v10  ;;  %v11107_v47 = vadd.f32 %v4644_v41, %v4484_v13 }
 0x422   : > { %v6700_v51 = vpop.f32.mrf.mxu0  ;;  %v7106_v19 = vpop.f32.mrf.mxu1 }
 0x423   : > { %12036 = vst [vmem:[#allocation50_spill] sm:$0xff] %v11107_v47  ;;  %v11109_v14 = vadd.f32 %v7106_v19, %v4505_v12  ;;  %v4508_v32 = vadd.f32 %v6699_v16, %v11011_v52 }
 0x424   : > { %v6701_v39 = vpop.f32.mrf.mxu0  ;;  %v4657_v54 = vpop.f32.mrf.mxu1 }
 0x425   : > { %12037 = vst [vmem:[#allocation8_spill] sm:$0xff] %v11109_v14  ;;  %v6702_v27 = vadd.f32 %v6701_v39, %v6700_v51  ;;  %v11112_v17 = vadd.f32 %v4657_v54, %v4497_v4  ;;  %v4216_v4 = vadd.f32 %v10912_v34, %v11030_v48 }
 0x426   : > { %v6703_v0 = vpop.f32.mrf.mxu0  ;;  %v7107_v55 = vpop.f32.mrf.mxu1 }
 0x427   : > { %12038 = vst [vmem:[#allocation52_spill] sm:$0xff] %v11112_v17  ;;  %v11114_v38 = vadd.f32 %v7107_v55, %v4508_v32  ;;  %v4513_v50 = vadd.f32 %v6702_v27, %v11018_v33 }
 0x428   : > { %v6704_v3 = vpop.f32.mrf.mxu0  ;;  %v4660_v13 = vpop.f32.mrf.mxu1 }
 0x429   : > { %12039 = vst [vmem:[#allocation9_spill] sm:$0xff] %v11114_v38  ;;  %v6705_v5 = vadd.f32 %v6704_v3, %v6703_v0  ;;  %v11117_v44 = vadd.f32 %v4660_v13, %v4500_v42  ;;  %v4219_v42 = vadd.f32 %v10921_v62, %v11033_v15 }
 0x42a   : > { %v6706_v60 = vpop.f32.mrf.mxu0  ;;  %v7110_v43 = vpop.f32.mrf.mxu1 }
 0x42b   : > { %12040 = vst [vmem:[#allocation53_spill] sm:$0xff] %v11117_v44  ;;  %v4516_v52 = vadd.f32 %v6705_v5, %v11025_v57 }
 0x42c   : > { %v6707_v9 = vpop.f32.mrf.mxu0  ;;  %v4673_v7 = vpop.f32.mrf.mxu1 }
 0x42d   : > { %v6708_v36 = vadd.f32 %v6707_v9, %v6706_v60  ;;  %v11122_v25 = vadd.f32 %v4673_v7, %v4513_v50 }
 0x42e   : > { %v6709_v24 = vpop.f32.mrf.mxu0  ;;  %v7111_v49 = vpop.f32.mrf.mxu1 }
 0x42f   : > { %12041 = vst [vmem:[#allocation63_spill] sm:$0xff] %v11122_v25  ;;  %v4521_v33 = vadd.f32 %v6708_v36, %v4216_v4 }
 0x430   : > { %v6710_v20 = vpop.f32.mrf.mxu0  ;;  %v4676_v10 = vpop.f32.mrf.mxu1 }
 0x431   : > { %v11126_v59 = vadd.f32 %v7110_v43, %v4521_v33  ;;  %v6711_v12 = vadd.f32 %v6710_v20, %v6709_v24  ;;  %v11128_v57 = vadd.f32 %v4676_v10, %v4516_v52 }
 0x432   : > { %v6752_v40 = vpop.f32.mrf.mxu1  ;;  %v7130_v41 = vpop.f32.mrf.mxu0 }
 0x433   : > { %12042 = vst [vmem:[#allocation13_spill] sm:$0xff] %v11126_v59  ;;  %12043 = vst [vmem:[#allocation20_spill] sm:$0xff] %v11128_v57  ;;  %v4524_v16 = vadd.f32 %v6711_v12, %v4219_v42 }
 0x434   : > { %v6753_v34 = vpop.f32.mrf.mxu1  ;;  %v5076_v48 = vpop.f32.mrf.mxu0 }
 0x435   : > { %v11130_v51 = vadd.f32 %v7111_v49, %v4524_v16  ;;  %v6754_v19 = vadd.f32 %v6753_v34, %v6752_v40 }
 0x436   : > { %v6755_v32 = vpop.f32.mrf.mxu1  ;;  %v7131_v39 = vpop.f32.mrf.mxu0 }
 0x437   : > { %12044 = vst [vmem:[#allocation15_spill] sm:$0xff] %v11130_v51  ;;  %v5077_v54 = vadd.f32 %v6754_v19, %v5076_v48 }
 0x438   : > { %v6756_v27 = vpop.f32.mrf.mxu1  ;;  %v5079_v62 = vpop.f32.mrf.mxu0 }
 0x439   : > { %v11133_v0 = vadd.f32 %v5077_v54, %v11040_v18  ;;  %v6757_v16 = vadd.f32 %v6756_v27, %v6755_v32 }
 0x43a   : > { %v6758_v15 = vpop.f32.mrf.mxu1  ;;  %v7134_v50 = vpop.f32.mrf.mxu0 }
 0x43b   : > { %v5080_v51 = vadd.f32 %v6757_v16, %v5079_v62 }
 0x43c   : > { %v6759_v55 = vpop.f32.mrf.mxu1  ;;  %v5092_v5 = vpop.f32.mrf.mxu0 }
 0x43d   : > { %v6760_v54 = vadd.f32 %v6759_v55, %v6758_v15  ;;  %v11142_v17 = vadd.f32 %v5080_v51, %v11047_v8 }
 0x43e   : > { %v6761_v3 = vpop.f32.mrf.mxu1  ;;  %v7135_v52 = vpop.f32.mrf.mxu0 }
 0x43f   : > { %v5085_v14 = vadd.f32 %v7130_v41, %v6760_v54  ;;  %v5273_v55 = vmul.f32 %v11142_v17, %v11142_v17 }
 0x440   : > { %v6762_v13 = vpop.f32.mrf.mxu1  ;;  %v5095_v4 = vpop.f32.mrf.mxu0 }
 0x441   : > { %v6763_v57 = vadd.f32 %v6762_v13, %v6761_v3  ;;  %v11145_v27 = vadd.f32 %v5085_v14, %v11036_v63 }
 0x442   : > { %v6764_v60 = vpop.f32.mrf.mxu1  ;;  %v11135_v49 = vpop.f32.mrf.mxu0 }
 0x443   : > { %v5088_v61 = vadd.f32 %v7131_v39, %v6763_v57  ;;  %v5272_v57 = vmul.f32 %v11133_v0, %v11133_v0  ;;  %v5274_v63 = vmul.f32 %v11145_v27, %v11145_v27 }
 0x444   : > { %v6765_v43 = vpop.f32.mrf.mxu1  ;;  %v5108_v20 = vpop.f32.mrf.mxu0 }
 0x445   : > { %v6766_v44 = vadd.f32 %v6765_v43, %v6764_v60  ;;  %v11150_v41 = vadd.f32 %v5088_v61, %v11043_v21  ;;  %v5235_v21 = vadd.f32 %v11142_v17, %v11133_v0  ;;  %v5304_v61 = vadd.f32 %v5273_v55, %v5272_v57 }
 0x446   : > { %v6767_v9 = vpop.f32.mrf.mxu1  ;;  %v11137_v12 = vpop.f32.mrf.mxu0 }
 0x447   : > { %v5093_v15 = vadd.f32 %v6766_v44, %v5092_v5  ;;  %v5275_v60 = vmul.f32 %v11150_v41, %v11150_v41 }
 0x448   : > { %v6768_v7 = vpop.f32.mrf.mxu1  ;;  %v5111_v48 = vpop.f32.mrf.mxu0 }
 0x449   : > { %v6769_v47 = vadd.f32 %v6768_v7, %v6767_v9  ;;  %v11159_v14 = vadd.f32 %v5093_v15, %v11054_v58 }
 0x44a   : > { %v6770_v36 = vpop.f32.mrf.mxu1  ;;  %v11139_v25 = vpop.f32.mrf.mxu0 }
 0x44b   : > { %v5096_v13 = vadd.f32 %v6769_v47, %v5095_v4  ;;  %v5236_v4 = vadd.f32 %v5235_v21, %v11145_v27 }
 0x44c   : > { %v6771_v24 = vpop.f32.mrf.mxu1  ;;  %v5124_v2 = vpop.f32.mrf.mxu0 }
 0x44d   : > { %v6772_v62 = vadd.f32 %v6771_v24, %v6770_v36  ;;  %v11166_v43 = vadd.f32 %v5096_v13, %v11061_v35  ;;  %v5305_v24 = vadd.f32 %v5304_v61, %v5274_v63 }
 0x44e   : > { %v6773_v33 = vpop.f32.mrf.mxu1  ;;  %v11154_v51 = vpop.f32.mrf.mxu0 }
 0x44f   : > { %v5101_v44 = vadd.f32 %v7134_v50, %v6772_v62  ;;  %v5276_v50 = vmul.f32 %v11159_v14, %v11159_v14  ;;  %v5306_v35 = vadd.f32 %v5305_v24, %v5275_v60 }
 0x450   : > { %v6774_v18 = vpop.f32.mrf.mxu1  ;;  %v5127_v36 = vpop.f32.mrf.mxu0 }
 0x451   : > { %v6775_v8 = vadd.f32 %v6774_v18, %v6773_v33  ;;  %v11172_v33 = vadd.f32 %v5101_v44, %v11050_v46  ;;  %v5307_v55 = vadd.f32 %v5306_v35, %v5276_v50 }
 0x452   : > { %v6776_v10 = vpop.f32.mrf.mxu1  ;;  %v11180_v54 = vpop.f32.mrf.mxu0 }
 0x453   : > { %v5104_v9 = vadd.f32 %v7135_v52, %v6775_v8  ;;  %v5277_v52 = vmul.f32 %v11166_v43, %v11166_v43 }
 0x454   : > { %v6777_v42 = vpop.f32.mrf.mxu1  ;;  %v5140_v57 = vpop.f32.mrf.mxu0 }
 0x455   : > { %v6778_v5 = vadd.f32 %v6777_v42, %v6776_v10  ;;  %v5237_v10 = vadd.f32 %v5236_v4, %v11150_v41 }
 0x456   : > { %v6779_v40 = vpop.f32.mrf.mxu1 }
 0x457   : > { %v5109_v18 = vadd.f32 %v6778_v5, %v5108_v20  ;;  %v5238_v46 = vadd.f32 %v5237_v10, %v11159_v14  ;;  %v5278_v20 = vmul.f32 %v11172_v33, %v11172_v33 }
 0x458   : > { %v6780_v34 = vpop.f32.mrf.mxu1 }
 0x459   : > { %v6781_v7 = vadd.f32 %v6780_v34, %v6779_v40  ;;  %v11178_v40 = vadd.f32 %v5104_v9, %v11057_v23  ;;  %v5239_v23 = vadd.f32 %v5238_v46, %v11166_v43 }
 0x45a   : > { %v6782_v19 = vpop.f32.mrf.mxu1 }
 0x45b   : > { %v5112_v34 = vadd.f32 %v6781_v7, %v5111_v48  ;;  %v5308_v48 = vadd.f32 %v5307_v55, %v5277_v52 }
 0x45c   : > { %v6783_v59 = vpop.f32.mrf.mxu1 }
 0x45d   : > { %v6784_v42 = vadd.f32 %v6783_v59, %v6782_v19  ;;  %v11186_v59 = vadd.f32 %v5109_v18, %v11068_v45  ;;  %v5240_v45 = vadd.f32 %v5239_v23, %v11172_v33  ;;  %v5309_v21 = vadd.f32 %v5308_v48, %v5278_v20 }
 0x45e   : > { %v6785_v38 = vpop.f32.mrf.mxu1 }
 0x45f   : > { %v5117_v19 = vadd.f32 %v11135_v49, %v6784_v42  ;;  %v5280_v49 = vmul.f32 %v11186_v59, %v11186_v59 }
 0x460   : > { %v6786_v11 = vpop.f32.mrf.mxu1 }
 0x461   : > { %v6787_v15 = vadd.f32 %v6786_v11, %v6785_v38  ;;  %v5279_v11 = vmul.f32 %v11178_v40, %v11178_v40  ;;  %v11193_v38 = vadd.f32 %v5112_v34, %v11075_v26  ;;  %v5241_v26 = vadd.f32 %v5240_v45, %v11178_v40 }
 0x462   : > { %v6788_v32 = vpop.f32.mrf.mxu1 }
 0x463   : > { %v5120_v63 = vadd.f32 %v11137_v12, %v6787_v15  ;;  %v5310_v9 = vadd.f32 %v5309_v21, %v5279_v11  ;;  %v5281_v12 = vmul.f32 %v11193_v38, %v11193_v38  ;;  %v5242_v50 = vadd.f32 %v5241_v26, %v11186_v59 }
 0x464   : > { %v6789_v3 = vpop.f32.mrf.mxu1 }
 0x465   : > { %v6790_v13 = vadd.f32 %v6789_v3, %v6788_v32  ;;  %v11200_v32 = vadd.f32 %v5117_v19, %v11064_v28  ;;  %v5311_v28 = vadd.f32 %v5310_v9, %v5280_v49 }
 0x466   : > { %v6791_v39 = vpop.f32.mrf.mxu1 }
 0x467   : > { %v5125_v3 = vadd.f32 %v6790_v13, %v5124_v2  ;;  %v5282_v2 = vmul.f32 %v11200_v32, %v11200_v32 }
 0x468   : > { %v6792_v47 = vpop.f32.mrf.mxu1 }
 0x469   : > { %v6793_v44 = vadd.f32 %v6792_v47, %v6791_v39  ;;  %v7147_v39 = vpop.f32.mrf.mxu0  ;;  %v11206_v47 = vadd.f32 %v5120_v63, %v11071_v22  ;;  %v5312_v22 = vadd.f32 %v5311_v28, %v5281_v12 }
 0x46a   : > { %v6794_v58 = vpop.f32.mrf.mxu1 }
 0x46b   : > { %v5128_v7 = vadd.f32 %v6793_v44, %v5127_v36  ;;  %v5143_v35 = vpop.f32.mrf.mxu0  ;;  %v5283_v36 = vmul.f32 %v11206_v47, %v11206_v47  ;;  %v5313_v46 = vadd.f32 %v5312_v22, %v5282_v2 }
 0x46c   : > { %v6795_v16 = vpop.f32.mrf.mxu1 }
 0x46d   : > { %v6796_v61 = vadd.f32 %v6795_v16, %v6794_v58  ;;  %v11212_v58 = vadd.f32 %v5125_v3, %v11081_v30  ;;  %v5243_v16 = vadd.f32 %v5242_v50, %v11193_v38  ;;  %v11219_v52 = vadd.f32 %v5128_v7, %v11087_v29  ;;  %v7150_v29 = vpop.f32.mrf.mxu0 }
 0x46e   : > { %v6797_v62 = vpop.f32.mrf.mxu1  ;;  %v5314_v23 = vadd.f32 %v5313_v46, %v5283_v36 }
 0x46f   : > { %v5133_v18 = vadd.f32 %v11139_v25, %v6796_v61  ;;  %v5244_v30 = vadd.f32 %v5243_v16, %v11200_v32  ;;  %v5284_v25 = vmul.f32 %v11212_v58, %v11212_v58  ;;  %v5156_v61 = vpop.f32.mrf.mxu0 }
 0x470   : > { %v6798_v8 = vpop.f32.mrf.mxu1 }
 0x471   : > { %v6799_v4 = vadd.f32 %v6798_v8, %v6797_v62  ;;  %v11226_v55 = vadd.f32 %v5133_v18, %v11077_v6  ;;  %v5245_v13 = vadd.f32 %v5244_v30, %v11206_v47  ;;  %v7151_v2 = vpop.f32.mrf.mxu0 }
 0x472   : > { %v6800_v5 = vpop.f32.mrf.mxu1 }
 0x473   : > { %v5136_v34 = vadd.f32 %v11154_v51, %v6799_v4  ;;  %v5285_v51 = vmul.f32 %v11219_v52, %v11219_v52  ;;  %v5246_v44 = vadd.f32 %v5245_v13, %v11212_v58  ;;  %v5286_v6 = vmul.f32 %v11226_v55, %v11226_v55  ;;  %v5159_v30 = vpop.f32.mrf.mxu0 }
 0x474   : > { %v6801_v60 = vpop.f32.mrf.mxu1 }
 0x475   : > { %v6802_v10 = vadd.f32 %v6801_v60, %v6800_v5  ;;  %v11232_v48 = vadd.f32 %v5136_v34, %v11083_v37  ;;  %v5315_v5 = vadd.f32 %v5314_v23, %v5284_v25  ;;  %v5247_v49 = vadd.f32 %v5246_v44, %v11219_v52  ;;  %v12045_v34 = vld [vmem:[#allocation29_spill] sm:$0xff] }
 0x476   : > { %v6803_v24 = vpop.f32.mrf.mxu1 }
 0x477   : > { %v5141_v20 = vadd.f32 %v6802_v10, %v5140_v57  ;;  %v5316_v37 = vadd.f32 %v5315_v5, %v5285_v51  ;;  %v5287_v60 = vmul.f32 %v11232_v48, %v11232_v48  ;;  %v5248_v12 = vadd.f32 %v5247_v49, %v11226_v55  ;;  %v7154_v5 = vpop.f32.mrf.mxu0 }
 0x478   : > { %v6804_v42 = vpop.f32.mrf.mxu1 }
 0x479   : > { %v6805_v15 = vadd.f32 %v6804_v42, %v6803_v24  ;;  %v11238_v57 = vadd.f32 %v5141_v20, %v11092_v56  ;;  %v5317_v56 = vadd.f32 %v5316_v37, %v5286_v6  ;;  %v5249_v50 = vadd.f32 %v5248_v12, %v11232_v48 }
 0x47a   : > { %v6806_v62 = vpop.f32.mrf.mxu1 }
 0x47b   : > { %v5144_v11 = vadd.f32 %v6805_v15, %v5143_v35  ;;  %v5318_v18 = vadd.f32 %v5317_v56, %v5287_v60  ;;  %v5250_v42 = vadd.f32 %v5249_v50, %v11238_v57  ;;  %v5172_v56 = vpop.f32.mrf.mxu0 }
 0x47c   : > { %v6807_v19 = vpop.f32.mrf.mxu1 }
 0x47d   : > { %v6808_v8 = vadd.f32 %v6807_v19, %v6806_v62  ;;  %v11245_v26 = vadd.f32 %v5144_v11, %v11097_v1  ;;  %v12046_v11 = vld [vmem:[#allocation50_spill] sm:$0xff] }
 0x47e   : > { %v6809_v63 = vpop.f32.mrf.mxu1 }
 0x47f   : > { %v5149_v45 = vadd.f32 %v11180_v54, %v6808_v8  ;;  %v5288_v54 = vmul.f32 %v11238_v57, %v11238_v57  ;;  %v5289_v1 = vmul.f32 %v11245_v26, %v11245_v26  ;;  %v5251_v36 = vadd.f32 %v5250_v42, %v11245_v26 }
 0x480   : > { %v6810_v21 = vpop.f32.mrf.mxu1 }
 0x481   : > { %v6811_v3 = vadd.f32 %v6810_v21, %v6809_v63  ;;  %v11251_v4 = vadd.f32 %v5149_v45, %v11089_v31  ;;  %v5319_v22 = vadd.f32 %v5318_v18, %v5288_v54 }
 0x482   : > { %v6812_v9 = vpop.f32.mrf.mxu1 }
 0x483   : > { %v5152_v7 = vadd.f32 %v7147_v39, %v6811_v3  ;;  %v5290_v31 = vmul.f32 %v11251_v4, %v11251_v4  ;;  %v5320_v46 = vadd.f32 %v5319_v22, %v5289_v1  ;;  %v5252_v20 = vadd.f32 %v5251_v36, %v11251_v4  ;;  %v7155_v22 = vpop.f32.mrf.mxu0 }
 0x484   : > { %v6813_v24 = vpop.f32.mrf.mxu1 }
 0x485   : > { %v6814_v28 = vadd.f32 %v6813_v24, %v6812_v9  ;;  %v11258_v39 = vadd.f32 %v5152_v7, %v11094_v53  ;;  %v5321_v13 = vadd.f32 %v5320_v46, %v5290_v31  ;;  %v12047_v9 = vld [vmem:[#allocation39_spill] sm:$0xff]  ;;  %v12049_v46 = vld [vmem:[#allocation52_spill] sm:$0xff] }
 0x486   : > { %v6815_v10 = vpop.f32.mrf.mxu1 }
 0x487   : > { %v5157_v16 = vadd.f32 %v6814_v28, %v5156_v61  ;;  %v5291_v53 = vmul.f32 %v11258_v39, %v11258_v39  ;;  %v5253_v23 = vadd.f32 %v5252_v20, %v11258_v39  ;;  %v5175_v20 = vpop.f32.mrf.mxu0 }
 0x488   : > { %v6816_v35 = vpop.f32.mrf.mxu1 }
 0x489   : > { %v11264_v15 = vadd.f32 %v5157_v16, %v12045_v34  ;;  %v6817_v62 = vadd.f32 %v6816_v35, %v6815_v10  ;;  %v5322_v45 = vadd.f32 %v5321_v13, %v5291_v53 }
 0x48a   : > { %v6818_v25 = vpop.f32.mrf.mxu1 }
 0x48b   : > { %v5160_v19 = vadd.f32 %v6817_v62, %v5159_v30  ;;  %v5292_v51 = vmul.f32 %v11264_v15, %v11264_v15  ;;  %v5254_v21 = vadd.f32 %v5253_v23, %v11264_v15 }
 0x48c   : > { %v6819_v8 = vpop.f32.mrf.mxu1 }
 0x48d   : > { %v11273_v63 = vadd.f32 %v5160_v19, %v12046_v11  ;;  %v6820_v44 = vadd.f32 %v6819_v8, %v6818_v25  ;;  %v5323_v37 = vadd.f32 %v5322_v45, %v5292_v51  ;;  %v12050_v11 = vld [vmem:[#allocation53_spill] sm:$0xff]  ;;  %v7158_v45 = vpop.f32.mrf.mxu0 }
 0x48e   : > { %v6821_v6 = vpop.f32.mrf.mxu1 }
 0x48f   : > { %v5293_v49 = vmul.f32 %v11273_v63, %v11273_v63  ;;  %v5165_v3 = vadd.f32 %v7150_v29, %v6820_v44  ;;  %v5255_v60 = vadd.f32 %v5254_v21, %v11273_v63  ;;  %v12048_v29 = vld [vmem:[#allocation45_spill] sm:$0xff] }
 0x490   : > { %v6822_v61 = vpop.f32.mrf.mxu1 }
 0x491   : > { %v11280_v12 = vadd.f32 %v5165_v3, %v12047_v9  ;;  %v6823_v7 = vadd.f32 %v6822_v61, %v6821_v6  ;;  %v5324_v24 = vadd.f32 %v5323_v37, %v5293_v49  ;;  %v12051_v9 = vld [vmem:[#allocation8_spill] sm:$0xff] }
 0x492   : > { %v6824_v54 = vpop.f32.mrf.mxu1 }
 0x493   : > { %v5256_v50 = vadd.f32 %v5255_v60, %v11280_v12  ;;  %v5294_v28 = vmul.f32 %v11280_v12, %v11280_v12  ;;  %v5168_v18 = vadd.f32 %v7151_v2, %v6823_v7 }
 0x494   : > { %v6825_v1 = vpop.f32.mrf.mxu1 }
 0x495   : > { %v5325_v10 = vadd.f32 %v5324_v24, %v5294_v28  ;;  %v11286_v42 = vadd.f32 %v5168_v18, %v12048_v29  ;;  %v6826_v16 = vadd.f32 %v6825_v1, %v6824_v54  ;;  %v5188_v54 = vpop.f32.mrf.mxu0  ;;  %v12052_v29 = vld [vmem:[#allocation9_spill] sm:$0xff] }
 0x496   : > { %v6827_v31 = vpop.f32.mrf.mxu1 }
 0x497   : > { %v5257_v35 = vadd.f32 %v5256_v50, %v11286_v42  ;;  %v5295_v36 = vmul.f32 %v11286_v42, %v11286_v42  ;;  %v5173_v34 = vadd.f32 %v6826_v16, %v5172_v56 }
 0x498   : > { %v6828_v62 = vpop.f32.mrf.mxu1 }
 0x499   : > { %v5326_v30 = vadd.f32 %v5325_v10, %v5295_v36  ;;  %v11292_v25 = vadd.f32 %v5173_v34, %v12049_v46  ;;  %v6829_v2 = vadd.f32 %v6828_v62, %v6827_v31  ;;  %v7159_v31 = vpop.f32.mrf.mxu0 }
 0x49a   : > { %v6830_v53 = vpop.f32.mrf.mxu1 }
 0x49b   : > { %v5258_v19 = vadd.f32 %v5257_v35, %v11292_v25  ;;  %v5296_v13 = vmul.f32 %v11292_v25, %v11292_v25  ;;  %v5176_v8 = vadd.f32 %v6829_v2, %v5175_v20  ;;  %v12053_v2 = vld [vmem:[#allocation63_spill] sm:$0xff] }
 0x49c   : > { %v6831_v23 = vpop.f32.mrf.mxu1 }
 0x49d   : > { %v5327_v51 = vadd.f32 %v5326_v30, %v5296_v13  ;;  %v11298_v44 = vadd.f32 %v5176_v8, %v12050_v11  ;;  %v6832_v6 = vadd.f32 %v6831_v23, %v6830_v53  ;;  %v5191_v53 = vpop.f32.mrf.mxu0 }
 0x49e   : > { %v6833_v21 = vpop.f32.mrf.mxu1 }
 0x49f   : > { %v5259_v49 = vadd.f32 %v5258_v19, %v11298_v44  ;;  %v5297_v3 = vmul.f32 %v11298_v44, %v11298_v44  ;;  %v5181_v61 = vadd.f32 %v7154_v5, %v6832_v6  ;;  %v12054_v6 = vld [vmem:[#allocation20_spill] sm:$0xff] }
 0x4a0   : > { %v6834_v37 = vpop.f32.mrf.mxu1 }
 0x4a1   : > { %v5328_v60 = vadd.f32 %v5327_v51, %v5297_v3  ;;  %v11304_v7 = vadd.f32 %v5181_v61, %v12051_v9  ;;  %v6835_v56 = vadd.f32 %v6834_v37, %v6833_v21 }
 0x4a2   : > { %v6836_v24 = vpop.f32.mrf.mxu1 }
 0x4a3   : > { %v5260_v50 = vadd.f32 %v5259_v49, %v11304_v7  ;;  %v5298_v28 = vmul.f32 %v11304_v7, %v11304_v7  ;;  %v5184_v18 = vadd.f32 %v7155_v22, %v6835_v56 }
 0x4a4   : > { %v6837_v1 = vpop.f32.mrf.mxu1 }
 0x4a5   : > { %v5329_v10 = vadd.f32 %v5328_v60, %v5298_v28  ;;  %v11310_v16 = vadd.f32 %v5184_v18, %v12052_v29  ;;  %v6838_v5 = vadd.f32 %v6837_v1, %v6836_v24  ;;  %v12056_v29 = vld [vmem:[#allocation15_spill] sm:$0xff] }
 0x4a6   : > { %v6839_v35 = vpop.f32.mrf.mxu1 }
 0x4a7   : > { %v5261_v36 = vadd.f32 %v5260_v50, %v11310_v16  ;;  %v5299_v34 = vmul.f32 %v11310_v16, %v11310_v16  ;;  %v5189_v62 = vadd.f32 %v6838_v5, %v5188_v54  ;;  %v12055_v54 = vld [vmem:[#allocation13_spill] sm:$0xff] }
 0x4a8   : > { %v6840_v30 = vpop.f32.mrf.mxu1 }
 0x4a9   : > { %v5330_v46 = vadd.f32 %v5329_v10, %v5299_v34  ;;  %v11316_v20 = vadd.f32 %v5189_v62, %v12053_v2  ;;  %v6841_v22 = vadd.f32 %v6840_v30, %v6839_v35 }
 0x4aa   : > { %v6842_v19 = vpop.f32.mrf.mxu1 }
 0x4ab   : > { %v5262_v13 = vadd.f32 %v5261_v36, %v11316_v20  ;;  %v5300_v8 = vmul.f32 %v11316_v20, %v11316_v20  ;;  %v5192_v23 = vadd.f32 %v6841_v22, %v5191_v53 }
 0x4ac   : > { %v6843_v51 = vpop.f32.mrf.mxu1 }
 0x4ad   : > { %v5331_v11 = vadd.f32 %v5330_v46, %v5300_v8  ;;  %v11322_v21 = vadd.f32 %v5192_v23, %v12054_v6  ;;  %v6844_v49 = vadd.f32 %v6843_v51, %v6842_v19 }
 0x4ae   : > { %v6845_v3 = vpop.f32.mrf.mxu1 }
 0x4af   : > { %v5263_v61 = vadd.f32 %v5262_v13, %v11322_v21  ;;  %v5301_v37 = vmul.f32 %v11322_v21, %v11322_v21  ;;  %v5197_v60 = vadd.f32 %v7158_v45, %v6844_v49 }
 0x4b0   : > { %v6846_v9 = vpop.f32.mrf.mxu1 }
 0x4b1   : > { %v5332_v56 = vadd.f32 %v5331_v11, %v5301_v37  ;;  %v11328_v24 = vadd.f32 %v5197_v60, %v12055_v54  ;;  %v6847_v50 = vadd.f32 %v6846_v9, %v6845_v3 }
 0x4b3   : > { %v5264_v28 = vadd.f32 %v5263_v61, %v11328_v24  ;;  %v5302_v18 = vmul.f32 %v11328_v24, %v11328_v24  ;;  %v5200_v1 = vadd.f32 %v7159_v31, %v6847_v50 }
 0x4b5   : > { %v5333_v10 = vadd.f32 %v5332_v56, %v5302_v18  ;;  %v5234_v5 = vadd.f32 %v5200_v1, %v12056_v29 }
 0x4b7   : > { %v5265_v35 = vadd.f32 %v5264_v28, %v5234_v5  ;;  %v5303_v36 = vmul.f32 %v5234_v5, %v5234_v5 }
 0x4b9   : > { %v5266_v34 = vrot.slane %v5265_v35, 4  ;;  %v5334_v62 = vadd.f32 %v5333_v10, %v5303_v36 }
 0x4bb   : > { %v5267_v45 = vadd.f32 %v5266_v34, %v5265_v35  ;;  %v5335_v30 = vrot.slane %v5334_v62, 4 }
 0x4bd   : > { %v5268_v46 = vrot.slane %v5267_v45, 2  ;;  %v5336_v2 = vadd.f32 %v5335_v30, %v5334_v62 }
 0x4bf   : > { %v5269_v22 = vadd.f32 %v5268_v46, %v5267_v45  ;;  %v5337_v53 = vrot.slane %v5336_v2, 2 }
 0x4c1   : > { %v5270_v19 = vrot.slane %v5269_v22, 1  ;;  %v5338_v13 = vadd.f32 %v5337_v53, %v5336_v2 }
 0x4c3   : > { %v5271_v8 = vadd.f32 %v5270_v19, %v5269_v22  ;;  %v5339_v23 = vrot.slane %v5338_v13, 1 }
 0x4c5   : > { %v5340_v51 = vadd.f32 %v5339_v23, %v5338_v13  ;;  %v11334_v11 = vmul.f32 0.00390625, %v5271_v8 }
 0x4c7   : > { %v5342_v31 = vmul.f32 0.00390625, %v5340_v51  ;;  %v5343_v6 = vmul.f32 %v11334_v11, %v11334_v11  ;;  %v5377_v49 = vsub.f32 %v5234_v5, %v11334_v11  ;;  %v5367_v60 = vsub.f32 %v11273_v63, %v11334_v11  ;;  %v5412_v51 = vld [vmem:[%s7587_s22] sm:$0xff] }
 0x4c8   : > { %v5368_v9 = vsub.f32 %v11280_v12, %v11334_v11  ;;  %v5369_v56 = vsub.f32 %v11286_v42, %v11334_v11  ;;  %v5370_v54 = vsub.f32 %v11292_v25, %v11334_v11  ;;  %v5371_v50 = vsub.f32 %v11298_v44, %v11334_v11  ;;  %v5426_v12 = vld [vmem:[%s7587_s22 + $0x70] sm:$0xff] }
 0x4c9   : > { %v5344_v3 = vsub.f32 %v5342_v31, %v5343_v6  ;;  %v5372_v28 = vsub.f32 %v11304_v7, %v11334_v11  ;;  %v5373_v18 = vsub.f32 %v11310_v16, %v11334_v11  ;;  %v5374_v1 = vsub.f32 %v11316_v20, %v11334_v11  ;;  %v5413_v31 = vld [vmem:[%s7587_s22 + $0x8] sm:$0xff]  ;;  %v5428_v7 = vld [vmem:[%s7587_s22 + $0x80] sm:$0xff] }
 0x4ca   : > { %v5375_v10 = vsub.f32 %v11322_v21, %v11334_v11  ;;  %v5376_v29 = vsub.f32 %v11328_v24, %v11334_v11  ;;  %v5346_v5 = vsub.f32 %v11133_v0, %v11334_v11  ;;  %v5347_v35 = vsub.f32 %v11142_v17, %v11334_v11  ;;  %v5432_v21 = vld [vmem:[%s7587_s22 + $0xa0] sm:$0xff]  ;;  %v5435_v24 = vld [vmem:[%s7587_s22 + $0xb8] sm:$0xff] }
 0x4cb   : > { %v5345_v61 = vmax.f32 %v5344_v3, 0.0  ;;  %v5348_v36 = vsub.f32 %v11145_v27, %v11334_v11  ;;  %v5349_v34 = vsub.f32 %v11150_v41, %v11334_v11  ;;  %v5350_v62 = vsub.f32 %v11159_v14, %v11334_v11 }
 0x4cc   : > { %v5351_v45 = vsub.f32 %v11166_v43, %v11334_v11  ;;  %v5352_v30 = vsub.f32 %v11172_v33, %v11334_v11  ;;  %v5353_v0 = vsub.f32 %v11178_v40, %v11334_v11  ;;  %v5354_v17 = vsub.f32 %v11186_v59, %v11334_v11 }
 0x4cd   : > { %v5378_v37 = vadd.f32 1e-05, %v5345_v61  ;;  %v5355_v27 = vsub.f32 %v11193_v38, %v11334_v11  ;;  %v5356_v41 = vsub.f32 %v11200_v32, %v11334_v11  ;;  %v5357_v14 = vsub.f32 %v11206_v47, %v11334_v11  ;;  %v5443_v32 = vld [vmem:[%s7587_s22 + $0xf8] sm:$0xff] }
 0x4ce   : > { %v5358_v43 = vsub.f32 %v11212_v58, %v11334_v11  ;;  %v5359_v33 = vsub.f32 %v11219_v52, %v11334_v11  ;;  %v5360_v40 = vsub.f32 %v11226_v55, %v11334_v11  ;;  %v5361_v59 = vsub.f32 %v11232_v48, %v11334_v11 }
 0x4cf   : > { %7357 = vrsqrt.f32 %v5378_v37  ;;  %v5362_v38 = vsub.f32 %v11238_v57, %v11334_v11  ;;  %v5363_v47 = vsub.f32 %v11245_v26, %v11334_v11  ;;  %v5364_v58 = vsub.f32 %v11251_v4, %v11334_v11  ;;  %v5415_v37 = vld [vmem:[%s7587_s22 + $0x18] sm:$0xff] }
 0x4d0   : > { %v5365_v52 = vsub.f32 %v11258_v39, %v11334_v11  ;;  %v5366_v55 = vsub.f32 %v11264_v15, %v11334_v11  ;;  %v5414_v15 = vld [vmem:[%s7587_s22 + $0x10] sm:$0xff]  ;;  %v5436_v11 = vld [vmem:[%s7587_s22 + $0xc0] sm:$0xff] }
 0x4dc   : > { %v7358_v46 = vpop.eup %7357 }
 0x4dd   : > { %v5411_v48 = vmul.f32 %v7358_v46, %v5377_v49  ;;  %v5380_v2 = vmul.f32 %v7358_v46, %v5346_v5  ;;  %v5381_v57 = vmul.f32 %v7358_v46, %v5347_v35  ;;  %v5382_v22 = vmul.f32 %v7358_v46, %v5348_v36  ;;  %v5416_v5 = vld [vmem:[%s7587_s22 + $0x20] sm:$0xff]  ;;  %v5417_v35 = vld [vmem:[%s7587_s22 + $0x28] sm:$0xff]  ;;  %v5418_v36 = vld [vmem:[%s7587_s22 + $0x30] sm:$0xff] }
 0x4de   : > { %v5383_v53 = vmul.f32 %v7358_v46, %v5349_v34  ;;  %v5384_v26 = vmul.f32 %v7358_v46, %v5350_v62  ;;  %v5385_v19 = vmul.f32 %v7358_v46, %v5351_v45  ;;  %v5386_v4 = vmul.f32 %v7358_v46, %v5352_v30 }
 0x4df   : > { %v5475_v13 = vadd.f32 %v5443_v32, %v5411_v48  ;;  %v5387_v8 = vmul.f32 %v7358_v46, %v5353_v0  ;;  %v5388_v39 = vmul.f32 %v7358_v46, %v5354_v17  ;;  %v5389_v23 = vmul.f32 %v7358_v46, %v5355_v27  ;;  %v5419_v0 = vld [vmem:[%s7587_s22 + $0x38] sm:$0xff]  ;;  %v5420_v17 = vld [vmem:[%s7587_s22 + $0x40] sm:$0xff]  ;;  %v5421_v27 = vld [vmem:[%s7587_s22 + $0x48] sm:$0xff] }
 0x4e0   : > { %v5390_v6 = vmul.f32 %v7358_v46, %v5356_v41  ;;  %v5391_v49 = vmul.f32 %v7358_v46, %v5357_v14  ;;  %v5392_v3 = vmul.f32 %v7358_v46, %v5358_v43  ;;  %v5393_v61 = vmul.f32 %v7358_v46, %v5359_v33 }
 0x4e1   : > { %5507 = vst [vmem:[%s11411_s29 + $0xf8] sm:$0xff] %v5475_v13  ;;  %v5394_v34 = vmul.f32 %v7358_v46, %v5360_v40  ;;  %v11414_v62 = vmul.f32 %v7358_v46, %v5361_v59  ;;  %v11416_v45 = vmul.f32 %v7358_v46, %v5362_v38  ;;  %v11418_v30 = vmul.f32 %v7358_v46, %v5363_v47  ;;  %v5422_v40 = vld [vmem:[%s7587_s22 + $0x50] sm:$0xff]  ;;  %v5423_v59 = vld [vmem:[%s7587_s22 + $0x58] sm:$0xff]  ;;  %v5424_v38 = vld [vmem:[%s7587_s22 + $0x60] sm:$0xff] }
 0x4e2   : > { %v5398_v41 = vmul.f32 %v7358_v46, %v5364_v58  ;;  %v11423_v14 = vmul.f32 %v7358_v46, %v5365_v52  ;;  %v11425_v43 = vmul.f32 %v7358_v46, %v5366_v55  ;;  %v11430_v33 = vmul.f32 %v7358_v46, %v5367_v60  ;;  %v5425_v58 = vld [vmem:[%s7587_s22 + $0x68] sm:$0xff] }
 0x4e3   : > { %v5402_v32 = vmul.f32 %v7358_v46, %v5368_v9  ;;  %v11441_v47 = vmul.f32 %v7358_v46, %v5369_v56  ;;  %v11446_v63 = vmul.f32 %v7358_v46, %v5370_v54  ;;  %v11451_v60 = vmul.f32 %v7358_v46, %v5371_v50  ;;  %v5427_v9 = vld [vmem:[%s7587_s22 + $0x78] sm:$0xff]  ;;  %v5429_v54 = vld [vmem:[%s7587_s22 + $0x88] sm:$0xff]  ;;  %v5430_v50 = vld [vmem:[%s7587_s22 + $0x90] sm:$0xff] }
 0x4e4   : > { %v11459_v42 = vmul.f32 %v7358_v46, %v5372_v28  ;;  %v11464_v25 = vmul.f32 %v7358_v46, %v5373_v18  ;;  %v11469_v44 = vmul.f32 %v7358_v46, %v5374_v1  ;;  %v11474_v56 = vmul.f32 %v7358_v46, %v5375_v10  ;;  %v5431_v1 = vld [vmem:[%s7587_s22 + $0x98] sm:$0xff]  ;;  %v5433_v10 = vld [vmem:[%s7587_s22 + $0xa8] sm:$0xff] }
 0x4e5   : > { %v11482_v16 = vmul.f32 %v7358_v46, %v5376_v29  ;;  %v5444_v28 = vadd.f32 %v5412_v51, %v5380_v2  ;;  %v5445_v20 = vadd.f32 %v5413_v31, %v5381_v57  ;;  %v5446_v18 = vadd.f32 %v5414_v15, %v5382_v22  ;;  %v5437_v22 = vld [vmem:[%s7587_s22 + $0xc8] sm:$0xff]  ;;  %v5442_v31 = vld [vmem:[%s7587_s22 + $0xf0] sm:$0xff] }
 0x4e6   : > { %12057 = vst [vmem:[#allocation16_spill] sm:$0xff] %v11474_v56  ;;  %v5447_v52 = vadd.f32 %v5415_v37, %v5383_v53  ;;  %v5448_v55 = vadd.f32 %v5416_v5, %v5384_v26  ;;  %v5449_v48 = vadd.f32 %v5417_v35, %v5385_v19  ;;  %v5450_v13 = vadd.f32 %v5418_v36, %v5386_v4  ;;  %v5434_v56 = vld [vmem:[%s7587_s22 + $0xb0] sm:$0xff]  ;;  %v5439_v26 = vld [vmem:[%s7587_s22 + $0xd8] sm:$0xff]  ;;  %v5441_v51 = vld [vmem:[%s7587_s22 + $0xe8] sm:$0xff] }
 0x4e7   : > { %v5451_v29 = vadd.f32 %v5419_v0, %v5387_v8  ;;  %v5452_v46 = vadd.f32 %v5420_v17, %v5388_v39  ;;  %v5453_v2 = vadd.f32 %v5421_v27, %v5389_v23  ;;  %v5454_v57 = vadd.f32 %v5422_v40, %v5390_v6  ;;  %5476 = vst [vmem:[%s11411_s29] sm:$0xff] %v5444_v28  ;;  %v5438_v53 = vld [vmem:[%s7587_s22 + $0xd0] sm:$0xff]  ;;  %v5440_v23 = vld [vmem:[%s7587_s22 + $0xe0] sm:$0xff] }
 0x4e8   : > { %5477 = vst [vmem:[%s11411_s29 + $0x8] sm:$0xff] %v5445_v20  ;;  %5478 = vst [vmem:[%s11411_s29 + $0x10] sm:$0xff] %v5446_v18  ;;  %v5455_v19 = vadd.f32 %v5423_v59, %v5391_v49  ;;  %v5456_v4 = vadd.f32 %v5424_v38, %v5392_v3  ;;  %v5457_v8 = vadd.f32 %v5425_v58, %v5393_v61 }
 0x4e9   : > { %v5458_v39 = vadd.f32 %v5426_v12, %v5394_v34  ;;  %5479 = vst [vmem:[%s11411_s29 + $0x18] sm:$0xff] %v5447_v52  ;;  %5480 = vst [vmem:[%s11411_s29 + $0x20] sm:$0xff] %v5448_v55  ;;  %v5459_v15 = vadd.f32 %v5427_v9, %v11414_v62  ;;  %v5460_v6 = vadd.f32 %v5428_v7, %v11416_v45 }
 0x4ea   : > { %5481 = vst [vmem:[%s11411_s29 + $0x28] sm:$0xff] %v5449_v48  ;;  %5482 = vst [vmem:[%s11411_s29 + $0x30] sm:$0xff] %v5450_v13  ;;  %v5461_v49 = vadd.f32 %v5429_v54, %v11418_v30  ;;  %v5462_v3 = vadd.f32 %v5430_v50, %v5398_v41  ;;  %v5463_v61 = vadd.f32 %v5431_v1, %v11423_v14 }
 0x4eb   : > { %5483 = vst [vmem:[%s11411_s29 + $0x38] sm:$0xff] %v5451_v29  ;;  %5484 = vst [vmem:[%s11411_s29 + $0x40] sm:$0xff] %v5452_v46  ;;  %v5464_v37 = vadd.f32 %v5432_v21, %v11425_v43  ;;  %v5465_v5 = vadd.f32 %v5433_v10, %v11430_v33  ;;  %v5466_v35 = vadd.f32 %v5434_v56, %v5402_v32 }
 0x4ec   : > { %5485 = vst [vmem:[%s11411_s29 + $0x48] sm:$0xff] %v5453_v2  ;;  %5486 = vst [vmem:[%s11411_s29 + $0x50] sm:$0xff] %v5454_v57  ;;  %v5467_v36 = vadd.f32 %v5435_v24, %v11441_v47  ;;  %v5468_v34 = vadd.f32 %v5436_v11, %v11446_v63  ;;  %v5469_v62 = vadd.f32 %v5437_v22, %v11451_v60 }
 0x4ed   : > { %5487 = vst [vmem:[%s11411_s29 + $0x58] sm:$0xff] %v5455_v19  ;;  %5488 = vst [vmem:[%s11411_s29 + $0x60] sm:$0xff] %v5456_v4  ;;  %v5470_v45 = vadd.f32 %v5438_v53, %v11459_v42  ;;  %v5471_v30 = vadd.f32 %v5439_v26, %v11464_v25  ;;  %v5472_v0 = vadd.f32 %v5440_v23, %v11469_v44  ;;  %v12058_v17 = vld [vmem:[#allocation16_spill] sm:$0xff] }
 0x4ee   : > { %5489 = vst [vmem:[%s11411_s29 + $0x68] sm:$0xff] %v5457_v8  ;;  %5490 = vst [vmem:[%s11411_s29 + $0x70] sm:$0xff] %v5458_v39  ;;  %v5473_v27 = vadd.f32 %v5441_v51, %v12058_v17  ;;  %v5474_v41 = vadd.f32 %v5442_v31, %v11482_v16 }
 0x4ef   : > { %5491 = vst [vmem:[%s11411_s29 + $0x78] sm:$0xff] %v5459_v15  ;;  %5492 = vst [vmem:[%s11411_s29 + $0x80] sm:$0xff] %v5460_v6 }
 0x4f0   : > { %5493 = vst [vmem:[%s11411_s29 + $0x88] sm:$0xff] %v5461_v49  ;;  %5494 = vst [vmem:[%s11411_s29 + $0x90] sm:$0xff] %v5462_v3 }
 0x4f1   : > { %5495 = vst [vmem:[%s11411_s29 + $0x98] sm:$0xff] %v5463_v61  ;;  %5496 = vst [vmem:[%s11411_s29 + $0xa0] sm:$0xff] %v5464_v37 }
 0x4f2   : > { %5497 = vst [vmem:[%s11411_s29 + $0xa8] sm:$0xff] %v5465_v5  ;;  %5498 = vst [vmem:[%s11411_s29 + $0xb0] sm:$0xff] %v5466_v35 }
 0x4f3   : > { %5499 = vst [vmem:[%s11411_s29 + $0xb8] sm:$0xff] %v5467_v36  ;;  %5500 = vst [vmem:[%s11411_s29 + $0xc0] sm:$0xff] %v5468_v34 }
 0x4f4   : > { %5501 = vst [vmem:[%s11411_s29 + $0xc8] sm:$0xff] %v5469_v62  ;;  %5502 = vst [vmem:[%s11411_s29 + $0xd0] sm:$0xff] %v5470_v45 }
 0x4f5   : > { %5503 = vst [vmem:[%s11411_s29 + $0xd8] sm:$0xff] %v5471_v30  ;;  %5504 = vst [vmem:[%s11411_s29 + $0xe0] sm:$0xff] %v5472_v0 }
 0x4f6   : > { %5505 = vst [vmem:[%s11411_s29 + $0xe8] sm:$0xff] %v5473_v27  ;;  %5506 = vst [vmem:[%s11411_s29 + $0xf0] sm:$0xff] %v5474_v41 }
 0x4f7   : > { %7400 = shalt.err (!%p7397_p0)
}
 0x4f8   : > { %s7401_s10 = scalar_lea.hbm %s11532_s30, 4096  ;;  %s7405_s12 = scalar_lea.hbm %s11599_s4, 8192 }
 0x4f9   : > { %p7402_p2 = scmp.ne.s32.totalorder %s11532_s30, %s7401_s10  ;;  %p7406_p3 = scmp.lt.s32.totalorder %s11532_s30, %s11599_s4 }
 0x4fa   : > { %p7407_p6 = scmp.lt.s32.totalorder %s7405_s12, %s7401_s10 }
 0x4fb   : > { %p7403_p9 = pnand %p7402_p2, %p12059_p13 }
 0x4fc   : > { %p7408_p11 = por %p7407_p6, %p7406_p3 }
 0x4fd   : > { %p7404_p1 = pneg %p7403_p9 }
 0x4ff   : > { %p7409_p12 = pnand %p7408_p11, %p7404_p1 }
 0x501   : > { %7412 = shalt.err (!%p7409_p12)
}
 0x502   : > { %s7457_s29 = smov 128   ;;  %s7458_s14 = smov 8  }
 0x503   : > { %7163 = dma.vmem_to_hbm [thread:$0]  (%p12059_p13), %s11536_s26, 4096, %s11532_s30, %s5509_s19, %s7457_s29, %s7457_s29, %s7458_s14  }
 0x504 PF: > { %s5537_s22 = sand.u32 1, %s7439_s15   ;;  %p12060_p4 = scmp.ne.s32.totalorder %s11719_s28, 0 }
 0x505   : > { %p12061_p5 = scmp.ge.s32.totalorder %s7451_s18, 2  ;;  %s5538_s5 = scalar_lea.sflag [#allocation4], %s5537_s22 }
 0x507   : > { %p7170_p7 = pnand %p12061_p5, %p12060_p4 }
 0x509   : > { %p7171_p8 = pneg %p7170_p7 }
 0x50b   : > { %7434 = dma.done.wait (%p7171_p8), %s5538_s5, 4096  }
 0x50c   : > { %7436 = vsyncadd (%p7171_p8), %s5538_s5, 4294963200  ;;  %p17_p10 = scmp.ge.s32.totalorder %s7509_s21, 4   ;;  %s12062_s15 = smov %s7443_s16 }
 0x50d   : > { %s12063_s16 = smov %s7447_s17  ;;  %s12064_s17 = smov %s7521_s24 }
 0x50e   : > { %s12065_s18 = smov %s7509_s21  ;;  %19 = sbr.rel (!%p17_p10) target bundleno = 5 (0x5), region = 90 }
 0x513   :  { %5543 = vsyncpa [#allocation3], 1 }
 0x514   :  { %5545 = vsyncpa [#allocation3 + $0x1], 1 }
 0x515   :  { %5546 = vsyncpa [#allocation4], 1 }
 0x516   :  { %5548 = vsyncpa [#allocation4 + $0x1], 1 }

</bundles_post_ra>
